<compile_context>
chip_gen: v7x
topology: tpu7x:2x2x1
jax: 0.10.0
libtpu: 0.0.40
codegen_flags: <defaults>
</compile_context>

<pallas_src>
import functools

import jax
import jax.numpy as jnp
from jax.experimental import pallas as pl
from jax.experimental.pallas import tpu as pltpu


def _vmem_limit_bytes():
    """Generation-aware scoped-VMEM limit (keeps headroom on v7x's 64 MiB)."""
    cap = 128 * 1024 * 1024
    try:
        cap = int(getattr(pltpu.get_tpu_info(), "vmem_capacity_bytes", cap))
    except Exception:
        pass
    return min(cap * 3 // 4, 96 * 1024 * 1024)


_VMEM_LIMIT = _vmem_limit_bytes()


# ----------------------------------------------------------------------------
# Pallas kernels
# ----------------------------------------------------------------------------
def _gemm_bias_act_kernel(a_ref, w_ref, b_ref, o_ref, *, relu):
    # a: (tm, K) bf16, w: (K, N) bf16, b: (1, N) f32, out: (tm, N)
    acc = jnp.dot(a_ref[...], w_ref[...], preferred_element_type=jnp.float32)
    acc = acc + b_ref[...]
    if relu:
        acc = jnp.maximum(acc, 0.0)
    o_ref[...] = acc.astype(o_ref.dtype)


def _head_kernel(a_ref, w1_ref, b1_ref, w2_ref, b2_ref, o_ref):
    # Fused: out = relu(a @ w1 + b1) @ w2 + b2  (h stays in VMEM/vregs)
    h = jnp.dot(a_ref[...], w1_ref[...], preferred_element_type=jnp.float32)
    h = jnp.maximum(h + b1_ref[...], 0.0)
    out = jnp.dot(h.astype(w2_ref.dtype), w2_ref[...],
                  preferred_element_type=jnp.float32)
    o_ref[...] = (out + b2_ref[...]).astype(o_ref.dtype)


def _round_up(x, m):
    return (x + m - 1) // m * m


def _choose_tile_m(m, cap):
    """Row tile: >=2 grid steps when m allows (v7x megacore), multiple of 8,
    capped for VMEM/vreg pressure.  The last block may be ragged; its OOB rows
    are garbage and are dropped by the clipped output store (rows are
    independent, so this is safe)."""
    if m <= 8:
        return m
    tm = min(cap, _round_up(pl.cdiv(m, 2), 8))
    return min(tm, m)


def gemm_bias_act(a, w, b, *, relu, out_dtype, tile_m=2048):
    """a: (M, K) bf16, w: (K, N) bf16 (N % 128 == 0), b: (1, N) f32."""
    m, k = a.shape
    k2, n = w.shape
    assert k == k2 and n % 128 == 0, (a.shape, w.shape)
    tm = _choose_tile_m(m, tile_m)
    grid = (pl.cdiv(m, tm),)
    return pl.pallas_call(
        functools.partial(_gemm_bias_act_kernel, relu=relu),
        out_shape=jax.ShapeDtypeStruct((m, n), out_dtype),
        grid=grid,
        in_specs=[
            pl.BlockSpec((tm, k), lambda i: (i, 0)),
            pl.BlockSpec((k, n), lambda i: (0, 0)),   # grid-invariant weight
            pl.BlockSpec((1, n), lambda i: (0, 0)),   # grid-invariant bias
        ],
        out_specs=pl.BlockSpec((tm, n), lambda i: (i, 0)),
        compiler_params=pltpu.CompilerParams(
            dimension_semantics=("parallel",),
            vmem_limit_bytes=_VMEM_LIMIT),
    )(a, w, b)


def head_fused(a, w1, b1, w2, b2, *, tile_m=128):
    """Fused lin1+ReLU+lin2: a (M,K1) bf16, w1 (K1,H), w2 (H,N); N%128==0."""
    m, k1 = a.shape
    _, hdim = w1.shape
    _, n = w2.shape
    tm = _choose_tile_m(m, tile_m)
    grid = (pl.cdiv(m, tm),)
    return pl.pallas_call(
        _head_kernel,
        out_shape=jax.ShapeDtypeStruct((m, n), jnp.float32),
        grid=grid,
        in_specs=[
            pl.BlockSpec((tm, k1), lambda i: (i, 0)),
            pl.BlockSpec((k1, hdim), lambda i: (0, 0)),
            pl.BlockSpec((1, hdim), lambda i: (0, 0)),
            pl.BlockSpec((hdim, n), lambda i: (0, 0)),
            pl.BlockSpec((1, n), lambda i: (0, 0)),
        ],
        out_specs=pl.BlockSpec((tm, n), lambda i: (i, 0)),
        compiler_params=pltpu.CompilerParams(
            dimension_semantics=("parallel",),
            vmem_limit_bytes=_VMEM_LIMIT),
    )(a, w1, b1, w2, b2)


# ----------------------------------------------------------------------------
# Glue: NHWC im2col (patch last-dim ordering = (kh, kw, c))
# ----------------------------------------------------------------------------
def im2col_nhwc(x, ksize, stride):
    """x: (B, H, W, C) -> (B*OH*OW, ksize*ksize*C), plus (OH, OW)."""
    b, h, w, c = x.shape
    oh = (h - ksize) // stride + 1
    ow = (w - ksize) // stride + 1
    cols = []
    for kh in range(ksize):
        for kw in range(ksize):
            cols.append(x[:, kh:kh + stride * oh:stride,
                             kw:kw + stride * ow:stride, :])
    p = jnp.concatenate(cols, axis=-1)          # (B, OH, OW, K*K*C)
    return p.reshape(b * oh * ow, ksize * ksize * c), oh, ow


# ----------------------------------------------------------------------------
# Parameters: module-style init, then one-time permutation/padding to the
# kernel-friendly (NHWC, lane-padded-N, unpadded-K, bf16) layout.
# ----------------------------------------------------------------------------
def kaiming_uniform(key, shape, fan_in, a=2.0):
    bound = float(jnp.sqrt(6.0 / ((1.0 + a * a) * fan_in)))
    return jax.random.uniform(key, shape, jnp.float32, -bound, bound)


def init_params(key, nch, n_actions):
    # Conv output sizes for 84x84 input: 84 -(k8,s4)-> 20 -(k4,s2)-> 9
    linear_size = 32 * 9 * 9  # 2592, matches torch.flatten of cnn(rand(1,nch,84,84))
    k = jax.random.split(key, 4)
    return {
        "conv1_w": kaiming_uniform(k[0], (16, nch, 8, 8), nch * 8 * 8),
        "conv1_b": jnp.full((16,), 0.01, jnp.float32),
        "conv2_w": kaiming_uniform(k[1], (32, 16, 4, 4), 16 * 4 * 4),
        "conv2_b": jnp.full((32,), 0.01, jnp.float32),
        "lin1_w": kaiming_uniform(k[2], (256, linear_size), linear_size),
        "lin1_b": jnp.full((256,), 0.01, jnp.float32),
        "lin2_w": kaiming_uniform(k[3], (n_actions, 256), 256),
        "lin2_b": jnp.full((n_actions,), 0.01, jnp.float32),
    }


def prepare_params(params, nch, n_actions):
    """One-time host-side permutation/padding. Output (N) dims are zero-padded
    to 128 lanes for lane-dense stores; contraction (K) dims are NOT padded --
    the padded output channels are sliced off in the forward pass before they
    feed the next layer. Exact rewrite of the PyTorch-layout weights."""
    cp = 128          # padded output-channel count for conv1/conv2
    nap = 128         # padded action count
    # conv1: (16, nch, 8, 8) -> ((kh,kw,c) = 8*8*nch, 16) -> pad N to 128
    w1 = params["conv1_w"].transpose(2, 3, 1, 0).reshape(8 * 8 * nch, 16)
    w1 = jnp.pad(w1, ((0, 0), (0, cp - 16))).astype(jnp.bfloat16)
    b1 = jnp.pad(params["conv1_b"], (0, cp - 16)).reshape(1, cp).astype(jnp.float32)
    # conv2: (32, 16, 4, 4) -> (4*4*16 = 256, 32) -> pad N to 128 (K unpadded)
    w2 = params["conv2_w"].transpose(2, 3, 1, 0).reshape(4 * 4 * 16, 32)
    w2 = jnp.pad(w2, ((0, 0), (0, cp - 32))).astype(jnp.bfloat16)
    b2 = jnp.pad(params["conv2_b"], (0, cp - 32)).reshape(1, cp).astype(jnp.float32)
    # lin1: PyTorch flatten order is (C=32, H=9, W=9); ours is (H, W, C=32)
    l1 = params["lin1_w"].reshape(256, 32, 9, 9).transpose(0, 2, 3, 1)   # (256,9,9,32)
    l1 = l1.reshape(256, 9 * 9 * 32).T.astype(jnp.bfloat16)              # (2592, 256)
    lb1 = params["lin1_b"].reshape(1, 256).astype(jnp.float32)
    # lin2: (n_actions, 256) -> (256, 128)
    l2 = jnp.pad(params["lin2_w"].T, ((0, 0), (0, nap - n_actions))).astype(jnp.bfloat16)
    lb2 = jnp.pad(params["lin2_b"], (0, nap - n_actions)).reshape(1, nap).astype(jnp.float32)
    return {"c1_w": w1, "c1_b": b1, "c2_w": w2, "c2_b": b2,
            "l1_w": l1, "l1_b": lb1, "l2_w": l2, "l2_b": lb2}


# ----------------------------------------------------------------------------
# Forward: Conv(8,4)+ReLU -> Conv(4,2)+ReLU -> flatten -> [FC256+ReLU -> FC]
# ----------------------------------------------------------------------------
def minh_dqn_forward(img, prep, n_actions):
    b = img.shape[0]
    x = jnp.transpose(img, (0, 2, 3, 1)).astype(jnp.bfloat16)      # NCHW -> NHWC once

    # conv1: (B,84,84,nch) -> (B*400, 128); lane-dense store, real channels = :16
    p1, oh1, ow1 = im2col_nhwc(x, ksize=8, stride=4)               # (B*400, 64*nch)
    h1 = gemm_bias_act(p1, prep["c1_w"], prep["c1_b"],
                       relu=True, out_dtype=jnp.bfloat16)

    # Drop padded channels BEFORE they become conv2's K (2048 -> 256).
    h1 = h1.reshape(b, oh1, ow1, 128)[..., :16]

    # conv2: (B,20,20,16) -> (B*81, 128); real channels = :32
    p2, oh2, ow2 = im2col_nhwc(h1, ksize=4, stride=2)              # (B*81, 256)
    h2 = gemm_bias_act(p2, prep["c2_w"], prep["c2_b"],
                       relu=True, out_dtype=jnp.bfloat16)

    # Drop padded channels BEFORE the flatten feeding lin1 (10368 -> 2592).
    flat = h2.reshape(b, oh2 * ow2, 128)[..., :32].reshape(b, oh2 * ow2 * 32)

    # Fused head: lin1 + ReLU + lin2, action lanes padded to 128.
    q = head_fused(flat, prep["l1_w"], prep["l1_b"], prep["l2_w"], prep["l2_b"])
    return q[:, :n_actions]


# ----------------------------------------------------------------------------
# Pure-JAX f32 reference (same math as the PyTorch module)
# ----------------------------------------------------------------------------
def reference_forward(img, params):
    dn = ("NCHW", "OIHW", "NCHW")
    y = jax.lax.conv_general_dilated(img, params["conv1_w"], (4, 4), "VALID",
                                     dimension_numbers=dn)
    y = jax.nn.relu(y + params["conv1_b"][None, :, None, None])
    y = jax.lax.conv_general_dilated(y, params["conv2_w"], (2, 2), "VALID",
                                     dimension_numbers=dn)
    y = jax.nn.relu(y + params["conv2_b"][None, :, None, None])
    flat = y.reshape(y.shape[0], -1)                 # (C,H,W) flatten, as torch
    h = jax.nn.relu(flat @ params["lin1_w"].T + params["lin1_b"])
    return h @ params["lin2_w"].T + params["lin2_b"]


if __name__ == "__main__":
    # Spatial size must be 84x84: the module derives linear_size from it.
    nch, n_actions, batch = 4, 6, 2

    key = jax.random.PRNGKey(0)
    pkey, xkey = jax.random.split(key)
    params = init_params(pkey, nch, n_actions)
    prep = prepare_params(params, nch, n_actions)
    img = jax.random.uniform(xkey, (batch, nch, 84, 84), jnp.float32)

    fwd = jax.jit(minh_dqn_forward, static_argnames=("n_actions",))
    q = jax.block_until_ready(fwd(img, prep, n_actions=n_actions))
    assert q.shape == (batch, n_actions), q.shape
    assert bool(jnp.all(jnp.isfinite(q)))

    # bf16-tolerance check vs f32 reference (activations/weights go through the
    # MXU in bf16 with f32 accumulation).
    q_ref = jax.jit(reference_forward)(img, params)
    max_err = float(jnp.max(jnp.abs(q - q_ref)))
    assert bool(jnp.allclose(q, q_ref, rtol=5e-2, atol=5e-2)), max_err
    print("KERNEL_OK")
</pallas_src>

<mosaic_0001>
module attributes {stable_mosaic.version = 11 : i64} {
  func.func @_gemm_bias_act_kernel(%arg0: i32, %arg1: memref<400x256xbf16, #tpu.memory_space<vmem>>, %arg2: memref<256x128xbf16, #tpu.memory_space<vmem>>, %arg3: memref<1x128xf32, #tpu.memory_space<vmem>>, %arg4: memref<400x128xbf16, #tpu.memory_space<vmem>>) attributes {dimension_semantics = [#tpu.dimension_semantics<parallel>], iteration_bounds = array<i64: 2>, scalar_prefetch = 0 : i64, scratch_operands = 0 : i64, tpu.core_type = #tpu.core_type<tc>, window_params = [{transform_indices = @transform_0, window_bounds = array<i64: 400, 256>}, {pipeline_mode = #tpu.pipeline_mode<synchronous>, transform_indices = @transform_1, window_bounds = array<i64: 256, 128>}, {pipeline_mode = #tpu.pipeline_mode<synchronous>, transform_indices = @transform_2, window_bounds = array<i64: 1, 128>}, {transform_indices = @transform_3, window_bounds = array<i64: 400, 128>}]} {
    %c0 = arith.constant 0 : index
    %c0_0 = arith.constant 0 : index
    %0 = vector.load %arg1[%c0, %c0_0] : memref<400x256xbf16, #tpu.memory_space<vmem>>, vector<400x256xbf16>
    %c0_1 = arith.constant 0 : index
    %c0_2 = arith.constant 0 : index
    %1 = vector.load %arg2[%c0_1, %c0_2] : memref<256x128xbf16, #tpu.memory_space<vmem>>, vector<256x128xbf16>
    %cst = arith.constant dense<0.000000e+00> : vector<400x128xf32>
    %2 = tpu.matmul %0, %1, %cst {dimension_numbers = #tpu.dot_dimension_numbers<[1], [0], [0], [1], [0, 0, 1, 1], [], []>} : vector<400x256xbf16>, vector<256x128xbf16>, vector<400x128xf32> -> vector<400x128xf32>
    %c0_3 = arith.constant 0 : index
    %c0_4 = arith.constant 0 : index
    %3 = vector.load %arg3[%c0_3, %c0_4] : memref<1x128xf32, #tpu.memory_space<vmem>>, vector<1x128xf32>
    %4 = vector.broadcast %3 : vector<1x128xf32> to vector<400x128xf32>
    %5 = arith.addf %2, %4 : vector<400x128xf32>
    %cst_5 = arith.constant 0.000000e+00 : f32
    %6 = vector.broadcast %cst_5 : f32 to vector<400x128xf32>
    %7 = arith.maximumf %5, %6 : vector<400x128xf32>
    %8 = arith.truncf %7 : vector<400x128xf32> to vector<400x128xbf16>
    %c0_6 = arith.constant 0 : index
    %c0_7 = arith.constant 0 : index
    %9 = vector.load %arg4[%c0_6, %c0_7] : memref<400x128xbf16, #tpu.memory_space<vmem>>, vector<400x128xbf16>
    tpu.vector_store %arg4[%c0_6, %c0_7], %8 {strides = array<i32>} : memref<400x128xbf16, #tpu.memory_space<vmem>>, vector<400x128xbf16>,
    return
  }
  func.func @transform_0(%arg0: i32) -> (i32, i32) {
    %c0_i32 = arith.constant 0 : i32
    %c0_i32_0 = arith.constant 0 : i32
    return %arg0, %c0_i32 : i32, i32
  }
  func.func @transform_1(%arg0: i32) -> (i32, i32) {
    %c0_i32 = arith.constant 0 : i32
    %c0_i32_0 = arith.constant 0 : i32
    %c0_i32_1 = arith.constant 0 : i32
    return %c0_i32, %c0_i32_0 : i32, i32
  }
  func.func @transform_2(%arg0: i32) -> (i32, i32) {
    %c0_i32 = arith.constant 0 : i32
    %c0_i32_0 = arith.constant 0 : i32
    %c0_i32_1 = arith.constant 0 : i32
    return %c0_i32, %c0_i32_0 : i32, i32
  }
  func.func @transform_3(%arg0: i32) -> (i32, i32) {
    %c0_i32 = arith.constant 0 : i32
    %c0_i32_0 = arith.constant 0 : i32
    return %arg0, %c0_i32 : i32, i32
  }
}

module attributes {stable_mosaic.version = 11 : i64} {
  func.func @_gemm_bias_act_kernel(%arg0: i32, %arg1: memref<88x256xbf16, #tpu.memory_space<vmem>>, %arg2: memref<256x128xbf16, #tpu.memory_space<vmem>>, %arg3: memref<1x128xf32, #tpu.memory_space<vmem>>, %arg4: memref<88x128xbf16, #tpu.memory_space<vmem>>) attributes {dimension_semantics = [#tpu.dimension_semantics<parallel>], iteration_bounds = array<i64: 2>, scalar_prefetch = 0 : i64, scratch_operands = 0 : i64, tpu.core_type = #tpu.core_type<tc>, window_params = [{transform_indices = @transform_0, window_bounds = array<i64: 88, 256>}, {pipeline_mode = #tpu.pipeline_mode<synchronous>, transform_indices = @transform_1, window_bounds = array<i64: 256, 128>}, {pipeline_mode = #tpu.pipeline_mode<synchronous>, transform_indices = @transform_2, window_bounds = array<i64: 1, 128>}, {transform_indices = @transform_3, window_bounds = array<i64: 88, 128>}]} {
    %c0 = arith.constant 0 : index
    %c0_0 = arith.constant 0 : index
    %0 = vector.load %arg1[%c0, %c0_0] : memref<88x256xbf16, #tpu.memory_space<vmem>>, vector<88x256xbf16>
    %c0_1 = arith.constant 0 : index
    %c0_2 = arith.constant 0 : index
    %1 = vector.load %arg2[%c0_1, %c0_2] : memref<256x128xbf16, #tpu.memory_space<vmem>>, vector<256x128xbf16>
    %cst = arith.constant dense<0.000000e+00> : vector<88x128xf32>
    %2 = tpu.matmul %0, %1, %cst {dimension_numbers = #tpu.dot_dimension_numbers<[1], [0], [0], [1], [0, 0, 1, 1], [], []>} : vector<88x256xbf16>, vector<256x128xbf16>, vector<88x128xf32> -> vector<88x128xf32>
    %c0_3 = arith.constant 0 : index
    %c0_4 = arith.constant 0 : index
    %3 = vector.load %arg3[%c0_3, %c0_4] : memref<1x128xf32, #tpu.memory_space<vmem>>, vector<1x128xf32>
    %4 = vector.broadcast %3 : vector<1x128xf32> to vector<88x128xf32>
    %5 = arith.addf %2, %4 : vector<88x128xf32>
    %cst_5 = arith.constant 0.000000e+00 : f32
    %6 = vector.broadcast %cst_5 : f32 to vector<88x128xf32>
    %7 = arith.maximumf %5, %6 : vector<88x128xf32>
    %8 = arith.truncf %7 : vector<88x128xf32> to vector<88x128xbf16>
    %c0_6 = arith.constant 0 : index
    %c0_7 = arith.constant 0 : index
    %9 = vector.load %arg4[%c0_6, %c0_7] : memref<88x128xbf16, #tpu.memory_space<vmem>>, vector<88x128xbf16>
    tpu.vector_store %arg4[%c0_6, %c0_7], %8 {strides = array<i32>} : memref<88x128xbf16, #tpu.memory_space<vmem>>, vector<88x128xbf16>,
    return
  }
  func.func @transform_0(%arg0: i32) -> (i32, i32) {
    %c0_i32 = arith.constant 0 : i32
    %c0_i32_0 = arith.constant 0 : i32
    return %arg0, %c0_i32 : i32, i32
  }
  func.func @transform_1(%arg0: i32) -> (i32, i32) {
    %c0_i32 = arith.constant 0 : i32
    %c0_i32_0 = arith.constant 0 : i32
    %c0_i32_1 = arith.constant 0 : i32
    return %c0_i32, %c0_i32_0 : i32, i32
  }
  func.func @transform_2(%arg0: i32) -> (i32, i32) {
    %c0_i32 = arith.constant 0 : i32
    %c0_i32_0 = arith.constant 0 : i32
    %c0_i32_1 = arith.constant 0 : i32
    return %c0_i32, %c0_i32_0 : i32, i32
  }
  func.func @transform_3(%arg0: i32) -> (i32, i32) {
    %c0_i32 = arith.constant 0 : i32
    %c0_i32_0 = arith.constant 0 : i32
    return %arg0, %c0_i32 : i32, i32
  }
}

module attributes {stable_mosaic.version = 11 : i64} {
  func.func @_head_kernel(%arg0: i32, %arg1: memref<2x2592xbf16, #tpu.memory_space<vmem>>, %arg2: memref<2592x256xbf16, #tpu.memory_space<vmem>>, %arg3: memref<1x256xf32, #tpu.memory_space<vmem>>, %arg4: memref<256x128xbf16, #tpu.memory_space<vmem>>, %arg5: memref<1x128xf32, #tpu.memory_space<vmem>>, %arg6: memref<2x128xf32, #tpu.memory_space<vmem>>) attributes {dimension_semantics = [#tpu.dimension_semantics<parallel>], iteration_bounds = array<i64: 1>, scalar_prefetch = 0 : i64, scratch_operands = 0 : i64, tpu.core_type = #tpu.core_type<tc>, window_params = [{transform_indices = @transform_0, window_bounds = array<i64: 2, 2592>}, {pipeline_mode = #tpu.pipeline_mode<synchronous>, transform_indices = @transform_1, window_bounds = array<i64: 2592, 256>}, {pipeline_mode = #tpu.pipeline_mode<synchronous>, transform_indices = @transform_2, window_bounds = array<i64: 1, 256>}, {pipeline_mode = #tpu.pipeline_mode<synchronous>, transform_indices = @transform_3, window_bounds = array<i64: 256, 128>}, {pipeline_mode = #tpu.pipeline_mode<synchronous>, transform_indices = @transform_4, window_bounds = array<i64: 1, 128>}, {transform_indices = @transform_5, window_bounds = array<i64: 2, 128>}]} {
    %c0 = arith.constant 0 : index
    %c0_0 = arith.constant 0 : index
    %0 = vector.load %arg1[%c0, %c0_0] : memref<2x2592xbf16, #tpu.memory_space<vmem>>, vector<2x2592xbf16>
    %c0_1 = arith.constant 0 : index
    %c0_2 = arith.constant 0 : index
    %1 = vector.load %arg2[%c0_1, %c0_2] : memref<2592x256xbf16, #tpu.memory_space<vmem>>, vector<2592x256xbf16>
    %cst = arith.constant dense<0.000000e+00> : vector<2x256xf32>
    %2 = tpu.matmul %0, %1, %cst {dimension_numbers = #tpu.dot_dimension_numbers<[1], [0], [0], [1], [0, 0, 1, 1], [], []>} : vector<2x2592xbf16>, vector<2592x256xbf16>, vector<2x256xf32> -> vector<2x256xf32>
    %c0_3 = arith.constant 0 : index
    %c0_4 = arith.constant 0 : index
    %3 = vector.load %arg3[%c0_3, %c0_4] : memref<1x256xf32, #tpu.memory_space<vmem>>, vector<1x256xf32>
    %4 = vector.broadcast %3 : vector<1x256xf32> to vector<2x256xf32>
    %5 = arith.addf %2, %4 : vector<2x256xf32>
    %cst_5 = arith.constant 0.000000e+00 : f32
    %6 = vector.broadcast %cst_5 : f32 to vector<2x256xf32>
    %7 = arith.maximumf %5, %6 : vector<2x256xf32>
    %8 = arith.truncf %7 : vector<2x256xf32> to vector<2x256xbf16>
    %c0_6 = arith.constant 0 : index
    %c0_7 = arith.constant 0 : index
    %9 = vector.load %arg4[%c0_6, %c0_7] : memref<256x128xbf16, #tpu.memory_space<vmem>>, vector<256x128xbf16>
    %cst_8 = arith.constant dense<0.000000e+00> : vector<2x128xf32>
    %10 = tpu.matmul %8, %9, %cst_8 {dimension_numbers = #tpu.dot_dimension_numbers<[1], [0], [0], [1], [0, 0, 1, 1], [], []>} : vector<2x256xbf16>, vector<256x128xbf16>, vector<2x128xf32> -> vector<2x128xf32>
    %c0_9 = arith.constant 0 : index
    %c0_10 = arith.constant 0 : index
    %11 = vector.load %arg5[%c0_9, %c0_10] : memref<1x128xf32, #tpu.memory_space<vmem>>, vector<1x128xf32>
    %12 = vector.broadcast %11 : vector<1x128xf32> to vector<2x128xf32>
    %13 = arith.addf %10, %12 : vector<2x128xf32>
    %c0_11 = arith.constant 0 : index
    %c0_12 = arith.constant 0 : index
    %14 = vector.load %arg6[%c0_11, %c0_12] : memref<2x128xf32, #tpu.memory_space<vmem>>, vector<2x128xf32>
    tpu.vector_store %arg6[%c0_11, %c0_12], %13 {strides = array<i32>} : memref<2x128xf32, #tpu.memory_space<vmem>>, vector<2x128xf32>,
    return
  }
  func.func @transform_0(%arg0: i32) -> (i32, i32) {
    %c0_i32 = arith.constant 0 : i32
    %c0_i32_0 = arith.constant 0 : i32
    return %arg0, %c0_i32 : i32, i32
  }
  func.func @transform_1(%arg0: i32) -> (i32, i32) {
    %c0_i32 = arith.constant 0 : i32
    %c0_i32_0 = arith.constant 0 : i32
    %c0_i32_1 = arith.constant 0 : i32
    return %c0_i32, %c0_i32_0 : i32, i32
  }
  func.func @transform_2(%arg0: i32) -> (i32, i32) {
    %c0_i32 = arith.constant 0 : i32
    %c0_i32_0 = arith.constant 0 : i32
    %c0_i32_1 = arith.constant 0 : i32
    return %c0_i32, %c0_i32_0 : i32, i32
  }
  func.func @transform_3(%arg0: i32) -> (i32, i32) {
    %c0_i32 = arith.constant 0 : i32
    %c0_i32_0 = arith.constant 0 : i32
    %c0_i32_1 = arith.constant 0 : i32
    return %c0_i32, %c0_i32_0 : i32, i32
  }
  func.func @transform_4(%arg0: i32) -> (i32, i32) {
    %c0_i32 = arith.constant 0 : i32
    %c0_i32_0 = arith.constant 0 : i32
    %c0_i32_1 = arith.constant 0 : i32
    return %c0_i32, %c0_i32_0 : i32, i32
  }
  func.func @transform_5(%arg0: i32) -> (i32, i32) {
    %c0_i32 = arith.constant 0 : i32
    %c0_i32_0 = arith.constant 0 : i32
    return %arg0, %c0_i32 : i32, i32
  }
}

</mosaic_0001>

<bundles_post_ra>
// kernel: minh_dqn_forward.3
= control target key start
LH: loop header
LB: loop body
LE: loop exit
PB: predicated region body
PF: predicated region fallthrough
CT: control target
= control target key end

     0   :  { %8 = vsyncpa [#allocation3], 0  ;;  %s2416_s0 = inlined_call_operand.hbm [shape: bf16[800,256], index: 0, kind: input, shape index: {}]   ;;  %s2417_s1 = inlined_call_operand.hbm [shape: bf16[256,128], index: 1, kind: input, shape index: {}]   ;;  %s2418_s2 = inlined_call_operand.hbm [shape: f32[1,128], index: 2, kind: input, shape index: {}]   ;;  %s2419_s3 = inlined_call_operand.hbm [shape: bf16[800,128], index: 3, kind: output, shape index: {}]  }
   0x1   :  { %10 = vsyncpa [#allocation3 + $0x1], 0 }
   0x2   :  { %11 = vsyncpa [#allocation6], 0 }
   0x3   :  { %12 = vsyncpa [#allocation4], 0 }
   0x4   :  { %14 = vsyncpa [#allocation4 + $0x1], 0  ;;  %s2016_s12 = smov 0   ;;  %s2018_s13 = smov 0  }
   0x5   :  { %s2020_s14 = smov 0   ;;  %s2022_s15 = smov 0  }
   0x6 LB: > { %s2037_s16 = sadd.s32 4294967295, %s1983_s15   ;;  %s1294_s17 = sadd.s32 4294967294, %s1983_s15   ;;  %s1983_s15 = sphi %s2022_s15, %s2439_s15   ;;  %s1979_s14 = sphi %s2020_s14, %s2438_s14   ;;  %s1975_s13 = sphi %s2018_s13, %s2437_s13   ;;  %s1971_s12 = sphi %s2016_s12, %s2436_s12  }
   0x7   : > { %p40_p0 = scmp.ne.s32.totalorder %s1975_s13, %s1971_s12  ;;  %p2420_p1 = scmp.eq.s32.totalorder %s2037_s16, 0 }
   0x8   : > { %p112_p3 = scmp.eq.s32.totalorder %s1294_s17, 1  ;;  %p1295_p5 = scmp.ge.s32.totalorder %s1983_s15, 1 }
   0x9   : > { %p2046_p4 = por %p2420_p1, %p40_p0  ;;  %p119_p7 = scmp.lt.s32.totalorder %s1983_s15, 3 }
   0xa   : > { %p2051_p6 = por %p112_p3, %p40_p0  ;;  %s1985_s21 = smov [#allocation5]  }
   0xb   : > { %s2423_s18 = scalar_select %p2046_p4, 1, 0 }
   0xc   : > { %s2424_s19 = scalar_select %p2051_p6, 1, 0 }
   0xd   : > { %p2056_p8 = pnand %p1295_p5, %p119_p7  ;;  %s131_s22 = sshll.u32 %s1985_s21, 4  ;;  %s2060_s22 = int_to_ptr.vmem [resolvable:$true] %s131_s22 }
   0xe   : > { %s1986_s24 = smov [#allocation7]   ;;  %s1827_s28 = scalar_lea.hbm %s2417_s1, 2048 }
   0xf   : > { %p1674_p9 = pneg %p2056_p8  ;;  %s145_s25 = sshll.u32 %s1986_s24, 4  ;;  %s2071_s25 = int_to_ptr.vmem [resolvable:$true] %s145_s25 }
  0x10   : > { %p1828_p12 = scmp.ne.s32.totalorder %s2417_s1, %s1827_s28  ;;  %p1834_p5 = scmp.lt.u32.totalorder %s1827_s28, %s2417_s1 }
  0x11   : > { %p2067_p11 = pnand %p1674_p9, %p2420_p1 }
  0x13   : > { %p1829_p13 = pneg %p2067_p11 }
  0x15   : > { %p1830_p0 = pnand %p1829_p13, %p1828_p12 }
  0x17   : > { %p1831_p3 = pneg %p1830_p0 }
  0x19   : > { %p1836_p7 = pnand %p1834_p5, %p1831_p3 }
  0x1b   : > { %1839 = shalt.err (!%p1836_p7)
}
  0x1c   : > { %s1840_s6 = scalar_lea.vmem %s2060_s22, 2048  ;;  %p1848_p2 = scmp.lt.s32.totalorder %s2060_s22, %s2060_s22 }
  0x1d   : > { %p1841_p9 = scmp.ne.s32.totalorder %s2060_s22, %s1840_s6  ;;  %p1849_p12 = scmp.lt.s32.totalorder %s1840_s6, %s1840_s6 }
  0x1f   : > { %p1843_p10 = pnand %p1841_p9, %p1829_p13  ;;  %p1850_p0 = por %p1849_p12, %p1848_p2 }
  0x21   : > { %p1844_p1 = pneg %p1843_p10 }
  0x23   : > { %p1851_p6 = pnand %p1850_p0, %p1844_p1 }
  0x25   : > { %1854 = shalt.err (!%p1851_p6)
}
  0x26   : > { %s1987_s7 = smov 64   ;;  %s1988_s8 = smov 4  }
  0x27   : > { %1677 = dma.hbm_to_vmem [thread:$0]  (!%p2067_p11), %s2417_s1, 2048, %s2060_s22, [#allocation6], %s1987_s7, %s1987_s7, %s1988_s8  }
  0x28   : > { %s1855_s21 = scalar_lea.hbm %s2418_s2, 16 }
  0x29   : > { %p1856_p2 = scmp.ne.s32.totalorder %s2418_s2, %s1855_s21  ;;  %p1862_p10 = scmp.lt.u32.totalorder %s1855_s21, %s2418_s2 }
  0x2b   : > { %p1858_p1 = pnand %p1856_p2, %p1829_p13 }
  0x2d   : > { %p1859_p6 = pneg %p1858_p1 }
  0x2f   : > { %p1864_p3 = pnand %p1862_p10, %p1859_p6 }
  0x31   : > { %1867 = shalt.err (!%p1864_p3)
}
  0x32   : > { %s1868_s22 = scalar_lea.vmem %s2071_s25, 16  ;;  %s1875_s29 = scalar_lea.vmem %s2071_s25, 32 }
  0x33   : > { %p1869_p5 = scmp.ne.s32.totalorder %s2071_s25, %s1868_s22  ;;  %p1876_p12 = scmp.lt.s32.totalorder %s2071_s25, %s2071_s25 }
  0x34   : > { %p1877_p0 = scmp.lt.s32.totalorder %s1875_s29, %s1868_s22 }
  0x35   : > { %p1871_p7 = pnand %p1869_p5, %p1829_p13 }
  0x36   : > { %p1878_p2 = por %p1877_p0, %p1876_p12 }
  0x37   : > { %p1872_p9 = pneg %p1871_p7 }
  0x39   : > { %p1879_p1 = pnand %p1878_p2, %p1872_p9 }
  0x3b   : > { %1882 = shalt.err (!%p1879_p1)
}
  0x3c   : > { %1680 = dma.hbm_to_vmem [thread:$0]  (!%p2067_p11), %s2418_s2, 16, %s2071_s25, [#allocation6]  }
  0x3d   : > { %s2127_s5 = sadd.s32 1, %s1983_s15   ;;  %s27_s23 = sadd.s32 1, %s1979_s14 }
  0x3e   : > { %s24_s6 = ssub.s32 %s1983_s15, %s2127_s5  ;;  %p34_p13 = scmp.ne.s32.totalorder %s1979_s14, %s1975_s13 }
  0x3f   : > { %p25_p6 = scmp.eq.s32.totalorder %s24_s6, 0  ;;  %p35_p10 = scmp.eq.s32.totalorder %s1983_s15, 0 }
  0x40   : > { %p2427_p3 = scmp.eq.s32.totalorder %s2037_s16, 1  ;;  %p1691_p7 = scmp.lt.s32.totalorder %s1983_s15, 2 }
  0x41   : > { %s2143_s8 = scalar_select %p25_p6, %s1979_s14, %s27_s23  }
  0x42   : > { %p2137_p5 = por %p2427_p3, %p34_p13  ;;  %p36_p9 = por %p35_p10, %p34_p13 }
  0x43   : > { %s156_s9 = sand.u32 1, %s1979_s14   ;;  %s1602_s25 = smul.u32 6400, %s1983_s15 }
  0x44   : > { %s2428_s7 = scalar_select %p2137_p5, 1, 0 }
  0x45   : > { %s1659_s10 = smul.u32 400, %s156_s9  ;;  %p2147_p11 = pnand %p1691_p7, %p36_p9 }
  0x46   : > { %s2154_s24 = scalar_lea.hbm %s2416_s0, %s1602_s25  ;;  %s2158_s28 = scalar_lea.sflag [#allocation3], %s156_s9 }
  0x47   : > { %s160_s26 = scalar_lea.vmem [#allocation2], %s1659_s10  ;;  %s1883_s22 = scalar_lea.hbm %s2154_s24, 6400 }
  0x48   : > { %s168_s27 = sshll.u32 %s160_s26, 4  ;;  %p1884_p12 = scmp.ne.s32.totalorder %s2154_s24, %s1883_s22  ;;  %s2156_s27 = int_to_ptr.vmem [resolvable:$true] %s168_s27 }
  0x49   : > { %p1885_p0 = pneg %p2147_p11  ;;  %s1888_s4 = scalar_lea.hbm %s2416_s0, 12800 }
  0x4a   : > { %p1889_p13 = scmp.lt.u32.totalorder %s2154_s24, %s2416_s0  ;;  %p1890_p6 = scmp.lt.u32.totalorder %s1888_s4, %s1883_s22 }
  0x4b   : > { %p1886_p2 = pnand %p1885_p0, %p1884_p12  ;;  %p1892_p3 = scmp.lt.u32.totalorder %s1883_s22, %s2154_s24 }
  0x4c   : > { %p1891_p10 = por %p1890_p6, %p1889_p13 }
  0x4d   : > { %p1887_p1 = pneg %p1886_p2 }
  0x4e   : > { %p1893_p7 = por %p1892_p3, %p1891_p10 }
  0x50   : > { %p1894_p9 = pnand %p1893_p7, %p1887_p1 }
  0x52   : > { %1897 = shalt.err (!%p1894_p9)
}
  0x53   : > { %s1898_s9 = scalar_lea.vmem %s2156_s27, 6400  ;;  %s1989_s10 = smov [#allocation2]  }
  0x54   : > { %p1899_p12 = scmp.ne.s32.totalorder %s2156_s27, %s1898_s9  ;;  %s1903_s25 = sshll.u32 %s1989_s10, 4  ;;  %s1904_s25 = int_to_ptr.vmem [resolvable:$false] %s1903_s25 }
  0x55   : > { %s1905_s17 = scalar_lea.vmem %s1904_s25, 12800  ;;  %p1906_p4 = scmp.lt.s32.totalorder %s2156_s27, %s1904_s25 }
  0x56   : > { %p1901_p2 = pnand %p1899_p12, %p1885_p0  ;;  %p1907_p13 = scmp.lt.s32.totalorder %s1905_s17, %s1898_s9 }
  0x58   : > { %p1902_p5 = pneg %p1901_p2  ;;  %p1908_p6 = por %p1907_p13, %p1906_p4 }
  0x5a   : > { %p1909_p10 = pnand %p1908_p6, %p1902_p5 }
  0x5c   : > { %1912 = shalt.err (!%p1909_p10)
}
  0x5d   : > { %s1990_s21 = smov 128   ;;  %s1991_s26 = smov 8  }
  0x5e   : > { %1684 = dma.hbm_to_vmem [thread:$0]  (!%p2147_p11), %s2154_s24, 6400, %s2156_s27, %s2158_s28, %s1990_s21, %s1990_s21, %s1991_s26  }
  0x5f   : > { %180 = sbr.rel (%p2056_p8) target bundleno = 502 (0x1f6), region = 32  ;;  %s2189_s22 = sand.u32 (!%p2056_p8), 1, %s1975_s13  }
  0x60   : > { %s1660_s29 = smul.u32 (!%p2056_p8), 400, %s2189_s22  ;;  %s183_s30 = scalar_lea.sflag (!%p2056_p8), [#allocation3], %s2189_s22 }
  0x61   : > { %p2430_p4 = scmp.ne.s32.totalorder (!%p2056_p8), %s2423_s18, 0 }
  0x62   : > { %s2193_s4 = scalar_lea.vmem (!%p2056_p8), [#allocation2], %s1660_s29 }
  0x66   : > { %1958 = dma.done.wait (%p2430_p4), %s183_s30, 6400  }
  0x67   : > { %1960 = vsyncadd (%p2430_p4), %s183_s30, 4294960896  ;;  %p2431_p5 = scmp.eq.s32.totalorder %s2037_s16, 0 }
  0x69   : > { %1962 = dma.done.wait (%p2431_p5), [#allocation6], 2064   ;;  %p2432_p8 = pmov %p2431_p5 }
  0x6a   : > { %v1992_v0 = vmov 0   ;;  %v1736_v1 = vld [vmem:[#allocation5] sm:$0xff]   ;;  %v1737_v2 = vld [vmem:[#allocation5 + $0x8] sm:$0xff]   ;;  %v1738_v3 = vld [vmem:[#allocation5 + $0x10] sm:$0xff]   ;;  %s1661_s18 = smul.u32 200, %s2189_s22  ;;  %s1189_s6 = scalar_lea.sflag [#allocation4], %s2189_s22 }
  0x6b   : > { %1964 = vsyncadd (%p2432_p8), [#allocation6], 4294965232  ;;  %655 = vmatprep.subr.bf16.mxu0 %v1992_v0  ;;  %1627 = vmatprep.subr.bf16.mxu1 %v1992_v0  ;;  %v1739_v4 = vld [vmem:[#allocation5 + $0x18] sm:$0xff]   ;;  %v1740_v5 = vld [vmem:[#allocation5 + $0x20] sm:$0xff]   ;;  %s1476_s11 = smul.u32 3200, %s2037_s16  ;;  %p2433_p0 = scmp.ne.s32.totalorder %s2428_s7, 0 }
  0x6c   : > { %656 = vmatpush1.bf16.msra.mxu0 %v1736_v1  ;;  %1643 = vmatpush1.bf16.msra.mxu1 %v1736_v1  ;;  %v1754_v6 = vld [vmem:[%s2193_s4 + $0x4] ss:$8 sps:$4 sm:$0xff]   ;;  %v1757_v8 = vld [vmem:[%s2193_s4 + $0xd4] ss:$8 sps:$4 sm:$0xff]   ;;  %v1752_v19 = vld [vmem:[%s2193_s4] ss:$8 sps:$4 sm:$0xff]  }
  0x6d   : > { %657 = vmatprep.subr.bf16.mxu0 %v1992_v0  ;;  %1628 = vmatprep.subr.bf16.mxu1 %v1992_v0  ;;  %v1741_v7 = vld [vmem:[#allocation5 + $0x28] sm:$0xff]   ;;  %v1742_v9 = vld [vmem:[#allocation5 + $0x30] sm:$0xff]   ;;  %v1743_v10 = vld [vmem:[#allocation5 + $0x38] sm:$0xff]   ;;  %s2292_s20 = scalar_lea.vmem [#allocation8], %s1661_s18  ;;  %s2369_s23 = scalar_lea.hbm %s2419_s3, %s1476_s11 }
  0x6e   : > { %687 = vmatprep.mubr.bf16.mxu0 %v1754_v6  ;;  %791 = vmatprep.mubr.bf16.mxu1 %v1757_v8  ;;  %v1744_v11 = vld [vmem:[#allocation5 + $0x40] sm:$0xff]   ;;  %v1745_v12 = vld [vmem:[#allocation5 + $0x48] sm:$0xff]   ;;  %v1746_v13 = vld [vmem:[#allocation5 + $0x50] sm:$0xff]   ;;  %s1202_s24 = sshll.u32 %s2292_s20, 4  ;;  %s1993_s9 = smov [#allocation8]   ;;  %s2371_s24 = int_to_ptr.vmem [resolvable:$true] %s1202_s24 }
  0x6f   : > { %v1747_v14 = vld [vmem:[#allocation5 + $0x58] sm:$0xff]   ;;  %v1748_v15 = vld [vmem:[#allocation5 + $0x60] sm:$0xff]   ;;  %v1749_v16 = vld [vmem:[#allocation5 + $0x68] sm:$0xff]   ;;  %s1913_s16 = scalar_lea.vmem %s2371_s24, 3200  ;;  %s1917_s10 = sshll.u32 %s1993_s9, 4  ;;  %s1918_s10 = int_to_ptr.vmem [resolvable:$false] %s1917_s10 }
  0x70   : > { %658 = vmatpush1.bf16.msra.mxu0 %v1737_v2  ;;  %1644 = vmatpush1.bf16.msra.mxu1 %v1737_v2  ;;  %v1750_v17 = vld [vmem:[#allocation5 + $0x70] sm:$0xff]   ;;  %v1751_v18 = vld [vmem:[#allocation5 + $0x78] sm:$0xff]   ;;  %p1914_p11 = scmp.ne.s32.totalorder %s2371_s24, %s1913_s16  ;;  %s1919_s25 = scalar_lea.vmem %s1918_s10, 6400 }
  0x71   : > { %659 = vmatprep.subr.bf16.mxu0 %v1992_v0  ;;  %1629 = vmatprep.subr.bf16.mxu1 %v1992_v0  ;;  %v1755_v20 = vld [vmem:[%s2193_s4 + $0xd0] ss:$8 sps:$4 sm:$0xff]   ;;  %v1758_v21 = vld [vmem:[%s2193_s4 + $0x14] ss:$8 sps:$4 sm:$0xff]   ;;  %v1761_v22 = vld [vmem:[%s2193_s4 + $0xe4] ss:$8 sps:$4 sm:$0xff]   ;;  %p1920_p7 = scmp.lt.s32.totalorder %s2371_s24, %s1918_s10  ;;  %p1921_p9 = scmp.lt.s32.totalorder %s1919_s25, %s1913_s16 }
  0x72   : > { %v1760_v23 = vld [vmem:[%s2193_s4 + $0x10] ss:$8 sps:$4 sm:$0xff]   ;;  %v1763_v24 = vld [vmem:[%s2193_s4 + $0xe0] ss:$8 sps:$4 sm:$0xff]   ;;  %v1764_v25 = vld [vmem:[%s2193_s4 + $0x24] ss:$8 sps:$4 sm:$0xff]   ;;  %p1915_p1 = pnand %p1914_p11, %p2433_p0 }
  0x73   : > { %v1767_v26 = vld [vmem:[%s2193_s4 + $0xf4] ss:$8 sps:$4 sm:$0xff]   ;;  %v1766_v27 = vld [vmem:[%s2193_s4 + $0x20] ss:$8 sps:$4 sm:$0xff]   ;;  %v1769_v28 = vld [vmem:[%s2193_s4 + $0xf0] ss:$8 sps:$4 sm:$0xff]   ;;  %p1922_p12 = por %p1921_p9, %p1920_p7 }
  0x74   : > { %660 = vmatpush1.bf16.msra.mxu0 %v1738_v3  ;;  %1645 = vmatpush1.bf16.msra.mxu1 %v1738_v3  ;;  %v1770_v29 = vld [vmem:[%s2193_s4 + $0x34] ss:$8 sps:$4 sm:$0xff]   ;;  %v1773_v30 = vld [vmem:[%s2193_s4 + $0x104] ss:$8 sps:$4 sm:$0xff]   ;;  %v1772_v31 = vld [vmem:[%s2193_s4 + $0x30] ss:$8 sps:$4 sm:$0xff]   ;;  %p1916_p3 = pneg %p1915_p1 }
  0x75   : > { %661 = vmatprep.subr.bf16.mxu0 %v1992_v0  ;;  %1630 = vmatprep.subr.bf16.mxu1 %v1992_v0  ;;  %v1775_v32 = vld [vmem:[%s2193_s4 + $0x100] ss:$8 sps:$4 sm:$0xff]   ;;  %v1776_v33 = vld [vmem:[%s2193_s4 + $0x44] ss:$8 sps:$4 sm:$0xff]   ;;  %v1779_v34 = vld [vmem:[%s2193_s4 + $0x114] ss:$8 sps:$4 sm:$0xff]  }
  0x76   : > { %v1778_v35 = vld [vmem:[%s2193_s4 + $0x40] ss:$8 sps:$4 sm:$0xff]   ;;  %v1781_v36 = vld [vmem:[%s2193_s4 + $0x110] ss:$8 sps:$4 sm:$0xff]   ;;  %v1782_v37 = vld [vmem:[%s2193_s4 + $0x54] ss:$8 sps:$4 sm:$0xff]   ;;  %p1923_p2 = pnand %p1922_p12, %p1916_p3 }
  0x77   : > { %v1785_v38 = vld [vmem:[%s2193_s4 + $0x124] ss:$8 sps:$4 sm:$0xff]   ;;  %v1784_v39 = vld [vmem:[%s2193_s4 + $0x50] ss:$8 sps:$4 sm:$0xff]   ;;  %v1787_v40 = vld [vmem:[%s2193_s4 + $0x120] ss:$8 sps:$4 sm:$0xff]  }
  0x78   : > { %662 = vmatpush1.bf16.msra.mxu0 %v1739_v4  ;;  %1646 = vmatpush1.bf16.msra.mxu1 %v1739_v4  ;;  %v1788_v41 = vld [vmem:[%s2193_s4 + $0x64] ss:$8 sps:$4 sm:$0xff]   ;;  %v1791_v42 = vld [vmem:[%s2193_s4 + $0x134] ss:$8 sps:$4 sm:$0xff]   ;;  %v1790_v43 = vld [vmem:[%s2193_s4 + $0x60] ss:$8 sps:$4 sm:$0xff]  }
  0x79   : > { %663 = vmatprep.subr.bf16.mxu0 %v1992_v0  ;;  %1631 = vmatprep.subr.bf16.mxu1 %v1992_v0  ;;  %v1793_v44 = vld [vmem:[%s2193_s4 + $0x130] ss:$8 sps:$4 sm:$0xff]   ;;  %v1794_v45 = vld [vmem:[%s2193_s4 + $0x74] ss:$8 sps:$4 sm:$0xff]   ;;  %v1797_v46 = vld [vmem:[%s2193_s4 + $0x144] ss:$8 sps:$4 sm:$0xff]  }
  0x7a   : > { %v1796_v47 = vld [vmem:[%s2193_s4 + $0x70] ss:$8 sps:$4 sm:$0xff]   ;;  %v1799_v48 = vld [vmem:[%s2193_s4 + $0x140] ss:$8 sps:$4 sm:$0xff]   ;;  %v1800_v49 = vld [vmem:[%s2193_s4 + $0x84] ss:$8 sps:$4 sm:$0xff]  }
  0x7b   : > { %v1803_v50 = vld [vmem:[%s2193_s4 + $0x154] ss:$8 sps:$4 sm:$0xff]   ;;  %v1802_v51 = vld [vmem:[%s2193_s4 + $0x80] ss:$8 sps:$4 sm:$0xff]   ;;  %v1805_v52 = vld [vmem:[%s2193_s4 + $0x150] ss:$8 sps:$4 sm:$0xff]  }
  0x7c   : > { %664 = vmatpush1.bf16.msra.mxu0 %v1740_v5  ;;  %1647 = vmatpush1.bf16.msra.mxu1 %v1740_v5  ;;  %v1806_v53 = vld [vmem:[%s2193_s4 + $0x94] ss:$8 sps:$4 sm:$0xff]   ;;  %v1809_v54 = vld [vmem:[%s2193_s4 + $0x164] ss:$8 sps:$4 sm:$0xff]   ;;  %v1808_v55 = vld [vmem:[%s2193_s4 + $0x90] ss:$8 sps:$4 sm:$0xff]  }
  0x7d   : > { %665 = vmatprep.subr.bf16.mxu0 %v1992_v0  ;;  %1632 = vmatprep.subr.bf16.mxu1 %v1992_v0  ;;  %v1811_v56 = vld [vmem:[%s2193_s4 + $0x160] ss:$8 sps:$4 sm:$0xff]   ;;  %v1812_v57 = vld [vmem:[%s2193_s4 + $0xa4] ss:$8 sps:$4 sm:$0xff]   ;;  %v1815_v58 = vld [vmem:[%s2193_s4 + $0x174] ss:$8 sps:$4 sm:$0xff]  }
  0x7e   : > { %v1814_v59 = vld [vmem:[%s2193_s4 + $0xa0] ss:$8 sps:$4 sm:$0xff]   ;;  %v1817_v60 = vld [vmem:[%s2193_s4 + $0x170] ss:$8 sps:$4 sm:$0xff]   ;;  %v1818_v61 = vld [vmem:[%s2193_s4 + $0xb4] ss:$8 sps:$4 sm:$0xff]  }
  0x7f   : > { %v1821_v62 = vld [vmem:[%s2193_s4 + $0x184] ss:$8 sps:$4 sm:$0xff]   ;;  %v1820_v63 = vld [vmem:[%s2193_s4 + $0xb0] ss:$8 sps:$4 sm:$0xff]   ;;  %v1826_v2 = vld [vmem:[%s2193_s4 + $0xc0] ss:$8 sps:$4 sm:$0xff]  }
  0x80   : > { %666 = vmatpush1.bf16.msra.mxu0 %v1741_v7  ;;  %1648 = vmatpush1.bf16.msra.mxu1 %v1741_v7  ;;  %v1824_v1 = vld [vmem:[%s2193_s4 + $0xc4] ss:$8 sps:$4 sm:$0xff]   ;;  %v2285_v3 = vld [vmem:[#allocation7] ss:$0 sm:$0xff] }
  0x81   : > { %667 = vmatprep.subr.bf16.mxu0 %v1992_v0  ;;  %1633 = vmatprep.subr.bf16.mxu1 %v1992_v0 }
  0x84   : > { %668 = vmatpush1.bf16.msra.mxu0 %v1742_v9  ;;  %1649 = vmatpush1.bf16.msra.mxu1 %v1742_v9 }
  0x85   : > { %669 = vmatprep.subr.bf16.mxu0 %v1992_v0  ;;  %1634 = vmatprep.subr.bf16.mxu1 %v1992_v0 }
  0x88   : > { %670 = vmatpush1.bf16.msra.mxu0 %v1743_v10  ;;  %1650 = vmatpush1.bf16.msra.mxu1 %v1743_v10 }
  0x89   : > { %671 = vmatprep.subr.bf16.mxu0 %v1992_v0  ;;  %1635 = vmatprep.subr.bf16.mxu1 %v1992_v0 }
  0x8c   : > { %672 = vmatpush1.bf16.msra.mxu0 %v1744_v11  ;;  %1651 = vmatpush1.bf16.msra.mxu1 %v1744_v11 }
  0x8d   : > { %673 = vmatprep.subr.bf16.mxu0 %v1992_v0  ;;  %1636 = vmatprep.subr.bf16.mxu1 %v1992_v0 }
  0x90   : > { %674 = vmatpush1.bf16.msra.mxu0 %v1745_v12  ;;  %1652 = vmatpush1.bf16.msra.mxu1 %v1745_v12 }
  0x91   : > { %675 = vmatprep.subr.bf16.mxu0 %v1992_v0  ;;  %1637 = vmatprep.subr.bf16.mxu1 %v1992_v0 }
  0x94   : > { %676 = vmatpush1.bf16.msra.mxu0 %v1746_v13  ;;  %1653 = vmatpush1.bf16.msra.mxu1 %v1746_v13 }
  0x95   : > { %677 = vmatprep.subr.bf16.mxu0 %v1992_v0  ;;  %1638 = vmatprep.subr.bf16.mxu1 %v1992_v0 }
  0x98   : > { %678 = vmatpush1.bf16.msra.mxu0 %v1747_v14  ;;  %1654 = vmatpush1.bf16.msra.mxu1 %v1747_v14 }
  0x99   : > { %679 = vmatprep.subr.bf16.mxu0 %v1992_v0  ;;  %1639 = vmatprep.subr.bf16.mxu1 %v1992_v0 }
  0x9c   : > { %680 = vmatpush1.bf16.msra.mxu0 %v1748_v15  ;;  %1655 = vmatpush1.bf16.msra.mxu1 %v1748_v15 }
  0x9d   : > { %681 = vmatprep.subr.bf16.mxu0 %v1992_v0  ;;  %1640 = vmatprep.subr.bf16.mxu1 %v1992_v0 }
  0xa0   : > { %682 = vmatpush1.bf16.msra.mxu0 %v1749_v16  ;;  %1656 = vmatpush1.bf16.msra.mxu1 %v1749_v16 }
  0xa1   : > { %683 = vmatprep.subr.bf16.mxu0 %v1992_v0  ;;  %1641 = vmatprep.subr.bf16.mxu1 %v1992_v0 }
  0xa4   : > { %684 = vmatpush1.bf16.msra.mxu0 %v1750_v17  ;;  %1657 = vmatpush1.bf16.msra.mxu1 %v1750_v17 }
  0xa5   : > { %685 = vmatprep.subr.bf16.mxu0 %v1992_v0  ;;  %1642 = vmatprep.subr.bf16.mxu1 %v1992_v0  ;;  %v1823_v0 = vld [vmem:[%s2193_s4 + $0x180] ss:$8 sps:$4 sm:$0xff]  }
  0xa8   : > { %686 = vmatpush1.bf16.msra.mxu0 %v1751_v18  ;;  %1658 = vmatpush1.bf16.msra.mxu1 %v1751_v18 }
  0xab   : > { %688 = vmatmul.mubr.bf16.vlgmr.msra.gmra.mrb[0].mxu0 %v1752_v19  ;;  %792 = vmatmul.mubr.bf16.vlgmr.msra.gmra.mrb[0].mxu1 %v1755_v20 }
  0xac   : > { %695 = vmatprep.mubr.bf16.mxu0 %v1758_v21  ;;  %799 = vmatprep.mubr.bf16.mxu1 %v1761_v22 }
  0xb3   : > { %696 = vmatmul.mubr.bf16.gmra.mrb[4].mxu0 %v1760_v23  ;;  %800 = vmatmul.mubr.bf16.gmra.mrb[4].mxu1 %v1763_v24 }
  0xb4   : > { %703 = vmatprep.mubr.bf16.mxu0 %v1764_v25  ;;  %807 = vmatprep.mubr.bf16.mxu1 %v1767_v26 }
  0xbb   : > { %704 = vmatmul.mubr.bf16.gmra.mrb[8].mxu0 %v1766_v27  ;;  %808 = vmatmul.mubr.bf16.gmra.mrb[8].mxu1 %v1769_v28 }
  0xbc   : > { %711 = vmatprep.mubr.bf16.mxu0 %v1770_v29  ;;  %815 = vmatprep.mubr.bf16.mxu1 %v1773_v30 }
  0xc3   : > { %712 = vmatmul.mubr.bf16.gmra.mrb[12].mxu0 %v1772_v31  ;;  %816 = vmatmul.mubr.bf16.gmra.mrb[12].mxu1 %v1775_v32 }
  0xc4   : > { %719 = vmatprep.mubr.bf16.mxu0 %v1776_v33  ;;  %823 = vmatprep.mubr.bf16.mxu1 %v1779_v34 }
  0xcb   : > { %720 = vmatmul.mubr.bf16.gmra.mrb[16].mxu0 %v1778_v35  ;;  %824 = vmatmul.mubr.bf16.gmra.mrb[16].mxu1 %v1781_v36 }
  0xcc   : > { %727 = vmatprep.mubr.bf16.mxu0 %v1782_v37  ;;  %831 = vmatprep.mubr.bf16.mxu1 %v1785_v38 }
  0xd3   : > { %728 = vmatmul.mubr.bf16.gmra.mrb[20].mxu0 %v1784_v39  ;;  %832 = vmatmul.mubr.bf16.gmra.mrb[20].mxu1 %v1787_v40 }
  0xd4   : > { %735 = vmatprep.mubr.bf16.mxu0 %v1788_v41  ;;  %839 = vmatprep.mubr.bf16.mxu1 %v1791_v42 }
  0xdb   : > { %736 = vmatmul.mubr.bf16.gmra.mrb[24].mxu0 %v1790_v43  ;;  %840 = vmatmul.mubr.bf16.gmra.mrb[24].mxu1 %v1793_v44 }
  0xdc   : > { %743 = vmatprep.mubr.bf16.mxu0 %v1794_v45  ;;  %847 = vmatprep.mubr.bf16.mxu1 %v1797_v46 }
  0xe3   : > { %744 = vmatmul.mubr.bf16.gmra.mrb[28].mxu0 %v1796_v47  ;;  %848 = vmatmul.mubr.bf16.gmra.mrb[28].mxu1 %v1799_v48 }
  0xe4   : > { %751 = vmatprep.mubr.bf16.mxu0 %v1800_v49  ;;  %855 = vmatprep.mubr.bf16.mxu1 %v1803_v50 }
  0xeb   : > { %752 = vmatmul.mubr.bf16.gmra.mrb[32].mxu0 %v1802_v51  ;;  %856 = vmatmul.mubr.bf16.gmra.mrb[32].mxu1 %v1805_v52 }
  0xec   : > { %759 = vmatprep.mubr.bf16.mxu0 %v1806_v53  ;;  %863 = vmatprep.mubr.bf16.mxu1 %v1809_v54 }
  0xf3   : > { %760 = vmatmul.mubr.bf16.gmra.mrb[36].mxu0 %v1808_v55  ;;  %864 = vmatmul.mubr.bf16.gmra.mrb[36].mxu1 %v1811_v56 }
  0xf4   : > { %767 = vmatprep.mubr.bf16.mxu0 %v1812_v57  ;;  %871 = vmatprep.mubr.bf16.mxu1 %v1815_v58 }
  0xfb   : > { %768 = vmatmul.mubr.bf16.gmra.mrb[40].mxu0 %v1814_v59  ;;  %872 = vmatmul.mubr.bf16.gmra.mrb[40].mxu1 %v1817_v60 }
  0xfc   : > { %775 = vmatprep.mubr.bf16.mxu0 %v1818_v61  ;;  %879 = vmatprep.mubr.bf16.mxu1 %v1821_v62 }
 0x103   : > { %776 = vmatmul.mubr.bf16.gmra.mrb[44].mxu0 %v1820_v63  ;;  %880 = vmatmul.mubr.bf16.gmra.mrb[44].mxu1 %v1823_v0 }
 0x104   : > { %783 = vmatprep.mubr.bf16.mxu0 %v1824_v1 }
 0x10b   : > { %784 = vmatmul.mubr.bf16.gmra.mrb[48].mxu0 %v1826_v2 }
 0x17e   : > { %v689_v4 = vpop.f32.mrb[0].mxu0  ;;  %v793_v5 = vpop.f32.mrb[0].mxu1 }
 0x17f   : > { %v690_v6 = vadd.f32 %v2285_v3, %v689_v4  ;;  %v691_v7 = vpop.f32.mrb[1].mxu0  ;;  %v794_v8 = vadd.f32 %v2285_v3, %v793_v5  ;;  %v795_v9 = vpop.f32.mrb[1].mxu1 }
 0x180   : > { %v692_v10 = vpop.f32.mrb[2].mxu0  ;;  %v796_v11 = vpop.f32.mrb[2].mxu1 }
 0x181   : > { %v693_v12 = vadd.f32 %v2285_v3, %v692_v10  ;;  %v694_v13 = vpop.f32.mrb[3].mxu0  ;;  %v914_v14 = vmax.f32 %v794_v8, 0.0  ;;  %v797_v15 = vadd.f32 %v2285_v3, %v796_v11  ;;  %v798_v16 = vpop.f32.mrb[3].mxu1  ;;  %v888_v17 = vmax.f32 %v690_v6, 0.0 }
 0x183   : > { %v889_v18 = vmax.f32 %v693_v12, 0.0  ;;  %v915_v19 = vmax.f32 %v797_v15, 0.0 }
 0x185   : > { %v1480_v20 = vpack.c.bf16 %v889_v18, %v888_v17  ;;  %v1545_v21 = vpack.c.bf16 %v915_v19, %v914_v14 }
 0x186   : > { %v697_v22 = vpop.f32.mrb[4].mxu0  ;;  %v801_v23 = vpop.f32.mrb[4].mxu1 }
 0x187   : > { %1481 = vst [vmem:[%s2292_s20] sm:$0xff] %v1480_v20   ;;  %1615 = vst [vmem:[%s2292_s20 + $0x68] sm:$0xff] %v1545_v21   ;;  %v698_v24 = vadd.f32 %v2285_v3, %v697_v22  ;;  %v699_v25 = vpop.f32.mrb[5].mxu0  ;;  %v802_v26 = vadd.f32 %v2285_v3, %v801_v23  ;;  %v803_v27 = vpop.f32.mrb[5].mxu1 }
 0x188   : > { %v700_v28 = vpop.f32.mrb[6].mxu0  ;;  %v804_v29 = vpop.f32.mrb[6].mxu1 }
 0x189   : > { %v701_v30 = vadd.f32 %v2285_v3, %v700_v28  ;;  %v702_v31 = vpop.f32.mrb[7].mxu0  ;;  %v916_v32 = vmax.f32 %v802_v26, 0.0  ;;  %v805_v33 = vadd.f32 %v2285_v3, %v804_v29  ;;  %v806_v34 = vpop.f32.mrb[7].mxu1  ;;  %v890_v35 = vmax.f32 %v698_v24, 0.0 }
 0x18b   : > { %v891_v36 = vmax.f32 %v701_v30, 0.0  ;;  %v917_v37 = vmax.f32 %v805_v33, 0.0 }
 0x18d   : > { %v1485_v38 = vpack.c.bf16 %v891_v36, %v890_v35  ;;  %v1550_v39 = vpack.c.bf16 %v917_v37, %v916_v32 }
 0x18e   : > { %v705_v40 = vpop.f32.mrb[8].mxu0  ;;  %v809_v41 = vpop.f32.mrb[8].mxu1 }
 0x18f   : > { %1603 = vst [vmem:[%s2292_s20 + $0x8] sm:$0xff] %v1485_v38   ;;  %1616 = vst [vmem:[%s2292_s20 + $0x70] sm:$0xff] %v1550_v39   ;;  %v706_v42 = vadd.f32 %v2285_v3, %v705_v40  ;;  %v707_v43 = vpop.f32.mrb[9].mxu0  ;;  %v810_v44 = vadd.f32 %v2285_v3, %v809_v41  ;;  %v811_v45 = vpop.f32.mrb[9].mxu1 }
 0x190   : > { %v708_v46 = vpop.f32.mrb[10].mxu0  ;;  %v812_v47 = vpop.f32.mrb[10].mxu1 }
 0x191   : > { %v709_v48 = vadd.f32 %v2285_v3, %v708_v46  ;;  %v710_v49 = vpop.f32.mrb[11].mxu0  ;;  %v918_v50 = vmax.f32 %v810_v44, 0.0  ;;  %v813_v51 = vadd.f32 %v2285_v3, %v812_v47  ;;  %v814_v52 = vpop.f32.mrb[11].mxu1  ;;  %v892_v53 = vmax.f32 %v706_v42, 0.0 }
 0x193   : > { %v893_v54 = vmax.f32 %v709_v48, 0.0  ;;  %v919_v55 = vmax.f32 %v813_v51, 0.0 }
 0x195   : > { %v1490_v56 = vpack.c.bf16 %v893_v54, %v892_v53  ;;  %v1555_v57 = vpack.c.bf16 %v919_v55, %v918_v50 }
 0x196   : > { %v713_v58 = vpop.f32.mrb[12].mxu0  ;;  %v817_v59 = vpop.f32.mrb[12].mxu1 }
 0x197   : > { %1604 = vst [vmem:[%s2292_s20 + $0x10] sm:$0xff] %v1490_v56   ;;  %1617 = vst [vmem:[%s2292_s20 + $0x78] sm:$0xff] %v1555_v57   ;;  %v714_v60 = vadd.f32 %v2285_v3, %v713_v58  ;;  %v715_v61 = vpop.f32.mrb[13].mxu0  ;;  %v818_v62 = vadd.f32 %v2285_v3, %v817_v59  ;;  %v819_v63 = vpop.f32.mrb[13].mxu1 }
 0x198   : > { %v716_v0 = vpop.f32.mrb[14].mxu0  ;;  %v820_v1 = vpop.f32.mrb[14].mxu1 }
 0x199   : > { %v717_v2 = vadd.f32 %v2285_v3, %v716_v0  ;;  %v718_v4 = vpop.f32.mrb[15].mxu0  ;;  %v920_v5 = vmax.f32 %v818_v62, 0.0  ;;  %v821_v6 = vadd.f32 %v2285_v3, %v820_v1  ;;  %v822_v7 = vpop.f32.mrb[15].mxu1  ;;  %v894_v8 = vmax.f32 %v714_v60, 0.0 }
 0x19b   : > { %v895_v9 = vmax.f32 %v717_v2, 0.0  ;;  %v921_v10 = vmax.f32 %v821_v6, 0.0 }
 0x19d   : > { %v1495_v11 = vpack.c.bf16 %v895_v9, %v894_v8  ;;  %v1560_v12 = vpack.c.bf16 %v921_v10, %v920_v5 }
 0x19e   : > { %v721_v13 = vpop.f32.mrb[16].mxu0  ;;  %v825_v14 = vpop.f32.mrb[16].mxu1 }
 0x19f   : > { %1605 = vst [vmem:[%s2292_s20 + $0x18] sm:$0xff] %v1495_v11   ;;  %1618 = vst [vmem:[%s2292_s20 + $0x80] sm:$0xff] %v1560_v12   ;;  %v722_v15 = vadd.f32 %v2285_v3, %v721_v13  ;;  %v723_v16 = vpop.f32.mrb[17].mxu0  ;;  %v826_v17 = vadd.f32 %v2285_v3, %v825_v14  ;;  %v827_v18 = vpop.f32.mrb[17].mxu1 }
 0x1a0   : > { %v724_v19 = vpop.f32.mrb[18].mxu0  ;;  %v828_v20 = vpop.f32.mrb[18].mxu1 }
 0x1a1   : > { %v725_v21 = vadd.f32 %v2285_v3, %v724_v19  ;;  %v726_v22 = vpop.f32.mrb[19].mxu0  ;;  %v922_v23 = vmax.f32 %v826_v17, 0.0  ;;  %v829_v24 = vadd.f32 %v2285_v3, %v828_v20  ;;  %v830_v25 = vpop.f32.mrb[19].mxu1  ;;  %v896_v26 = vmax.f32 %v722_v15, 0.0 }
 0x1a3   : > { %v897_v27 = vmax.f32 %v725_v21, 0.0  ;;  %v923_v28 = vmax.f32 %v829_v24, 0.0 }
 0x1a5   : > { %v1500_v29 = vpack.c.bf16 %v897_v27, %v896_v26  ;;  %v1565_v30 = vpack.c.bf16 %v923_v28, %v922_v23 }
 0x1a6   : > { %v729_v31 = vpop.f32.mrb[20].mxu0  ;;  %v833_v32 = vpop.f32.mrb[20].mxu1 }
 0x1a7   : > { %1606 = vst [vmem:[%s2292_s20 + $0x20] sm:$0xff] %v1500_v29   ;;  %1619 = vst [vmem:[%s2292_s20 + $0x88] sm:$0xff] %v1565_v30   ;;  %v730_v33 = vadd.f32 %v2285_v3, %v729_v31  ;;  %v731_v34 = vpop.f32.mrb[21].mxu0  ;;  %v834_v35 = vadd.f32 %v2285_v3, %v833_v32  ;;  %v835_v36 = vpop.f32.mrb[21].mxu1 }
 0x1a8   : > { %v732_v37 = vpop.f32.mrb[22].mxu0  ;;  %v836_v38 = vpop.f32.mrb[22].mxu1 }
 0x1a9   : > { %v733_v39 = vadd.f32 %v2285_v3, %v732_v37  ;;  %v734_v40 = vpop.f32.mrb[23].mxu0  ;;  %v924_v41 = vmax.f32 %v834_v35, 0.0  ;;  %v837_v42 = vadd.f32 %v2285_v3, %v836_v38  ;;  %v838_v43 = vpop.f32.mrb[23].mxu1  ;;  %v898_v44 = vmax.f32 %v730_v33, 0.0 }
 0x1ab   : > { %v899_v45 = vmax.f32 %v733_v39, 0.0  ;;  %v925_v46 = vmax.f32 %v837_v42, 0.0 }
 0x1ad   : > { %v1505_v47 = vpack.c.bf16 %v899_v45, %v898_v44  ;;  %v1570_v48 = vpack.c.bf16 %v925_v46, %v924_v41 }
 0x1ae   : > { %v737_v49 = vpop.f32.mrb[24].mxu0  ;;  %v841_v50 = vpop.f32.mrb[24].mxu1 }
 0x1af   : > { %1607 = vst [vmem:[%s2292_s20 + $0x28] sm:$0xff] %v1505_v47   ;;  %1620 = vst [vmem:[%s2292_s20 + $0x90] sm:$0xff] %v1570_v48   ;;  %v738_v51 = vadd.f32 %v2285_v3, %v737_v49  ;;  %v739_v52 = vpop.f32.mrb[25].mxu0  ;;  %v842_v53 = vadd.f32 %v2285_v3, %v841_v50  ;;  %v843_v54 = vpop.f32.mrb[25].mxu1 }
 0x1b0   : > { %v740_v55 = vpop.f32.mrb[26].mxu0  ;;  %v844_v56 = vpop.f32.mrb[26].mxu1 }
 0x1b1   : > { %v741_v57 = vadd.f32 %v2285_v3, %v740_v55  ;;  %v742_v58 = vpop.f32.mrb[27].mxu0  ;;  %v926_v59 = vmax.f32 %v842_v53, 0.0  ;;  %v845_v60 = vadd.f32 %v2285_v3, %v844_v56  ;;  %v846_v61 = vpop.f32.mrb[27].mxu1  ;;  %v900_v62 = vmax.f32 %v738_v51, 0.0 }
 0x1b3   : > { %v901_v63 = vmax.f32 %v741_v57, 0.0  ;;  %v927_v0 = vmax.f32 %v845_v60, 0.0 }
 0x1b5   : > { %v1510_v1 = vpack.c.bf16 %v901_v63, %v900_v62  ;;  %v1575_v2 = vpack.c.bf16 %v927_v0, %v926_v59 }
 0x1b6   : > { %v745_v4 = vpop.f32.mrb[28].mxu0  ;;  %v849_v5 = vpop.f32.mrb[28].mxu1 }
 0x1b7   : > { %1608 = vst [vmem:[%s2292_s20 + $0x30] sm:$0xff] %v1510_v1   ;;  %1621 = vst [vmem:[%s2292_s20 + $0x98] sm:$0xff] %v1575_v2   ;;  %v746_v6 = vadd.f32 %v2285_v3, %v745_v4  ;;  %v747_v7 = vpop.f32.mrb[29].mxu0  ;;  %v850_v8 = vadd.f32 %v2285_v3, %v849_v5  ;;  %v851_v9 = vpop.f32.mrb[29].mxu1 }
 0x1b8   : > { %v748_v10 = vpop.f32.mrb[30].mxu0  ;;  %v852_v11 = vpop.f32.mrb[30].mxu1 }
 0x1b9   : > { %v749_v12 = vadd.f32 %v2285_v3, %v748_v10  ;;  %v750_v13 = vpop.f32.mrb[31].mxu0  ;;  %v928_v14 = vmax.f32 %v850_v8, 0.0  ;;  %v853_v15 = vadd.f32 %v2285_v3, %v852_v11  ;;  %v854_v16 = vpop.f32.mrb[31].mxu1  ;;  %v902_v17 = vmax.f32 %v746_v6, 0.0 }
 0x1bb   : > { %v903_v18 = vmax.f32 %v749_v12, 0.0  ;;  %v929_v19 = vmax.f32 %v853_v15, 0.0 }
 0x1bd   : > { %v1515_v20 = vpack.c.bf16 %v903_v18, %v902_v17  ;;  %v1580_v21 = vpack.c.bf16 %v929_v19, %v928_v14 }
 0x1be   : > { %v753_v22 = vpop.f32.mrb[32].mxu0  ;;  %v857_v23 = vpop.f32.mrb[32].mxu1 }
 0x1bf   : > { %1609 = vst [vmem:[%s2292_s20 + $0x38] sm:$0xff] %v1515_v20   ;;  %1622 = vst [vmem:[%s2292_s20 + $0xa0] sm:$0xff] %v1580_v21   ;;  %v754_v24 = vadd.f32 %v2285_v3, %v753_v22  ;;  %v755_v25 = vpop.f32.mrb[33].mxu0  ;;  %v858_v26 = vadd.f32 %v2285_v3, %v857_v23  ;;  %v859_v27 = vpop.f32.mrb[33].mxu1 }
 0x1c0   : > { %v756_v28 = vpop.f32.mrb[34].mxu0  ;;  %v860_v29 = vpop.f32.mrb[34].mxu1 }
 0x1c1   : > { %v757_v30 = vadd.f32 %v2285_v3, %v756_v28  ;;  %v758_v31 = vpop.f32.mrb[35].mxu0  ;;  %v930_v32 = vmax.f32 %v858_v26, 0.0  ;;  %v861_v33 = vadd.f32 %v2285_v3, %v860_v29  ;;  %v862_v34 = vpop.f32.mrb[35].mxu1  ;;  %v904_v35 = vmax.f32 %v754_v24, 0.0 }
 0x1c3   : > { %v905_v36 = vmax.f32 %v757_v30, 0.0  ;;  %v931_v37 = vmax.f32 %v861_v33, 0.0 }
 0x1c5   : > { %v1520_v38 = vpack.c.bf16 %v905_v36, %v904_v35  ;;  %v1585_v39 = vpack.c.bf16 %v931_v37, %v930_v32 }
 0x1c6   : > { %v761_v40 = vpop.f32.mrb[36].mxu0  ;;  %v865_v41 = vpop.f32.mrb[36].mxu1 }
 0x1c7   : > { %1610 = vst [vmem:[%s2292_s20 + $0x40] sm:$0xff] %v1520_v38   ;;  %1623 = vst [vmem:[%s2292_s20 + $0xa8] sm:$0xff] %v1585_v39   ;;  %v762_v42 = vadd.f32 %v2285_v3, %v761_v40  ;;  %v763_v43 = vpop.f32.mrb[37].mxu0  ;;  %v866_v44 = vadd.f32 %v2285_v3, %v865_v41  ;;  %v867_v45 = vpop.f32.mrb[37].mxu1 }
 0x1c8   : > { %v764_v46 = vpop.f32.mrb[38].mxu0  ;;  %v868_v47 = vpop.f32.mrb[38].mxu1 }
 0x1c9   : > { %v765_v48 = vadd.f32 %v2285_v3, %v764_v46  ;;  %v766_v49 = vpop.f32.mrb[39].mxu0  ;;  %v932_v50 = vmax.f32 %v866_v44, 0.0  ;;  %v869_v51 = vadd.f32 %v2285_v3, %v868_v47  ;;  %v870_v52 = vpop.f32.mrb[39].mxu1  ;;  %v906_v53 = vmax.f32 %v762_v42, 0.0 }
 0x1cb   : > { %v907_v54 = vmax.f32 %v765_v48, 0.0  ;;  %v933_v55 = vmax.f32 %v869_v51, 0.0 }
 0x1cd   : > { %v1525_v56 = vpack.c.bf16 %v907_v54, %v906_v53  ;;  %v1590_v57 = vpack.c.bf16 %v933_v55, %v932_v50 }
 0x1ce   : > { %v769_v58 = vpop.f32.mrb[40].mxu0  ;;  %v873_v59 = vpop.f32.mrb[40].mxu1 }
 0x1cf   : > { %1611 = vst [vmem:[%s2292_s20 + $0x48] sm:$0xff] %v1525_v56   ;;  %1624 = vst [vmem:[%s2292_s20 + $0xb0] sm:$0xff] %v1590_v57   ;;  %v770_v60 = vadd.f32 %v2285_v3, %v769_v58  ;;  %v771_v61 = vpop.f32.mrb[41].mxu0  ;;  %v874_v62 = vadd.f32 %v2285_v3, %v873_v59  ;;  %v875_v63 = vpop.f32.mrb[41].mxu1 }
 0x1d0   : > { %v772_v0 = vpop.f32.mrb[42].mxu0  ;;  %v876_v1 = vpop.f32.mrb[42].mxu1 }
 0x1d1   : > { %v773_v2 = vadd.f32 %v2285_v3, %v772_v0  ;;  %v774_v4 = vpop.f32.mrb[43].mxu0  ;;  %v934_v5 = vmax.f32 %v874_v62, 0.0  ;;  %v877_v6 = vadd.f32 %v2285_v3, %v876_v1  ;;  %v878_v7 = vpop.f32.mrb[43].mxu1  ;;  %v908_v8 = vmax.f32 %v770_v60, 0.0 }
 0x1d3   : > { %v909_v9 = vmax.f32 %v773_v2, 0.0  ;;  %v935_v10 = vmax.f32 %v877_v6, 0.0 }
 0x1d5   : > { %v1530_v11 = vpack.c.bf16 %v909_v9, %v908_v8  ;;  %v1595_v12 = vpack.c.bf16 %v935_v10, %v934_v5 }
 0x1d6   : > { %v777_v13 = vpop.f32.mrb[44].mxu0  ;;  %v881_v14 = vpop.f32.mrb[44].mxu1 }
 0x1d7   : > { %1612 = vst [vmem:[%s2292_s20 + $0x50] sm:$0xff] %v1530_v11   ;;  %1625 = vst [vmem:[%s2292_s20 + $0xb8] sm:$0xff] %v1595_v12   ;;  %v778_v15 = vadd.f32 %v2285_v3, %v777_v13  ;;  %v779_v16 = vpop.f32.mrb[45].mxu0  ;;  %v882_v17 = vadd.f32 %v2285_v3, %v881_v14  ;;  %v883_v18 = vpop.f32.mrb[45].mxu1 }
 0x1d8   : > { %v780_v19 = vpop.f32.mrb[46].mxu0  ;;  %v884_v20 = vpop.f32.mrb[46].mxu1 }
 0x1d9   : > { %v781_v21 = vadd.f32 %v2285_v3, %v780_v19  ;;  %v782_v22 = vpop.f32.mrb[47].mxu0  ;;  %v936_v23 = vmax.f32 %v882_v17, 0.0  ;;  %v885_v24 = vadd.f32 %v2285_v3, %v884_v20  ;;  %v886_v25 = vpop.f32.mrb[47].mxu1  ;;  %v910_v26 = vmax.f32 %v778_v15, 0.0 }
 0x1db   : > { %v911_v27 = vmax.f32 %v781_v21, 0.0  ;;  %v937_v28 = vmax.f32 %v885_v24, 0.0 }
 0x1dd   : > { %v1535_v29 = vpack.c.bf16 %v911_v27, %v910_v26  ;;  %v1600_v30 = vpack.c.bf16 %v937_v28, %v936_v23 }
 0x1de   : > { %v785_v31 = vpop.f32.mrb[48].mxu0 }
 0x1df   : > { %1613 = vst [vmem:[%s2292_s20 + $0x58] sm:$0xff] %v1535_v29   ;;  %1626 = vst [vmem:[%s2292_s20 + $0xc0] sm:$0xff] %v1600_v30   ;;  %v786_v32 = vadd.f32 %v2285_v3, %v785_v31  ;;  %v787_v33 = vpop.f32.mrb[49].mxu0 }
 0x1e0   : > { %v788_v34 = vpop.f32.mrb[50].mxu0 }
 0x1e1   : > { %v789_v35 = vadd.f32 %v2285_v3, %v788_v34  ;;  %v790_v36 = vpop.f32.mrb[51].mxu0  ;;  %v912_v37 = vmax.f32 %v786_v32, 0.0 }
 0x1e3   : > { %v913_v38 = vmax.f32 %v789_v35, 0.0 }
 0x1e5   : > { %v1540_v39 = vpack.c.bf16 %v913_v38, %v912_v37 }
 0x1e7   : > { %1614 = vst [vmem:[%s2292_s20 + $0x60] sm:$0xff] %v1540_v39  }
 0x1e8   : > { %1926 = shalt.err (!%p1923_p2)
}
 0x1e9   : > { %s1927_s17 = scalar_lea.hbm %s2369_s23, 3200  ;;  %s1931_s29 = scalar_lea.hbm %s2419_s3, 6400 }
 0x1ea   : > { %p1928_p13 = scmp.ne.s32.totalorder %s2369_s23, %s1927_s17  ;;  %p1932_p4 = scmp.lt.u32.totalorder %s2369_s23, %s2419_s3 }
 0x1eb   : > { %p1933_p5 = scmp.lt.u32.totalorder %s1931_s29, %s1927_s17  ;;  %p1935_p11 = scmp.lt.u32.totalorder %s1927_s17, %s2369_s23 }
 0x1ec   : > { %p1929_p6 = pnand %p1928_p13, %p2433_p0 }
 0x1ed   : > { %p1934_p8 = por %p1933_p5, %p1932_p4 }
 0x1ee   : > { %p1930_p10 = pneg %p1929_p6 }
 0x1ef   : > { %p1936_p1 = por %p1935_p11, %p1934_p8 }
 0x1f1   : > { %p1937_p3 = pnand %p1936_p1, %p1930_p10 }
 0x1f3   : > { %1940 = shalt.err (!%p1937_p3)
}
 0x1f4   : > { %s1994_s18 = smov 64   ;;  %s1995_s20 = smov 4  }
 0x1f5   : > { %1672 = dma.vmem_to_hbm [thread:$0]  (%p2433_p0), %s2371_s24, 3200, %s2369_s23, %s1189_s6, %s1994_s18, %s1994_s18, %s1995_s20  }
 0x1f6 PF: > { %s1217_s11 = sand.u32 1, %s1971_s12   ;;  %p2434_p7 = scmp.ne.s32.totalorder %s2424_s19, 0 }
 0x1f7   : > { %p2435_p9 = scmp.ge.s32.totalorder %s1983_s15, 2  ;;  %s1218_s27 = scalar_lea.sflag [#allocation4], %s1217_s11 }
 0x1f9   : > { %p1686_p12 = pnand %p2435_p9, %p2434_p7 }
 0x1fb   : > { %1966 = dma.done.wait (!%p1686_p12), %s1218_s27, 3200  }
 0x1fc   : > { %1968 = vsyncadd (!%p1686_p12), %s1218_s27, 4294964096  ;;  %p17_p2 = scmp.ge.s32.totalorder %s2127_s5, 4   ;;  %s2436_s12 = smov %s1975_s13 }
 0x1fd   : > { %s2437_s13 = smov %s1979_s14  ;;  %s2438_s14 = smov %s2143_s8 }
 0x1fe   : > { %s2439_s15 = smov %s2127_s5  ;;  %19 = sbr.rel (!%p17_p2) target bundleno = 6 (0x6), region = 85 }
 0x205   :  { %1223 = vsyncpa [#allocation3], 1 }
 0x206   :  { %1225 = vsyncpa [#allocation3 + $0x1], 1 }
 0x207   :  { %1226 = vsyncpa [#allocation6], 1 }
 0x208   :  { %1227 = vsyncpa [#allocation4], 1 }
 0x209   :  { %1229 = vsyncpa [#allocation4 + $0x1], 1 }

// kernel: minh_dqn_forward.4
= control target key start
LH: loop header
LB: loop body
LE: loop exit
PB: predicated region body
PF: predicated region fallthrough
CT: control target
= control target key end

     0   :  { %8 = vsyncpa [#allocation3], 0  ;;  %s1443_s0 = inlined_call_operand.hbm [shape: bf16[162,256], index: 0, kind: input, shape index: {}]   ;;  %s1444_s1 = inlined_call_operand.hbm [shape: bf16[256,128], index: 1, kind: input, shape index: {}]   ;;  %s1445_s2 = inlined_call_operand.hbm [shape: f32[1,128], index: 2, kind: input, shape index: {}]   ;;  %s1446_s3 = inlined_call_operand.hbm [shape: bf16[162,128], index: 3, kind: output, shape index: {}]  }
   0x1   :  { %10 = vsyncpa [#allocation3 + $0x1], 0 }
   0x2   :  { %11 = vsyncpa [#allocation6], 0 }
   0x3   :  { %12 = vsyncpa [#allocation4], 0 }
   0x4   :  { %14 = vsyncpa [#allocation4 + $0x1], 0  ;;  %s1161_s12 = smov 0   ;;  %s1163_s13 = smov 0  }
   0x5   :  { %s1165_s14 = smov 0   ;;  %s1167_s15 = smov 0  }
   0x6 LB: > { %s1182_s16 = sadd.s32 4294967295, %s1129_s15   ;;  %s698_s17 = sadd.s32 4294967294, %s1129_s15   ;;  %s1129_s15 = sphi %s1167_s15, %s1466_s15   ;;  %s1125_s14 = sphi %s1165_s14, %s1465_s14   ;;  %s1121_s13 = sphi %s1163_s13, %s1464_s13   ;;  %s1117_s12 = sphi %s1161_s12, %s1463_s12  }
   0x7   : > { %s1186_s18 = sadd.s32 1, %s1129_s15   ;;  %s27_s19 = sadd.s32 1, %s1125_s14 }
   0x8   : > { %s24_s20 = ssub.s32 %s1129_s15, %s1186_s18  ;;  %p34_p0 = scmp.ne.s32.totalorder %s1125_s14, %s1121_s13 }
   0x9   : > { %p25_p1 = scmp.eq.s32.totalorder %s24_s20, 0  ;;  %p35_p2 = scmp.eq.s32.totalorder %s1129_s15, 0 }
   0xa   : > { %p40_p3 = scmp.ne.s32.totalorder %s1121_s13, %s1117_s12  ;;  %p1447_p4 = scmp.eq.s32.totalorder %s1182_s16, 0 }
   0xb   : > { %s1198_s21 = scalar_select %p25_p1, %s1125_s14, %s27_s19  }
   0xc   : > { %p1200_p5 = por %p35_p2, %p34_p0  ;;  %p1206_p6 = por %p1447_p4, %p40_p3 }
   0xd   : > { %p106_p7 = scmp.eq.s32.totalorder %s1182_s16, 1  ;;  %p112_p8 = scmp.eq.s32.totalorder %s698_s17, 1 }
   0xe   : > { %s1450_s22 = scalar_select %p1200_p5, 1, 0 }
   0xf   : > { %s1451_s23 = scalar_select %p1206_p6, 1, 0 }
  0x10   : > { %p699_p9 = scmp.ge.s32.totalorder %s1129_s15, 1  ;;  %p119_p10 = scmp.lt.s32.totalorder %s1129_s15, 3 }
  0x11   : > { %p1213_p11 = por %p106_p7, %p34_p0  ;;  %p1217_p12 = por %p112_p8, %p40_p3 }
  0x12   : > { %p1221_p13 = pnand %p699_p9, %p119_p10  ;;  %s1131_s27 = smov [#allocation5]  }
  0x13   : > { %s1452_s24 = scalar_select %p1213_p11, 1, 0 }
  0x14   : > { %s1453_s25 = scalar_select %p1217_p12, 1, 0 }
  0x15   : > { %s1454_s26 = scalar_select %p1221_p13, 1, 0 }
  0x16   : > { %p886_p1 = pneg %p1221_p13  ;;  %s131_s28 = sshll.u32 %s1131_s27, 4  ;;  %s132_s28 = int_to_ptr.vmem [resolvable:$true] %s131_s28 }
  0x17   : > { %s1132_s30 = smov [#allocation7]   ;;  %s975_s7 = scalar_lea.hbm %s1444_s1, 2048 }
  0x18   : > { %p1229_p2 = pnand %p886_p1, %p1447_p4  ;;  %s145_s4 = sshll.u32 %s1132_s30, 4  ;;  %s1233_s4 = int_to_ptr.vmem [resolvable:$true] %s145_s4 }
  0x19   : > { %p976_p0 = scmp.ne.s32.totalorder %s1444_s1, %s975_s7  ;;  %p982_p9 = scmp.lt.u32.totalorder %s975_s7, %s1444_s1 }
  0x1a   : > { %p977_p3 = pneg %p1229_p2 }
  0x1c   : > { %p978_p7 = pnand %p977_p3, %p976_p0 }
  0x1e   : > { %p979_p8 = pneg %p978_p7 }
  0x20   : > { %p984_p10 = pnand %p982_p9, %p979_p8 }
  0x22   : > { %987 = shalt.err (!%p984_p10)
}
  0x23   : > { %s988_s17 = scalar_lea.vmem %s132_s28, 2048  ;;  %p996_p11 = scmp.lt.s32.totalorder %s132_s28, %s132_s28 }
  0x24   : > { %p989_p1 = scmp.ne.s32.totalorder %s132_s28, %s988_s17  ;;  %p997_p6 = scmp.lt.s32.totalorder %s988_s17, %s988_s17 }
  0x26   : > { %p991_p4 = pnand %p989_p1, %p977_p3  ;;  %p998_p13 = por %p997_p6, %p996_p11 }
  0x28   : > { %p992_p12 = pneg %p991_p4 }
  0x2a   : > { %p999_p5 = pnand %p998_p13, %p992_p12 }
  0x2c   : > { %1002 = shalt.err (!%p999_p5)
}
  0x2d   : > { %s1133_s19 = smov 64   ;;  %s1134_s20 = smov 4  }
  0x2e   : > { %889 = dma.hbm_to_vmem [thread:$0]  (!%p1229_p2), %s1444_s1, 2048, %s132_s28, [#allocation6], %s1133_s19, %s1133_s19, %s1134_s20  }
  0x2f   : > { %s1003_s7 = scalar_lea.hbm %s1445_s2, 16 }
  0x30   : > { %p1004_p4 = scmp.ne.s32.totalorder %s1445_s2, %s1003_s7  ;;  %p1010_p11 = scmp.lt.u32.totalorder %s1003_s7, %s1445_s2 }
  0x32   : > { %p1006_p5 = pnand %p1004_p4, %p977_p3 }
  0x34   : > { %p1007_p6 = pneg %p1006_p5 }
  0x36   : > { %p1012_p12 = pnand %p1010_p11, %p1007_p6 }
  0x38   : > { %1015 = shalt.err (!%p1012_p12)
}
  0x39   : > { %s1016_s28 = scalar_lea.vmem %s1233_s4, 16  ;;  %s1023_s17 = scalar_lea.vmem %s1233_s4, 32 }
  0x3a   : > { %p1017_p13 = scmp.ne.s32.totalorder %s1233_s4, %s1016_s28  ;;  %p1024_p8 = scmp.lt.s32.totalorder %s1233_s4, %s1233_s4 }
  0x3b   : > { %p1025_p9 = scmp.lt.s32.totalorder %s1023_s17, %s1016_s28 }
  0x3c   : > { %p1019_p0 = pnand %p1017_p13, %p977_p3 }
  0x3d   : > { %p1026_p10 = por %p1025_p9, %p1024_p8 }
  0x3e   : > { %p1020_p7 = pneg %p1019_p0 }
  0x40   : > { %p1027_p1 = pnand %p1026_p10, %p1020_p7 }
  0x42   : > { %1030 = shalt.err (!%p1027_p1)
}
  0x43   : > { %892 = dma.hbm_to_vmem [thread:$0]  (!%p1229_p2), %s1445_s2, 16, %s1233_s4, [#allocation6]  }
  0x44   : > { %p702_p4 = scmp.ge.s32.totalorder %s1129_s15, 2 }
  0x45   : > { %p1456_p3 = scmp.ne.s32.totalorder (!%p702_p4), %s1450_s22, 0 }
  0x46   : > { %152 = sbr.rel (%p702_p4) target bundleno = 112 (0x70), region = 24 }
  0x4d   : > { %155 = sbr.rel (!%p1456_p3) target bundleno = 112 (0x70), region = 28  ;;  %s156_s27 = sand.u32 (%p1456_p3), 1, %s1125_s14  }
  0x4e   : > { %s161_s30 = smul.u32 (%p1456_p3), 11, %s1129_s15  ;;  %s1293_s7 = scalar_lea.sflag (%p1456_p3), [#allocation3], %s156_s27 }
  0x4f   : > { %s873_s5 = smul.u32 (%p1456_p3), 88, %s156_s27 }
  0x50   : > { %s162_s6 = ssub.s32 (%p1456_p3), 21, %s161_s30 }
  0x51   : > { %p163_p5 = scmp.lt.s32.totalorder (%p1456_p3), %s162_s6, 11  ;;  %s160_s8 = scalar_lea.vmem (%p1456_p3), [#allocation2], %s873_s5 }
  0x54   : > { %s1468_s6 = smov (!%p163_p5, %s162_s6), 11 }
  0x55   : > { %s1290_s29 = sshll.u32 %s1468_s6, 7 }
  0x56   : > { %s168_s4 = ssub.s32 1408, %s1290_s29 }
  0x57   : > { %169 = vsyncadd %s1293_s7, %s168_s4  ;;  %p705_p2 = scmp.ne.s32.totalorder %s1290_s29, 0  ;;  %s800_s22 = smul.u32 1408, %s1129_s15 }
  0x58   : > { %s175_s9 = sshll.u32 %s160_s8, 4  ;;  %s1035_s27 = scalar_lea.hbm %s1443_s0, 2688  ;;  %s1303_s9 = int_to_ptr.vmem [resolvable:$true] %s175_s9 }
  0x59   : > { %s1301_s28 = scalar_lea.hbm %s1443_s0, %s800_s22 }
  0x5a   : > { %s1031_s17 = scalar_lea.hbm %s1301_s28, %s1290_s29  ;;  %p1036_p13 = scmp.lt.u32.totalorder %s1301_s28, %s1443_s0 }
  0x5b   : > { %p1032_p6 = scmp.ne.s32.totalorder %s1301_s28, %s1031_s17  ;;  %p1037_p0 = scmp.lt.u32.totalorder %s1035_s27, %s1031_s17 }
  0x5c   : > { %p1039_p8 = scmp.lt.u32.totalorder %s1031_s17, %s1301_s28 }
  0x5d   : > { %p1033_p11 = pnand %p1032_p6, %p705_p2  ;;  %p1038_p7 = por %p1037_p0, %p1036_p13 }
  0x5f   : > { %p1034_p12 = pneg %p1033_p11  ;;  %p1040_p9 = por %p1039_p8, %p1038_p7 }
  0x61   : > { %p1041_p10 = pnand %p1040_p9, %p1034_p12 }
  0x63   : > { %1044 = shalt.err (!%p1041_p10)
}
  0x64   : > { %s1045_s6 = scalar_lea.vmem %s1303_s9, %s1290_s29  ;;  %s1135_s4 = smov [#allocation2]  }
  0x65   : > { %p1046_p1 = scmp.ne.s32.totalorder %s1303_s9, %s1045_s6  ;;  %s1049_s8 = sshll.u32 %s1135_s4, 4  ;;  %s1050_s8 = int_to_ptr.vmem [resolvable:$false] %s1049_s8 }
  0x66   : > { %s1051_s22 = scalar_lea.vmem %s1050_s8, 2816  ;;  %p1052_p6 = scmp.lt.s32.totalorder %s1303_s9, %s1050_s8 }
  0x67   : > { %p1047_p3 = pnand %p1046_p1, %p705_p2  ;;  %p1053_p11 = scmp.lt.s32.totalorder %s1051_s22, %s1045_s6 }
  0x69   : > { %p1048_p5 = pneg %p1047_p3  ;;  %p1054_p13 = por %p1053_p11, %p1052_p6 }
  0x6b   : > { %p1055_p0 = pnand %p1054_p13, %p1048_p5 }
  0x6d   : > { %1058 = shalt.err (!%p1055_p0)
}
  0x6e   : > { %s1136_s10 = smov 128   ;;  %s1137_s11 = smov 8  }
  0x6f   : > { %181 = dma.hbm_to_vmem [thread:$0]  (%p705_p2), %s1301_s28, %s1290_s29, %s1303_s9, %s1293_s7, %s1136_s10, %s1136_s10, %s1137_s11  }
  0x70 PF: > { %p1457_p12 = scmp.ne.s32.totalorder %s1454_s26, 0 }
  0x71   : > { %s1333_s17 = sand.u32 (!%p1457_p12), 1, %s1121_s13   ;;  %p1458_p7 = scmp.ne.s32.totalorder (!%p1457_p12), %s1451_s23, 0 }
  0x72   : > { %187 = sbr.rel (%p1457_p12) target bundleno = 426 (0x1aa), region = 32  ;;  %s190_s20 = scalar_lea.sflag (!%p1457_p12), [#allocation3], %s1333_s17 }
  0x73   : > { %s874_s19 = smul.u32 (!%p1457_p12), 88, %s1333_s17 }
  0x75   : > { %s1337_s27 = scalar_lea.vmem (!%p1457_p12), [#allocation2], %s874_s19 }
  0x79   : > { %1104 = dma.done.wait (%p1458_p7), %s190_s20, 1408  }
  0x7a   : > { %1106 = vsyncadd (%p1458_p7), %s190_s20, 4294965888  ;;  %p1459_p2 = scmp.eq.s32.totalorder %s1182_s16, 0 }
  0x7c   : > { %1108 = dma.done.wait (%p1459_p2), [#allocation6], 2064   ;;  %p1460_p8 = pmov %p1459_p2 }
  0x7d   : > { %v942_v0 = vld [vmem:[#allocation5 + $0x40] sm:$0xff]   ;;  %v944_v2 = vld [vmem:[#allocation5 + $0x48] sm:$0xff]   ;;  %v946_v4 = vld [vmem:[#allocation5 + $0x50] sm:$0xff]   ;;  %s875_s23 = smul.u32 44, %s1333_s17  ;;  %s587_s29 = scalar_lea.sflag [#allocation4], %s1333_s17 }
  0x7e   : > { %1110 = vsyncadd (%p1460_p8), [#allocation6], 4294965232  ;;  %v943_v1 = vld [vmem:[#allocation5] sm:$0xff]   ;;  %805 = vmatprep.subr.bf16.mxu0 %v942_v0  ;;  %857 = vmatprep.subr.bf16.mxu1 %v942_v0  ;;  %v945_v3 = vld [vmem:[#allocation5 + $0x8] sm:$0xff]   ;;  %p1461_p9 = scmp.ne.s32.totalorder %s1452_s24, 0 }
  0x7f   : > { %806 = vmatpush3.bf16.msra.mxu0 %v943_v1  ;;  %865 = vmatpush3.bf16.msra.mxu1 %v943_v1  ;;  %v947_v5 = vld [vmem:[#allocation5 + $0x10] sm:$0xff]   ;;  %v948_v6 = vld [vmem:[#allocation5 + $0x58] sm:$0xff]   ;;  %v950_v8 = vld [vmem:[#allocation5 + $0x60] sm:$0xff]   ;;  %s1365_s26 = scalar_lea.vmem [#allocation8], %s875_s23  ;;  %s594_s7 = smul.u32 (%p1461_p9), 11, %s1182_s16 }
  0x80   : > { %807 = vmatprep.subr.bf16.mxu0 %v944_v2  ;;  %858 = vmatprep.subr.bf16.mxu1 %v944_v2  ;;  %v949_v7 = vld [vmem:[#allocation5 + $0x18] sm:$0xff]   ;;  %v951_v9 = vld [vmem:[#allocation5 + $0x20] sm:$0xff]   ;;  %v952_v10 = vld [vmem:[#allocation5 + $0x68] sm:$0xff]  }
  0x81   : > { %v960_v11 = vld [vmem:[%s1337_s27 + $0x4] ss:$8 sps:$4 sm:$0xff]   ;;  %v963_v12 = vld [vmem:[%s1337_s27 + $0x34] ss:$8 sps:$4 sm:$0xff]   ;;  %v958_v18 = vld [vmem:[%s1337_s27] ss:$8 sps:$4 sm:$0xff]  }
  0x82   : > { %v953_v13 = vld [vmem:[#allocation5 + $0x28] sm:$0xff]   ;;  %v954_v14 = vld [vmem:[#allocation5 + $0x70] sm:$0xff]   ;;  %471 = vmatprep.mubr.bf16.mxu0 %v960_v11  ;;  %495 = vmatprep.mubr.bf16.mxu1 %v963_v12  ;;  %v956_v16 = vld [vmem:[#allocation5 + $0x78] sm:$0xff]   ;;  %s595_s9 = ssub.s32 (%p1461_p9), 21, %s594_s7 }
  0x83   : > { %808 = vmatpush3.bf16.msra.mxu0 %v945_v3  ;;  %866 = vmatpush3.bf16.msra.mxu1 %v945_v3  ;;  %v955_v15 = vld [vmem:[#allocation5 + $0x30] sm:$0xff]   ;;  %v957_v17 = vld [vmem:[#allocation5 + $0x38] sm:$0xff]   ;;  %v1358_v31 = vld [vmem:[#allocation7] ss:$0 sm:$0xff]  ;;  %p596_p10 = scmp.lt.s32.totalorder (%p1461_p9), %s595_s9, 11 }
  0x84   : > { %809 = vmatprep.subr.bf16.mxu0 %v946_v4  ;;  %859 = vmatprep.subr.bf16.mxu1 %v946_v4  ;;  %v961_v19 = vld [vmem:[%s1337_s27 + $0x30] ss:$8 sps:$4 sm:$0xff]   ;;  %v964_v20 = vld [vmem:[%s1337_s27 + $0x14] ss:$8 sps:$4 sm:$0xff]   ;;  %v966_v21 = vld [vmem:[%s1337_s27 + $0x44] ss:$8 sps:$4 sm:$0xff]  }
  0x85   : > { %v246_v22 = vld [vmem:[%s1337_s27 + $0x50] sm:$0xff]  ;;  %v969_v24 = vld [vmem:[%s1337_s27 + $0x40] ss:$8 sps:$4 sm:$0xff]   ;;  %v970_v25 = vld [vmem:[%s1337_s27 + $0x24] ss:$8 sps:$4 sm:$0xff]  }
  0x86   : > { %v968_v23 = vld [vmem:[%s1337_s27 + $0x10] ss:$8 sps:$4 sm:$0xff]   ;;  %v725_v26 = vcombine.high %v246_v22, %v246_v22  ;;  %v973_v27 = vld [vmem:[%s1337_s27 + $0x20] ss:$8 sps:$4 sm:$0xff]   ;;  %v724_v28 = vcombine.low %v246_v22, %v246_v22 }
  0x87   : > { %810 = vmatpush3.bf16.msra.mxu0 %v947_v5  ;;  %867 = vmatpush3.bf16.msra.mxu1 %v947_v5 }
  0x88   : > { %811 = vmatprep.subr.bf16.mxu0 %v948_v6  ;;  %860 = vmatprep.subr.bf16.mxu1 %v948_v6 }
  0x8b   : > { %812 = vmatpush3.bf16.msra.mxu0 %v949_v7  ;;  %868 = vmatpush3.bf16.msra.mxu1 %v949_v7 }
  0x8c   : > { %813 = vmatprep.subr.bf16.mxu0 %v950_v8  ;;  %861 = vmatprep.subr.bf16.mxu1 %v950_v8 }
  0x8f   : > { %814 = vmatpush3.bf16.msra.mxu0 %v951_v9  ;;  %869 = vmatpush3.bf16.msra.mxu1 %v951_v9 }
  0x90   : > { %815 = vmatprep.subr.bf16.mxu0 %v952_v10  ;;  %862 = vmatprep.subr.bf16.mxu1 %v952_v10 }
  0x93   : > { %816 = vmatpush3.bf16.msra.mxu0 %v953_v13  ;;  %870 = vmatpush3.bf16.msra.mxu1 %v953_v13 }
  0x94   : > { %817 = vmatprep.subr.bf16.mxu0 %v954_v14  ;;  %863 = vmatprep.subr.bf16.mxu1 %v954_v14 }
  0x97   : > { %818 = vmatpush3.bf16.msra.mxu0 %v955_v15  ;;  %871 = vmatpush3.bf16.msra.mxu1 %v955_v15 }
  0x98   : > { %819 = vmatprep.subr.bf16.mxu0 %v956_v16  ;;  %864 = vmatprep.subr.bf16.mxu1 %v956_v16 }
  0x9b   : > { %820 = vmatpush3.bf16.msra.mxu0 %v957_v17  ;;  %872 = vmatpush3.bf16.msra.mxu1 %v957_v17 }
  0x9e   : > { %472 = vmatmul.mubr.bf16.vlgmr.msra.gmra.mrb[0].mxu0 %v958_v18  ;;  %496 = vmatmul.mubr.bf16.vlgmr.msra.gmra.mrb[0].mxu1 %v961_v19 }
  0x9f   : > { %479 = vmatprep.mubr.bf16.mxu0 %v964_v20  ;;  %503 = vmatprep.mubr.bf16.mxu1 %v966_v21 }
  0xa6   : > { %480 = vmatmul.mubr.bf16.gmra.mrb[4].mxu0 %v968_v23  ;;  %504 = vmatmul.mubr.bf16.gmra.mrb[4].mxu1 %v969_v24 }
  0xa7   : > { %487 = vmatprep.mubr.bf16.mxu0 %v970_v25  ;;  %511 = vmatprep.mubr.bf16.mxu1 %v725_v26 }
  0xae   : > { %488 = vmatmul.mubr.bf16.gmra.mrb[8].mxu0 %v973_v27  ;;  %512 = vmatmul.mubr.bf16.gmra.mrb[8].mxu1 %v724_v28 }
 0x171   : > { %v821_v29 = vpop.f32.mrb[0].mxu0  ;;  %v839_v30 = vpop.f32.mrb[0].mxu1 }
 0x172   : > { %v822_v32 = vpop.f32.mrb[1].mxu0  ;;  %v840_v33 = vpop.f32.mrb[1].mxu1 }
 0x173   : > { %v823_v34 = vadd.f32 %v822_v32, %v821_v29  ;;  %v841_v35 = vadd.f32 %v840_v33, %v839_v30  ;;  %v824_v36 = vpop.f32.mrb[2].mxu0  ;;  %v842_v37 = vpop.f32.mrb[2].mxu1 }
 0x174   : > { %v825_v38 = vpop.f32.mrb[3].mxu0  ;;  %v843_v39 = vpop.f32.mrb[3].mxu1 }
 0x175   : > { %v474_v40 = vadd.f32 %v823_v34, %v1358_v31  ;;  %v498_v41 = vadd.f32 %v841_v35, %v1358_v31  ;;  %v826_v42 = vadd.f32 %v825_v38, %v824_v36  ;;  %v844_v43 = vadd.f32 %v843_v39, %v842_v37 }
 0x177   : > { %v525_v44 = vmax.f32 %v498_v41, 0.0  ;;  %v477_v45 = vadd.f32 %v826_v42, %v1358_v31  ;;  %v501_v46 = vadd.f32 %v844_v43, %v1358_v31  ;;  %v519_v47 = vmax.f32 %v474_v40, 0.0 }
 0x179   : > { %v520_v48 = vmax.f32 %v477_v45, 0.0  ;;  %v526_v49 = vmax.f32 %v501_v46, 0.0  ;;  %v827_v50 = vpop.f32.mrb[4].mxu0  ;;  %v845_v51 = vpop.f32.mrb[4].mxu1 }
 0x17a   : > { %v828_v52 = vpop.f32.mrb[5].mxu0  ;;  %v846_v53 = vpop.f32.mrb[5].mxu1 }
 0x17b   : > { %v778_v54 = vpack.c.bf16 %v520_v48, %v519_v47  ;;  %v793_v55 = vpack.c.bf16 %v526_v49, %v525_v44  ;;  %v829_v56 = vadd.f32 %v828_v52, %v827_v50  ;;  %v847_v57 = vadd.f32 %v846_v53, %v845_v51  ;;  %v830_v58 = vpop.f32.mrb[6].mxu0  ;;  %v848_v59 = vpop.f32.mrb[6].mxu1 }
 0x17c   : > { %v831_v60 = vpop.f32.mrb[7].mxu0  ;;  %v849_v61 = vpop.f32.mrb[7].mxu1 }
 0x17d   : > { %779 = vst [vmem:[%s1365_s26] sm:$0xff] %v778_v54   ;;  %803 = vst [vmem:[%s1365_s26 + $0x18] sm:$0xff] %v793_v55   ;;  %v482_v62 = vadd.f32 %v829_v56, %v1358_v31  ;;  %v506_v63 = vadd.f32 %v847_v57, %v1358_v31  ;;  %v832_v0 = vadd.f32 %v831_v60, %v830_v58 }
 0x17e   : > { %v850_v1 = vadd.f32 %v849_v61, %v848_v59 }
 0x17f   : > { %v527_v2 = vmax.f32 %v506_v63, 0.0  ;;  %v485_v3 = vadd.f32 %v832_v0, %v1358_v31  ;;  %v521_v5 = vmax.f32 %v482_v62, 0.0 }
 0x180   : > { %v509_v4 = vadd.f32 %v850_v1, %v1358_v31 }
 0x181   : > { %v522_v6 = vmax.f32 %v485_v3, 0.0  ;;  %v833_v8 = vpop.f32.mrb[8].mxu0  ;;  %v851_v9 = vpop.f32.mrb[8].mxu1 }
 0x182   : > { %v528_v7 = vmax.f32 %v509_v4, 0.0  ;;  %v834_v10 = vpop.f32.mrb[9].mxu0  ;;  %v852_v11 = vpop.f32.mrb[9].mxu1 }
 0x183   : > { %v783_v12 = vpack.c.bf16 %v522_v6, %v521_v5  ;;  %v835_v14 = vadd.f32 %v834_v10, %v833_v8  ;;  %v853_v15 = vadd.f32 %v852_v11, %v851_v9  ;;  %v836_v16 = vpop.f32.mrb[10].mxu0  ;;  %v854_v17 = vpop.f32.mrb[10].mxu1 }
 0x184   : > { %v798_v13 = vpack.c.bf16 %v528_v7, %v527_v2  ;;  %v837_v18 = vpop.f32.mrb[11].mxu0  ;;  %v855_v19 = vpop.f32.mrb[11].mxu1 }
 0x185   : > { %801 = vst [vmem:[%s1365_s26 + $0x8] sm:$0xff] %v783_v12   ;;  %v490_v20 = vadd.f32 %v835_v14, %v1358_v31  ;;  %v514_v21 = vadd.f32 %v853_v15, %v1358_v31  ;;  %v838_v22 = vadd.f32 %v837_v18, %v836_v16 }
 0x186   : > { %804 = vst [vmem:[%s1365_s26 + $0x20] sm:$0xff] %v798_v13  }
 0x187   : > { %v529_v23 = vmax.f32 %v514_v21, 0.0  ;;  %v493_v24 = vadd.f32 %v838_v22, %v1358_v31  ;;  %v523_v25 = vmax.f32 %v490_v20, 0.0  ;;  %593 = sbr.rel (!%p1461_p9) target bundleno = 426 (0x1aa), region = 48 }
 0x189   : > { %v773_v26 = vpack.c.bf16 %v529_v23, %v529_v23  ;;  %v524_v27 = vmax.f32 %v493_v24, 0.0 }
 0x18b   : > { %585 = vst [vmem:[%s1365_s26 + $0x28] sm:$0xf] %v773_v26  ;;  %v788_v28 = vpack.c.bf16 %v524_v27, %v523_v25 }
 0x18d   : > { %802 = vst [vmem:[%s1365_s26 + $0x10] sm:$0xff] %v788_v28  }
 0x18e   : > { %s1470_s9 = smov (!%p596_p10, %s595_s9), 11 }
 0x18f   : > { %s1384_s28 = sshll.u32 %s1470_s9, 6 }
 0x190   : > { %s600_s30 = ssub.s32 704, %s1384_s28 }
 0x191   : > { %601 = vsyncadd %s587_s29, %s600_s30  ;;  %p754_p1 = scmp.ne.s32.totalorder %s1384_s28, 0  ;;  %s774_s24 = smul.u32 704, %s1182_s16 }
 0x192   : > { %s606_s5 = sshll.u32 %s1365_s26, 4  ;;  %s1138_s10 = smov [#allocation8]   ;;  %s1397_s5 = int_to_ptr.vmem [resolvable:$true] %s606_s5 }
 0x193   : > { %s1395_s8 = scalar_lea.hbm %s1446_s3, %s774_s24  ;;  %s1059_s22 = scalar_lea.vmem %s1397_s5, %s1384_s28 }
 0x194   : > { %p1060_p3 = scmp.ne.s32.totalorder %s1397_s5, %s1059_s22  ;;  %s1063_s11 = sshll.u32 %s1138_s10, 4  ;;  %s1064_s11 = int_to_ptr.vmem [resolvable:$false] %s1063_s11 }
 0x195   : > { %s1065_s16 = scalar_lea.vmem %s1064_s11, 1408  ;;  %p1066_p11 = scmp.lt.s32.totalorder %s1397_s5, %s1064_s11 }
 0x196   : > { %p1061_p5 = pnand %p1060_p3, %p754_p1  ;;  %p1067_p13 = scmp.lt.s32.totalorder %s1065_s16, %s1059_s22 }
 0x198   : > { %p1062_p6 = pneg %p1061_p5  ;;  %p1068_p0 = por %p1067_p13, %p1066_p11 }
 0x19a   : > { %p1069_p12 = pnand %p1068_p0, %p1062_p6 }
 0x19c   : > { %1072 = shalt.err (!%p1069_p12)
}
 0x19d   : > { %s1073_s19 = scalar_lea.hbm %s1395_s8, %s1384_s28  ;;  %s1077_s23 = scalar_lea.hbm %s1446_s3, 1344 }
 0x19e   : > { %p1074_p7 = scmp.ne.s32.totalorder %s1395_s8, %s1073_s19  ;;  %p1078_p9 = scmp.lt.u32.totalorder %s1395_s8, %s1446_s3 }
 0x19f   : > { %p1079_p10 = scmp.lt.u32.totalorder %s1077_s23, %s1073_s19  ;;  %p1081_p5 = scmp.lt.u32.totalorder %s1073_s19, %s1395_s8 }
 0x1a0   : > { %p1075_p2 = pnand %p1074_p7, %p754_p1 }
 0x1a1   : > { %p1080_p3 = por %p1079_p10, %p1078_p9 }
 0x1a2   : > { %p1076_p8 = pneg %p1075_p2 }
 0x1a3   : > { %p1082_p6 = por %p1081_p5, %p1080_p3 }
 0x1a5   : > { %p1083_p11 = pnand %p1082_p6, %p1076_p8 }
 0x1a7   : > { %1086 = shalt.err (!%p1083_p11)
}
 0x1a8   : > { %s1139_s9 = smov 64   ;;  %s1140_s30 = smov 4  }
 0x1a9   : > { %612 = dma.vmem_to_hbm [thread:$0]  (%p754_p1), %s1397_s5, %s1384_s28, %s1395_s8, %s587_s29, %s1139_s9, %s1139_s9, %s1140_s30  }
 0x1aa PF: > { %s621_s24 = sand.u32 1, %s1117_s12   ;;  %p1462_p13 = scmp.ne.s32.totalorder %s1453_s25, 0 }
 0x1ab   : > { %s622_s6 = scalar_lea.sflag [#allocation4], %s621_s24 }
 0x1ac   : > { %p894_p0 = pnand %p702_p4, %p1462_p13 }
 0x1ae   : > { %1112 = dma.done.wait (!%p894_p0), %s622_s6, 704  }
 0x1af   : > { %1114 = vsyncadd (!%p894_p0), %s622_s6, 4294966592  ;;  %p17_p12 = scmp.ge.s32.totalorder %s1186_s18, 4   ;;  %s1463_s12 = smov %s1121_s13 }
 0x1b0   : > { %s1464_s13 = smov %s1125_s14  ;;  %s1465_s14 = smov %s1198_s21 }
 0x1b1   : > { %s1466_s15 = smov %s1186_s18  ;;  %19 = sbr.rel (!%p17_p12) target bundleno = 6 (0x6), region = 85 }
 0x1b8   :  { %627 = vsyncpa [#allocation3], 1 }
 0x1b9   :  { %629 = vsyncpa [#allocation3 + $0x1], 1 }
 0x1ba   :  { %630 = vsyncpa [#allocation6], 1 }
 0x1bb   :  { %631 = vsyncpa [#allocation4], 1 }
 0x1bc   :  { %633 = vsyncpa [#allocation4 + $0x1], 1 }

// kernel: minh_dqn_forward.5
= control target key start
LH: loop header
LB: loop body
LE: loop exit
PB: predicated region body
PF: predicated region fallthrough
CT: control target
= control target key end

     0   :  { %10 = vsyncpa [#allocation3], 0  ;;  %s4129_s0 = inlined_call_operand.hbm [shape: bf16[2,2592], index: 0, kind: input, shape index: {}]   ;;  %s4130_s1 = inlined_call_operand.hbm [shape: bf16[2592,256], index: 1, kind: input, shape index: {}]   ;;  %s4131_s2 = inlined_call_operand.hbm [shape: f32[1,256], index: 2, kind: input, shape index: {}]   ;;  %s4132_s3 = inlined_call_operand.hbm [shape: bf16[256,128], index: 3, kind: input, shape index: {}]   ;;  %s4133_s4 = inlined_call_operand.hbm [shape: f32[1,128], index: 4, kind: input, shape index: {}]   ;;  %s4134_s5 = inlined_call_operand.hbm [shape: f32[2,128], index: 5, kind: output, shape index: {}]  }
   0x1   :  { %11 = vsyncpa [#allocation6], 0 }
   0x2   :  { %12 = vsyncpa [#allocation9], 0 }
   0x3   :  { %13 = vsyncpa [#allocation4], 0  ;;  %s3916_s18 = smov [#allocation5]   ;;  %s3776_s22 = scalar_lea.hbm %s4130_s1, 41472 }
   0x4   :  { %s29_s19 = sshll.u32 %s3916_s18, 4  ;;  %p3777_p0 = scmp.ne.s32.totalorder %s4130_s1, %s3776_s22  ;;  %s30_s19 = int_to_ptr.vmem [resolvable:$true] %s29_s19 }
   0x5   :  { %p3780_p1 = scmp.lt.u32.totalorder %s3776_s22, %s4130_s1 }
   0x7   :  { %p3782_p2 = pnand %p3780_p1, %p3777_p0 }
   0x9   :  { %3785 = shalt.err (!%p3782_p2)
}
   0xa   :  { %s3786_s27 = scalar_lea.vmem %s30_s19, 41472  ;;  %p3791_p4 = scmp.lt.s32.totalorder %s30_s19, %s30_s19 }
   0xb   :  { %p3787_p3 = scmp.ne.s32.totalorder %s30_s19, %s3786_s27  ;;  %p3792_p5 = scmp.lt.s32.totalorder %s3786_s27, %s3786_s27 }
   0xd   :  { %p3793_p6 = por %p3792_p5, %p3791_p4 }
   0xf   :  { %p3794_p7 = pnand %p3793_p6, %p3787_p3 }
  0x11   :  { %3797 = shalt.err (!%p3794_p7)
}
  0x12   :  { %s3917_s28 = smov 128   ;;  %s3918_s29 = smov 8  }
  0x13   :  { %35 = dma.hbm_to_vmem [thread:$0]  %s4130_s1, 41472, %s30_s19, [#allocation6], %s3917_s28, %s3917_s28, %s3918_s29  }
  0x14   :  { %s3919_s7 = smov [#allocation8]   ;;  %s3798_s11 = scalar_lea.hbm %s4132_s3, 2048 }
  0x15   :  { %s51_s8 = sshll.u32 %s3919_s7, 4  ;;  %p3799_p8 = scmp.ne.s32.totalorder %s4132_s3, %s3798_s11  ;;  %s52_s8 = int_to_ptr.vmem [resolvable:$true] %s51_s8 }
  0x16   :  { %p3802_p9 = scmp.lt.u32.totalorder %s3798_s11, %s4132_s3 }
  0x18   :  { %p3804_p10 = pnand %p3802_p9, %p3799_p8 }
  0x1a   :  { %3807 = shalt.err (!%p3804_p10)
}
  0x1b   :  { %s3808_s16 = scalar_lea.vmem %s52_s8, 2048  ;;  %p3813_p12 = scmp.lt.s32.totalorder %s52_s8, %s52_s8 }
  0x1c   :  { %p3809_p11 = scmp.ne.s32.totalorder %s52_s8, %s3808_s16  ;;  %p3814_p13 = scmp.lt.s32.totalorder %s3808_s16, %s3808_s16 }
  0x1e   :  { %p3815_p0 = por %p3814_p13, %p3813_p12 }
  0x20   :  { %p3816_p1 = pnand %p3815_p0, %p3809_p11 }
  0x22   :  { %3819 = shalt.err (!%p3816_p1)
}
  0x23   :  { %s3920_s1 = smov 64   ;;  %s3921_s17 = smov 4  }
  0x24   :  { %57 = dma.hbm_to_vmem [thread:$0]  %s4132_s3, 2048, %s52_s8, [#allocation9], %s3920_s1, %s3920_s1, %s3921_s17  }
  0x25   :  { %s3922_s20 = smov [#allocation2]   ;;  %s3923_s22 = smov [#allocation7]  }
  0x26   :  { %s20_s21 = sshll.u32 %s3922_s20, 4  ;;  %s42_s23 = sshll.u32 %s3923_s22, 4  ;;  %s21_s21 = int_to_ptr.vmem [resolvable:$true] %s20_s21  ;;  %s43_s23 = int_to_ptr.vmem [resolvable:$true] %s42_s23 }
  0x27   :  { %s3820_s26 = scalar_lea.hbm %s4129_s0, 336 }
  0x28   :  { %p3821_p2 = scmp.ne.s32.totalorder %s4129_s0, %s3820_s26  ;;  %p3824_p3 = scmp.lt.u32.totalorder %s3820_s26, %s4129_s0 }
  0x2a   :  { %p3826_p4 = pnand %p3824_p3, %p3821_p2 }
  0x2c   :  { %3829 = shalt.err (!%p3826_p4)
}
  0x2d   :  { %s3830_s3 = scalar_lea.vmem %s21_s21, 336  ;;  %s3834_s6 = scalar_lea.vmem %s21_s21, 352 }
  0x2e   :  { %p3831_p5 = scmp.ne.s32.totalorder %s21_s21, %s3830_s3  ;;  %p3835_p6 = scmp.lt.s32.totalorder %s21_s21, %s21_s21 }
  0x2f   :  { %p3836_p7 = scmp.lt.s32.totalorder %s3834_s6, %s3830_s3 }
  0x31   :  { %p3837_p8 = por %p3836_p7, %p3835_p6 }
  0x33   :  { %p3838_p9 = pnand %p3837_p8, %p3831_p5 }
  0x35   :  { %3841 = shalt.err (!%p3838_p9)
}
  0x36   :  { %23 = dma.hbm_to_vmem [thread:$0]  %s4129_s0, 336, %s21_s21, [#allocation3]  }
  0x37   :  { %s3842_s11 = scalar_lea.hbm %s4131_s2, 32 }
  0x38   :  { %p3843_p10 = scmp.ne.s32.totalorder %s4131_s2, %s3842_s11  ;;  %p3846_p11 = scmp.lt.u32.totalorder %s3842_s11, %s4131_s2 }
  0x3a   :  { %p3848_p12 = pnand %p3846_p11, %p3843_p10 }
  0x3c   :  { %3851 = shalt.err (!%p3848_p12)
}
  0x3d   :  { %s3852_s16 = scalar_lea.vmem %s43_s23, 32  ;;  %p3857_p0 = scmp.lt.s32.totalorder %s43_s23, %s43_s23 }
  0x3e   :  { %p3853_p13 = scmp.ne.s32.totalorder %s43_s23, %s3852_s16  ;;  %p3858_p1 = scmp.lt.s32.totalorder %s3852_s16, %s3852_s16 }
  0x40   :  { %p3859_p2 = por %p3858_p1, %p3857_p0 }
  0x42   :  { %p3860_p3 = pnand %p3859_p2, %p3853_p13 }
  0x44   :  { %3863 = shalt.err (!%p3860_p3)
}
  0x45   :  { %45 = dma.hbm_to_vmem [thread:$0]  %s4131_s2, 32, %s43_s23, [#allocation6]  }
  0x46   :  { %s3924_s17 = smov [#allocation10]   ;;  %s3864_s21 = scalar_lea.hbm %s4133_s4, 16 }
  0x47   :  { %s64_s18 = sshll.u32 %s3924_s17, 4  ;;  %p3865_p4 = scmp.ne.s32.totalorder %s4133_s4, %s3864_s21  ;;  %s65_s18 = int_to_ptr.vmem [resolvable:$true] %s64_s18 }
  0x48   :  { %p3868_p5 = scmp.lt.u32.totalorder %s3864_s21, %s4133_s4 }
  0x4a   :  { %p3870_p6 = pnand %p3868_p5, %p3865_p4 }
  0x4c   :  { %3873 = shalt.err (!%p3870_p6)
}
  0x4d   :  { %s3874_s27 = scalar_lea.vmem %s65_s18, 16  ;;  %s3878_s2 = scalar_lea.vmem %s65_s18, 32 }
  0x4e   :  { %p3875_p7 = scmp.ne.s32.totalorder %s65_s18, %s3874_s27  ;;  %p3879_p8 = scmp.lt.s32.totalorder %s65_s18, %s65_s18 }
  0x4f   :  { %p3880_p9 = scmp.lt.s32.totalorder %s3878_s2, %s3874_s27 }
  0x51   :  { %p3881_p10 = por %p3880_p9, %p3879_p8 }
  0x53   :  { %p3882_p11 = pnand %p3881_p10, %p3875_p7 }
  0x55   :  { %3885 = shalt.err (!%p3882_p11)
}
  0x56   :  { %67 = dma.hbm_to_vmem [thread:$0]  %s4133_s4, 16, %s65_s18, [#allocation9]  }
  0x57   :  { %3908 = dma.done.wait [#allocation3], 336  }
  0x58   :  { %3909 = vsyncadd [#allocation3], 4294966960 }
  0x59   :  { %3910 = dma.done.wait [#allocation6], 41504  }
  0x5a   :  { %3911 = vsyncadd [#allocation6], 4294925792 }
  0x5b   :  { %3912 = dma.done.wait [#allocation9], 2064  }
  0x5c   :  { %3913 = vsyncadd [#allocation9], 4294965232  ;;  %v3271_v0 = vld [vmem:[#allocation5 + $0x4] ss:$8 sps:$4 sm:$0xff]   ;;  %v3275_v2 = vld [vmem:[#allocation5] ss:$8 sps:$4 sm:$0xff]   ;;  %v413_v38 = vlaneseq }
  0x5d   :  { %v3273_v1 = vld [vmem:[#allocation5 + $0x504] ss:$8 sps:$4 sm:$0xff]   ;;  %2207 = vmatprep.subr.bf16.mxu1 %v3271_v0  ;;  %v3276_v3 = vld [vmem:[#allocation5 + $0x500] ss:$8 sps:$4 sm:$0xff]   ;;  %v3277_v4 = vld [vmem:[#allocation5 + $0x14] ss:$8 sps:$4 sm:$0xff]  }
  0x5e   :  { %2412 = vmatprep.subr.bf16.mxu0 %v3273_v1  ;;  %2208 = vmatpush1.bf16.msra.mxu1 %v3275_v2  ;;  %v3279_v5 = vld [vmem:[#allocation5 + $0x514] ss:$8 sps:$4 sm:$0xff]   ;;  %v3281_v6 = vld [vmem:[#allocation5 + $0x10] ss:$8 sps:$4 sm:$0xff]   ;;  %v3283_v8 = vld [vmem:[#allocation5 + $0x24] ss:$8 sps:$4 sm:$0xff]  }
  0x5f   :  { %2413 = vmatpush1.bf16.msra.mxu0 %v3276_v3  ;;  %2209 = vmatprep.subr.bf16.mxu1 %v3277_v4  ;;  %v3282_v7 = vld [vmem:[#allocation5 + $0x510] ss:$8 sps:$4 sm:$0xff]   ;;  %v3285_v9 = vld [vmem:[#allocation5 + $0x524] ss:$8 sps:$4 sm:$0xff]   ;;  %v3287_v10 = vld [vmem:[#allocation5 + $0x20] ss:$8 sps:$4 sm:$0xff]  }
  0x60   :  { %2414 = vmatprep.subr.bf16.mxu0 %v3279_v5  ;;  %v3288_v11 = vld [vmem:[#allocation5 + $0x520] ss:$8 sps:$4 sm:$0xff]   ;;  %v3289_v12 = vld [vmem:[#allocation5 + $0x34] ss:$8 sps:$4 sm:$0xff]   ;;  %v3293_v14 = vld [vmem:[#allocation5 + $0x30] ss:$8 sps:$4 sm:$0xff]  }
  0x61   :  { %v3291_v13 = vld [vmem:[#allocation5 + $0x534] ss:$8 sps:$4 sm:$0xff]   ;;  %v3294_v15 = vld [vmem:[#allocation5 + $0x530] ss:$8 sps:$4 sm:$0xff]   ;;  %v3295_v16 = vld [vmem:[#allocation5 + $0x44] ss:$8 sps:$4 sm:$0xff]  }
  0x62   :  { %2210 = vmatpush1.bf16.msra.mxu1 %v3281_v6  ;;  %v3297_v17 = vld [vmem:[#allocation5 + $0x544] ss:$8 sps:$4 sm:$0xff]   ;;  %v3299_v18 = vld [vmem:[#allocation5 + $0x40] ss:$8 sps:$4 sm:$0xff]   ;;  %v3301_v20 = vld [vmem:[#allocation5 + $0x54] ss:$8 sps:$4 sm:$0xff]  }
  0x63   :  { %2415 = vmatpush1.bf16.msra.mxu0 %v3282_v7  ;;  %2211 = vmatprep.subr.bf16.mxu1 %v3283_v8  ;;  %v3300_v19 = vld [vmem:[#allocation5 + $0x540] ss:$8 sps:$4 sm:$0xff]   ;;  %v3303_v21 = vld [vmem:[#allocation5 + $0x554] ss:$8 sps:$4 sm:$0xff]   ;;  %v3305_v22 = vld [vmem:[#allocation5 + $0x50] ss:$8 sps:$4 sm:$0xff]  }
  0x64   :  { %2416 = vmatprep.subr.bf16.mxu0 %v3285_v9  ;;  %v3306_v23 = vld [vmem:[#allocation5 + $0x550] ss:$8 sps:$4 sm:$0xff]   ;;  %v3307_v24 = vld [vmem:[#allocation5 + $0x64] ss:$8 sps:$4 sm:$0xff]   ;;  %v3311_v26 = vld [vmem:[#allocation5 + $0x60] ss:$8 sps:$4 sm:$0xff]  }
  0x65   :  { %v3309_v25 = vld [vmem:[#allocation5 + $0x564] ss:$8 sps:$4 sm:$0xff]   ;;  %v3312_v27 = vld [vmem:[#allocation5 + $0x560] ss:$8 sps:$4 sm:$0xff]   ;;  %v3313_v28 = vld [vmem:[#allocation5 + $0x74] ss:$8 sps:$4 sm:$0xff]  }
  0x66   :  { %2212 = vmatpush1.bf16.msra.mxu1 %v3287_v10  ;;  %v3315_v29 = vld [vmem:[#allocation5 + $0x574] ss:$8 sps:$4 sm:$0xff]   ;;  %v3317_v30 = vld [vmem:[#allocation5 + $0x70] ss:$8 sps:$4 sm:$0xff]   ;;  %v3319_v32 = vld [vmem:[#allocation5 + $0x84] ss:$8 sps:$4 sm:$0xff]  }
  0x67   :  { %2417 = vmatpush1.bf16.msra.mxu0 %v3288_v11  ;;  %2213 = vmatprep.subr.bf16.mxu1 %v3289_v12  ;;  %v3318_v31 = vld [vmem:[#allocation5 + $0x570] ss:$8 sps:$4 sm:$0xff]   ;;  %v3321_v33 = vld [vmem:[#allocation5 + $0x584] ss:$8 sps:$4 sm:$0xff]   ;;  %v3323_v34 = vld [vmem:[#allocation5 + $0x80] ss:$8 sps:$4 sm:$0xff]  }
  0x68   :  { %2418 = vmatprep.subr.bf16.mxu0 %v3291_v13  ;;  %v3324_v35 = vld [vmem:[#allocation5 + $0x580] ss:$8 sps:$4 sm:$0xff]   ;;  %v3325_v36 = vld [vmem:[#allocation5 + $0x94] ss:$8 sps:$4 sm:$0xff]   ;;  %v3925_v39 = vmov 1966171168  }
  0x69   :  { %v3327_v37 = vld [vmem:[#allocation5 + $0x594] ss:$8 sps:$4 sm:$0xff]   ;;  %v428_v40 = vunpack.c.l.s4 %v3925_v39  ;;  %v3329_v41 = vld [vmem:[#allocation5 + $0x90] ss:$8 sps:$4 sm:$0xff]   ;;  %v3331_v43 = vld [vmem:[#allocation5 + $0xa4] ss:$8 sps:$4 sm:$0xff]  }
  0x6a   :  { %2214 = vmatpush1.bf16.msra.mxu1 %v3293_v14  ;;  %v3330_v42 = vld [vmem:[#allocation5 + $0x590] ss:$8 sps:$4 sm:$0xff]   ;;  %v3333_v44 = vld [vmem:[#allocation5 + $0x5a4] ss:$8 sps:$4 sm:$0xff]   ;;  %v4018_v45 = vshrl.u32 %v413_v38, 7  ;;  %vm2203_vm0 = vcmask 261120  }
  0x6b   :  { %2419 = vmatpush1.bf16.msra.mxu0 %v3294_v15  ;;  %2215 = vmatprep.subr.bf16.mxu1 %v3295_v16  ;;  %v429_v46 = vunpack.c.0.s8 %v428_v40  ;;  %v3335_v47 = vld [vmem:[#allocation5 + $0xa0] ss:$8 sps:$4 sm:$0xff]   ;;  %v3337_v49 = vld [vmem:[#allocation5 + $0xb4] ss:$8 sps:$4 sm:$0xff]   ;;  %v3341_v53 = vld [vmem:[#allocation5 + $0xb0] ss:$8 sps:$4 sm:$0xff]  }
  0x6c   :  { %2420 = vmatprep.subr.bf16.mxu0 %v3297_v17  ;;  %v3336_v48 = vld [vmem:[#allocation5 + $0x5a0] ss:$8 sps:$4 sm:$0xff]   ;;  %v3339_v50 = vld [vmem:[#allocation5 + $0x5b4] ss:$8 sps:$4 sm:$0xff]   ;;  %v3342_v55 = vld [vmem:[#allocation5 + $0x5b0] ss:$8 sps:$4 sm:$0xff]  }
  0x6d   :  { %v4021_v51 = vsub.s32 %v429_v46, %v4018_v45  ;;  %v4023_v52 = vld [vmem:[#allocation2] sm:$0xff]  ;;  %v85_v56 = vld [vmem:[#allocation2 + $0x8] sm:$0xff]  ;;  %s3927_s4 = smov [#allocation11]  }
  0x6e   :  { %2216 = vmatpush1.bf16.msra.mxu1 %v3299_v18  ;;  %v3343_v57 = vld [vmem:[#allocation5 + $0xc4] ss:$8 sps:$4 sm:$0xff]   ;;  %v3347_v63 = vld [vmem:[#allocation5 + $0xc0] ss:$8 sps:$4 sm:$0xff]   ;;  %v3349_v1 = vld [vmem:[#allocation5 + $0xd4] ss:$8 sps:$4 sm:$0xff]   ;;  %v475_v9 = vcombine.high %v85_v56, %v85_v56 }
  0x6f   :  { %2421 = vmatpush1.bf16.msra.mxu0 %v3300_v19  ;;  %2217 = vmatprep.subr.bf16.mxu1 %v3301_v20  ;;  %v433_v54 = vrot.slane %v4023_v52, %v4021_v51  ;;  %v3345_v58 = vld [vmem:[#allocation5 + $0x5c4] ss:$8 sps:$4 sm:$0xff]   ;;  %v482_v60 = vrot.slane %v85_v56, %v4021_v51  ;;  %v3348_v0 = vld [vmem:[#allocation5 + $0x5c0] ss:$8 sps:$4 sm:$0xff]   ;;  %v3351_v2 = vld [vmem:[#allocation5 + $0x5d4] ss:$8 sps:$4 sm:$0xff]  }
  0x70   :  { %2422 = vmatprep.subr.bf16.mxu0 %v3303_v21  ;;  %v3353_v5 = vld [vmem:[#allocation5 + $0xd0] ss:$8 sps:$4 sm:$0xff]   ;;  %v3355_v7 = vld [vmem:[#allocation5 + $0xe4] ss:$8 sps:$4 sm:$0xff]   ;;  %v3359_v10 = vld [vmem:[#allocation5 + $0xe0] ss:$8 sps:$4 sm:$0xff]   ;;  %v4038_v14 = vrot.slane %v475_v9, %v4021_v51 }
  0x71   :  { %v441_v59 = vcombine.high %v433_v54, %v433_v54  ;;  %v490_v62 = vcombine.high %v482_v60, %v482_v60  ;;  %v3354_v6 = vld [vmem:[#allocation5 + $0x5d0] ss:$8 sps:$4 sm:$0xff]   ;;  %v3357_v8 = vld [vmem:[#allocation5 + $0x5e4] ss:$8 sps:$4 sm:$0xff]   ;;  %v3360_v11 = vld [vmem:[#allocation5 + $0x5e0] ss:$8 sps:$4 sm:$0xff]   ;;  %v4041_v15 = vrot.slane %v482_v60, %v4021_v51  ;;  %v4046_v21 = vrot.slane %v433_v54, %v4021_v51 }
  0x72   :  { %2218 = vmatpush1.bf16.msra.mxu1 %v3305_v22  ;;  %v3361_v12 = vld [vmem:[#allocation5 + $0xf4] ss:$8 sps:$4 sm:$0xff]   ;;  %v3365_v16 = vld [vmem:[#allocation5 + $0xf0] ss:$8 sps:$4 sm:$0xff]   ;;  %v3370_v18 = vld [vmem:[#allocation5 + $0x104] ss:$8 sps:$4 sm:$0xff]   ;;  %v491_v20 = vcombine.high %v4038_v14, %v4038_v14 }
  0x73   :  { %2423 = vmatpush1.bf16.msra.mxu0 %v3306_v23  ;;  %2219 = vmatprep.subr.bf16.mxu1 %v3307_v24  ;;  %v4029_v61 = vrot.slane %v441_v59, %v4021_v51  ;;  %v4032_v3 = vrot.slane %v490_v62, %v4021_v51  ;;  %v3363_v13 = vld [vmem:[#allocation5 + $0x5f4] ss:$8 sps:$4 sm:$0xff]   ;;  %v3366_v17 = vld [vmem:[#allocation5 + $0x5f0] ss:$8 sps:$4 sm:$0xff]   ;;  %v3374_v19 = vld [vmem:[#allocation5 + $0x604] ss:$8 sps:$4 sm:$0xff]   ;;  %v520_v22 = vcombine.high %v4041_v15, %v4041_v15 }
  0x74   :  { %2424 = vmatprep.subr.bf16.mxu0 %v3309_v25  ;;  %v3368_v23 = vld [vmem:[#allocation5 + $0x100] ss:$8 sps:$4 sm:$0xff]   ;;  %v3377_v25 = vld [vmem:[#allocation5 + $0x114] ss:$8 sps:$4 sm:$0xff]   ;;  %v3390_v38 = vld [vmem:[#allocation5 + $0x630] ss:$8 sps:$4 sm:$0xff]  }
  0x75   :  { %2239 = vmatprep.mubr.bf16.mxu1 %v4029_v61  ;;  %v522_v4 = vcombine.high %v4032_v3, %v4032_v3  ;;  %v3372_v24 = vld [vmem:[#allocation5 + $0x600] ss:$8 sps:$4 sm:$0xff]   ;;  %v3395_v39 = vld [vmem:[#allocation5 + $0x144] ss:$8 sps:$4 sm:$0xff]   ;;  %v3399_v46 = vld [vmem:[#allocation5 + $0x150] ss:$8 sps:$4 sm:$0xff]  }
  0x76   :  { %2220 = vmatpush1.bf16.msra.mxu1 %v3311_v26  ;;  %v3380_v26 = vld [vmem:[#allocation5 + $0x614] ss:$8 sps:$4 sm:$0xff]   ;;  %v3398_v40 = vld [vmem:[#allocation5 + $0x644] ss:$8 sps:$4 sm:$0xff]   ;;  %v3411_v56 = vld [vmem:[#allocation5 + $0x170] ss:$8 sps:$4 sm:$0xff]  }
  0x77   :  { %2425 = vmatpush1.bf16.msra.mxu0 %v3312_v27  ;;  %2221 = vmatprep.subr.bf16.mxu1 %v3313_v28  ;;  %v473_v27 = vcombine.high %v4029_v61, %v4029_v61  ;;  %v4053_v28 = vrot.slane %v491_v20, %v4021_v51  ;;  %v3413_v54 = vld [vmem:[#allocation5 + $0x174] ss:$8 sps:$4 sm:$0xff]   ;;  %v3422_v59 = vld [vmem:[#allocation5 + $0x684] ss:$8 sps:$4 sm:$0xff]   ;;  %v3417_v60 = vld [vmem:[#allocation5 + $0x180] ss:$8 sps:$4 sm:$0xff]  }
  0x78   :  { %2426 = vmatprep.subr.bf16.mxu0 %v3315_v29  ;;  %2444 = vmatprep.mubr.bf16.mxu0 %v522_v4  ;;  %v3375_v29 = vld [vmem:[#allocation5 + $0x110] ss:$8 sps:$4 sm:$0xff]   ;;  %v3420_v61 = vld [vmem:[#allocation5 + $0x680] ss:$8 sps:$4 sm:$0xff]   ;;  %v3425_v62 = vld [vmem:[#allocation5 + $0x194] ss:$8 sps:$4 sm:$0xff]  }
  0x79   :  { %v3434_v4 = vld [vmem:[#allocation5 + $0x6a4] ss:$8 sps:$4 sm:$0xff]   ;;  %v3435_v9 = vld [vmem:[#allocation5 + $0x1b0] ss:$8 sps:$4 sm:$0xff]   ;;  %s2844_s29 = sshll.u32 %s3927_s4, 4  ;;  %s2845_s29 = int_to_ptr.vmem [resolvable:$true] %s2844_s29 }
  0x7a   :  { %2222 = vmatpush1.bf16.msra.mxu1 %v3317_v30  ;;  %v3378_v30 = vld [vmem:[#allocation5 + $0x610] ss:$8 sps:$4 sm:$0xff]   ;;  %s3886_s30 = scalar_lea.vmem %s2845_s29, 32  ;;  %p3891_p13 = scmp.lt.s32.totalorder %s2845_s29, %s2845_s29 }
  0x7b   :  { %2427 = vmatpush1.bf16.msra.mxu0 %v3318_v31  ;;  %2223 = vmatprep.subr.bf16.mxu1 %v3319_v32  ;;  %v3383_v31 = vld [vmem:[#allocation5 + $0x124] ss:$8 sps:$4 sm:$0xff]   ;;  %v3450_v20 = vld [vmem:[#allocation5 + $0x6d0] ss:$8 sps:$4 sm:$0xff]   ;;  %p3887_p12 = scmp.ne.s32.totalorder %s2845_s29, %s3886_s30  ;;  %p3892_p0 = scmp.lt.s32.totalorder %s3886_s30, %s3886_s30 }
  0x7c   :  { %2428 = vmatprep.subr.bf16.mxu0 %v3321_v33  ;;  %v3386_v32 = vld [vmem:[#allocation5 + $0x624] ss:$8 sps:$4 sm:$0xff]   ;;  %v3381_v33 = vld [vmem:[#allocation5 + $0x120] ss:$8 sps:$4 sm:$0xff]  }
  0x7d   :  { %p3893_p1 = por %p3892_p0, %p3891_p13 }
  0x7e   :  { %2224 = vmatpush1.bf16.msra.mxu1 %v3323_v34  ;;  %v3384_v34 = vld [vmem:[#allocation5 + $0x620] ss:$8 sps:$4 sm:$0xff]  }
  0x7f   :  { %2429 = vmatpush1.bf16.msra.mxu0 %v3324_v35  ;;  %2225 = vmatprep.subr.bf16.mxu1 %v3325_v36  ;;  %v3389_v35 = vld [vmem:[#allocation5 + $0x134] ss:$8 sps:$4 sm:$0xff]   ;;  %p3894_p2 = pnand %p3893_p1, %p3887_p12 }
  0x80   :  { %2430 = vmatprep.subr.bf16.mxu0 %v3327_v37  ;;  %v3392_v36 = vld [vmem:[#allocation5 + $0x634] ss:$8 sps:$4 sm:$0xff]   ;;  %v3387_v37 = vld [vmem:[#allocation5 + $0x130] ss:$8 sps:$4 sm:$0xff]  }
  0x82   :  { %2226 = vmatpush1.bf16.msra.mxu1 %v3329_v41  ;;  %v3393_v41 = vld [vmem:[#allocation5 + $0x140] ss:$8 sps:$4 sm:$0xff]  }
  0x83   :  { %2431 = vmatpush1.bf16.msra.mxu0 %v3330_v42  ;;  %2227 = vmatprep.subr.bf16.mxu1 %v3331_v43  ;;  %v3396_v42 = vld [vmem:[#allocation5 + $0x640] ss:$8 sps:$4 sm:$0xff]   ;;  %v3401_v43 = vld [vmem:[#allocation5 + $0x154] ss:$8 sps:$4 sm:$0xff]  }
  0x84   :  { %2432 = vmatprep.subr.bf16.mxu0 %v3333_v44  ;;  %v3404_v44 = vld [vmem:[#allocation5 + $0x654] ss:$8 sps:$4 sm:$0xff]  }
  0x86   :  { %2228 = vmatpush1.bf16.msra.mxu1 %v3335_v47  ;;  %v3402_v47 = vld [vmem:[#allocation5 + $0x650] ss:$8 sps:$4 sm:$0xff]  }
  0x87   :  { %2433 = vmatpush1.bf16.msra.mxu0 %v3336_v48  ;;  %2229 = vmatprep.subr.bf16.mxu1 %v3337_v49  ;;  %v3407_v48 = vld [vmem:[#allocation5 + $0x164] ss:$8 sps:$4 sm:$0xff]  }
  0x88   :  { %2434 = vmatprep.subr.bf16.mxu0 %v3339_v50  ;;  %v3410_v49 = vld [vmem:[#allocation5 + $0x664] ss:$8 sps:$4 sm:$0xff]   ;;  %v3405_v50 = vld [vmem:[#allocation5 + $0x160] ss:$8 sps:$4 sm:$0xff]  }
  0x8a   :  { %2230 = vmatpush1.bf16.msra.mxu1 %v3341_v53  ;;  %v3408_v53 = vld [vmem:[#allocation5 + $0x660] ss:$8 sps:$4 sm:$0xff]  }
  0x8b   :  { %2435 = vmatpush1.bf16.msra.mxu0 %v3342_v55  ;;  %2231 = vmatprep.subr.bf16.mxu1 %v3343_v57  ;;  %v3416_v55 = vld [vmem:[#allocation5 + $0x674] ss:$8 sps:$4 sm:$0xff]   ;;  %v3414_v57 = vld [vmem:[#allocation5 + $0x670] ss:$8 sps:$4 sm:$0xff]  }
  0x8c   :  { %2436 = vmatprep.subr.bf16.mxu0 %v3345_v58  ;;  %v3419_v58 = vld [vmem:[#allocation5 + $0x184] ss:$8 sps:$4 sm:$0xff]  }
  0x8e   :  { %2232 = vmatpush1.bf16.msra.mxu1 %v3347_v63  ;;  %v3428_v63 = vld [vmem:[#allocation5 + $0x694] ss:$8 sps:$4 sm:$0xff]  }
  0x8f   :  { %2437 = vmatpush1.bf16.msra.mxu0 %v3348_v0  ;;  %2233 = vmatprep.subr.bf16.mxu1 %v3349_v1  ;;  %v3423_v0 = vld [vmem:[#allocation5 + $0x190] ss:$8 sps:$4 sm:$0xff]  }
  0x90   :  { %2438 = vmatprep.subr.bf16.mxu0 %v3351_v2  ;;  %v3426_v1 = vld [vmem:[#allocation5 + $0x690] ss:$8 sps:$4 sm:$0xff]   ;;  %v3431_v2 = vld [vmem:[#allocation5 + $0x1a4] ss:$8 sps:$4 sm:$0xff]  }
  0x92   :  { %2234 = vmatpush1.bf16.msra.mxu1 %v3353_v5  ;;  %v3429_v5 = vld [vmem:[#allocation5 + $0x1a0] ss:$8 sps:$4 sm:$0xff]  }
  0x93   :  { %2439 = vmatpush1.bf16.msra.mxu0 %v3354_v6  ;;  %2235 = vmatprep.subr.bf16.mxu1 %v3355_v7  ;;  %v3432_v6 = vld [vmem:[#allocation5 + $0x6a0] ss:$8 sps:$4 sm:$0xff]   ;;  %v3437_v7 = vld [vmem:[#allocation5 + $0x1b4] ss:$8 sps:$4 sm:$0xff]  }
  0x94   :  { %2440 = vmatprep.subr.bf16.mxu0 %v3357_v8  ;;  %v3440_v8 = vld [vmem:[#allocation5 + $0x6b4] ss:$8 sps:$4 sm:$0xff]  }
  0x96   :  { %2236 = vmatpush1.bf16.msra.mxu1 %v3359_v10  ;;  %v3438_v10 = vld [vmem:[#allocation5 + $0x6b0] ss:$8 sps:$4 sm:$0xff]  }
  0x97   :  { %2441 = vmatpush1.bf16.msra.mxu0 %v3360_v11  ;;  %2237 = vmatprep.subr.bf16.mxu1 %v3361_v12  ;;  %v3443_v11 = vld [vmem:[#allocation5 + $0x1c4] ss:$8 sps:$4 sm:$0xff]  }
  0x98   :  { %2442 = vmatprep.subr.bf16.mxu0 %v3363_v13  ;;  %v3446_v12 = vld [vmem:[#allocation5 + $0x6c4] ss:$8 sps:$4 sm:$0xff]   ;;  %v3441_v13 = vld [vmem:[#allocation5 + $0x1c0] ss:$8 sps:$4 sm:$0xff]  }
  0x9a   :  { %2238 = vmatpush1.bf16.msra.mxu1 %v3365_v16  ;;  %v3444_v16 = vld [vmem:[#allocation5 + $0x6c0] ss:$8 sps:$4 sm:$0xff]  }
  0x9b   :  { %2443 = vmatpush1.bf16.msra.mxu0 %v3366_v17  ;;  %2248 = vmatprep.subr.bf16.mxu1 %v3370_v18  ;;  %v3449_v17 = vld [vmem:[#allocation5 + $0x1d4] ss:$8 sps:$4 sm:$0xff]  }
  0x9c   :  { %2453 = vmatprep.subr.bf16.mxu0 %v3374_v19  ;;  %v3452_v18 = vld [vmem:[#allocation5 + $0x6d4] ss:$8 sps:$4 sm:$0xff]   ;;  %v3447_v19 = vld [vmem:[#allocation5 + $0x1d0] ss:$8 sps:$4 sm:$0xff]  }
  0x9d   :  { %2240 = vmatmul.mubr.bf16.vlgmr.msra.gmra.mrb[0].mxu1 %v4046_v21 }
  0x9e   :  { %2445 = vmatmul.mubr.bf16.vlgmr.msra.gmra.mrb[0].mxu0 %v520_v22  ;;  %2249 = vmatpush1.bf16.msra.mxu1 %v3368_v23  ;;  %v3455_v22 = vld [vmem:[#allocation5 + $0x1e4] ss:$8 sps:$4 sm:$0xff]  }
  0x9f   :  { %2454 = vmatpush1.bf16.msra.mxu0 %v3372_v24  ;;  %2250 = vmatprep.subr.bf16.mxu1 %v3377_v25  ;;  %v3458_v23 = vld [vmem:[#allocation5 + $0x6e4] ss:$8 sps:$4 sm:$0xff]   ;;  %v426_v24 = vcombine.high %v4023_v52, %v4023_v52  ;;  %v3453_v25 = vld [vmem:[#allocation5 + $0x1e0] ss:$8 sps:$4 sm:$0xff]  }
  0xa0   :  { %2455 = vmatprep.subr.bf16.mxu0 %v3380_v26  ;;  %2280 = vmatprep.mubr.bf16.mxu1 %v473_v27  ;;  %v3456_v26 = vld [vmem:[#allocation5 + $0x6e0] ss:$8 sps:$4 sm:$0xff]   ;;  %v3461_v27 = vld [vmem:[#allocation5 + $0x1f4] ss:$8 sps:$4 sm:$0xff]  }
  0xa1   :  { %2485 = vmatprep.mubr.bf16.mxu0 %v4053_v28 }
  0xa2   :  { %2251 = vmatpush1.bf16.msra.mxu1 %v3375_v29  ;;  %v3464_v29 = vld [vmem:[#allocation5 + $0x6f4] ss:$8 sps:$4 sm:$0xff]  }
  0xa3   :  { %2456 = vmatpush1.bf16.msra.mxu0 %v3378_v30  ;;  %2252 = vmatprep.subr.bf16.mxu1 %v3383_v31  ;;  %v4060_v30 = vrot.slane %v426_v24, %v4021_v51  ;;  %v3459_v31 = vld [vmem:[#allocation5 + $0x1f0] ss:$8 sps:$4 sm:$0xff]  }
  0xa4   :  { %2457 = vmatprep.subr.bf16.mxu0 %v3386_v32  ;;  %v3462_v32 = vld [vmem:[#allocation5 + $0x6f0] ss:$8 sps:$4 sm:$0xff]  }
  0xa5   :  { %v442_v52 = vcombine.high %v4060_v30, %v4060_v30  ;;  %v3534_v24 = vld [vmem:[#allocation5 + $0x7b0] ss:$8 sps:$4 sm:$0xff]  }
  0xa6   :  { %2253 = vmatpush1.bf16.msra.mxu1 %v3381_v33  ;;  %v3467_v33 = vld [vmem:[#allocation5 + $0x204] ss:$8 sps:$4 sm:$0xff]  }
  0xa7   :  { %2458 = vmatpush1.bf16.msra.mxu0 %v3384_v34  ;;  %2254 = vmatprep.subr.bf16.mxu1 %v3389_v35  ;;  %v3470_v34 = vld [vmem:[#allocation5 + $0x704] ss:$8 sps:$4 sm:$0xff]   ;;  %v471_v35 = vcombine.high %v4046_v21, %v4046_v21  ;;  %v3474_v21 = vld [vmem:[#allocation5 + $0x710] ss:$8 sps:$4 sm:$0xff]  }
  0xa8   :  { %2459 = vmatprep.subr.bf16.mxu0 %v3392_v36  ;;  %v4068_v36 = vrot.slane %v4038_v14, %v4021_v51  ;;  %v3471_v14 = vld [vmem:[#allocation5 + $0x210] ss:$8 sps:$4 sm:$0xff]  }
  0xaa   :  { %2255 = vmatpush1.bf16.msra.mxu1 %v3387_v37  ;;  %v3465_v37 = vld [vmem:[#allocation5 + $0x200] ss:$8 sps:$4 sm:$0xff]  }
  0xab   :  { %2460 = vmatpush1.bf16.msra.mxu0 %v3390_v38  ;;  %2256 = vmatprep.subr.bf16.mxu1 %v3395_v39  ;;  %v3468_v38 = vld [vmem:[#allocation5 + $0x700] ss:$8 sps:$4 sm:$0xff]   ;;  %v3473_v39 = vld [vmem:[#allocation5 + $0x214] ss:$8 sps:$4 sm:$0xff]  }
  0xac   :  { %2461 = vmatprep.subr.bf16.mxu0 %v3398_v40  ;;  %v3476_v40 = vld [vmem:[#allocation5 + $0x714] ss:$8 sps:$4 sm:$0xff]  }
  0xae   :  { %2257 = vmatpush1.bf16.msra.mxu1 %v3393_v41  ;;  %v4071_v41 = vrot.slane %v442_v52, %v4021_v51  ;;  %v3551_v52 = vld [vmem:[#allocation5 + $0x2e4] ss:$8 sps:$4 sm:$0xff]  }
  0xaf   :  { %2462 = vmatpush1.bf16.msra.mxu0 %v3396_v42  ;;  %2258 = vmatprep.subr.bf16.mxu1 %v3401_v43  ;;  %v523_v42 = vcombine.high %v4053_v28, %v4053_v28  ;;  %v3479_v43 = vld [vmem:[#allocation5 + $0x224] ss:$8 sps:$4 sm:$0xff]   ;;  %v3485_v28 = vld [vmem:[#allocation5 + $0x234] ss:$8 sps:$4 sm:$0xff]  }
  0xb0   :  { %2463 = vmatprep.subr.bf16.mxu0 %v3404_v44  ;;  %v3482_v44 = vld [vmem:[#allocation5 + $0x724] ss:$8 sps:$4 sm:$0xff]  }
  0xb2   :  { %2259 = vmatpush1.bf16.msra.mxu1 %v3399_v46  ;;  %v3477_v46 = vld [vmem:[#allocation5 + $0x220] ss:$8 sps:$4 sm:$0xff]  }
  0xb3   :  { %2464 = vmatpush1.bf16.msra.mxu0 %v3402_v47  ;;  %2260 = vmatprep.subr.bf16.mxu1 %v3407_v48  ;;  %v3480_v47 = vld [vmem:[#allocation5 + $0x720] ss:$8 sps:$4 sm:$0xff]   ;;  %v3488_v48 = vld [vmem:[#allocation5 + $0x734] ss:$8 sps:$4 sm:$0xff]  }
  0xb4   :  { %2465 = vmatprep.subr.bf16.mxu0 %v3410_v49  ;;  %v3483_v49 = vld [vmem:[#allocation5 + $0x230] ss:$8 sps:$4 sm:$0xff]  }
  0xb6   :  { %2261 = vmatpush1.bf16.msra.mxu1 %v3405_v50  ;;  %v3486_v50 = vld [vmem:[#allocation5 + $0x730] ss:$8 sps:$4 sm:$0xff]  }
  0xb7   :  { %2466 = vmatpush1.bf16.msra.mxu0 %v3408_v53  ;;  %2262 = vmatprep.subr.bf16.mxu1 %v3413_v54  ;;  %v3491_v53 = vld [vmem:[#allocation5 + $0x244] ss:$8 sps:$4 sm:$0xff]  }
  0xb8   :  { %2467 = vmatprep.subr.bf16.mxu0 %v3416_v55  ;;  %v3494_v54 = vld [vmem:[#allocation5 + $0x744] ss:$8 sps:$4 sm:$0xff]   ;;  %v3489_v55 = vld [vmem:[#allocation5 + $0x240] ss:$8 sps:$4 sm:$0xff]  }
  0xba   :  { %2263 = vmatpush1.bf16.msra.mxu1 %v3411_v56  ;;  %v3492_v56 = vld [vmem:[#allocation5 + $0x740] ss:$8 sps:$4 sm:$0xff]  }
  0xbb   :  { %2468 = vmatpush1.bf16.msra.mxu0 %v3414_v57  ;;  %2264 = vmatprep.subr.bf16.mxu1 %v3419_v58  ;;  %v3497_v57 = vld [vmem:[#allocation5 + $0x254] ss:$8 sps:$4 sm:$0xff]  }
  0xbc   :  { %2469 = vmatprep.subr.bf16.mxu0 %v3422_v59  ;;  %v3500_v58 = vld [vmem:[#allocation5 + $0x754] ss:$8 sps:$4 sm:$0xff]   ;;  %v3495_v59 = vld [vmem:[#allocation5 + $0x250] ss:$8 sps:$4 sm:$0xff]  }
  0xbe   :  { %2265 = vmatpush1.bf16.msra.mxu1 %v3417_v60  ;;  %v3498_v60 = vld [vmem:[#allocation5 + $0x750] ss:$8 sps:$4 sm:$0xff]  }
  0xbf   :  { %2470 = vmatpush1.bf16.msra.mxu0 %v3420_v61  ;;  %2266 = vmatprep.subr.bf16.mxu1 %v3425_v62  ;;  %v3503_v61 = vld [vmem:[#allocation5 + $0x264] ss:$8 sps:$4 sm:$0xff]  }
  0xc0   :  { %2471 = vmatprep.subr.bf16.mxu0 %v3428_v63  ;;  %v3506_v62 = vld [vmem:[#allocation5 + $0x764] ss:$8 sps:$4 sm:$0xff]   ;;  %v3501_v63 = vld [vmem:[#allocation5 + $0x260] ss:$8 sps:$4 sm:$0xff]  }
  0xc2   :  { %2267 = vmatpush1.bf16.msra.mxu1 %v3423_v0  ;;  %v3504_v0 = vld [vmem:[#allocation5 + $0x760] ss:$8 sps:$4 sm:$0xff]  }
  0xc3   :  { %2472 = vmatpush1.bf16.msra.mxu0 %v3426_v1  ;;  %2268 = vmatprep.subr.bf16.mxu1 %v3431_v2  ;;  %v3509_v1 = vld [vmem:[#allocation5 + $0x274] ss:$8 sps:$4 sm:$0xff]  }
  0xc4   :  { %2473 = vmatprep.subr.bf16.mxu0 %v3434_v4  ;;  %v3512_v2 = vld [vmem:[#allocation5 + $0x774] ss:$8 sps:$4 sm:$0xff]   ;;  %v3507_v4 = vld [vmem:[#allocation5 + $0x270] ss:$8 sps:$4 sm:$0xff]  }
  0xc6   :  { %2269 = vmatpush1.bf16.msra.mxu1 %v3429_v5  ;;  %v3510_v5 = vld [vmem:[#allocation5 + $0x770] ss:$8 sps:$4 sm:$0xff]  }
  0xc7   :  { %2474 = vmatpush1.bf16.msra.mxu0 %v3432_v6  ;;  %2270 = vmatprep.subr.bf16.mxu1 %v3437_v7  ;;  %v3515_v6 = vld [vmem:[#allocation5 + $0x284] ss:$8 sps:$4 sm:$0xff]  }
  0xc8   :  { %2475 = vmatprep.subr.bf16.mxu0 %v3440_v8  ;;  %v3518_v7 = vld [vmem:[#allocation5 + $0x784] ss:$8 sps:$4 sm:$0xff]   ;;  %v3513_v8 = vld [vmem:[#allocation5 + $0x280] ss:$8 sps:$4 sm:$0xff]  }
  0xca   :  { %2271 = vmatpush1.bf16.msra.mxu1 %v3435_v9  ;;  %v3516_v9 = vld [vmem:[#allocation5 + $0x780] ss:$8 sps:$4 sm:$0xff]  }
  0xcb   :  { %2476 = vmatpush1.bf16.msra.mxu0 %v3438_v10  ;;  %2272 = vmatprep.subr.bf16.mxu1 %v3443_v11  ;;  %v3521_v10 = vld [vmem:[#allocation5 + $0x294] ss:$8 sps:$4 sm:$0xff]  }
  0xcc   :  { %2477 = vmatprep.subr.bf16.mxu0 %v3446_v12  ;;  %v3524_v11 = vld [vmem:[#allocation5 + $0x794] ss:$8 sps:$4 sm:$0xff]   ;;  %v3519_v12 = vld [vmem:[#allocation5 + $0x290] ss:$8 sps:$4 sm:$0xff]  }
  0xce   :  { %2273 = vmatpush1.bf16.msra.mxu1 %v3441_v13  ;;  %v3522_v13 = vld [vmem:[#allocation5 + $0x790] ss:$8 sps:$4 sm:$0xff]  }
  0xcf   :  { %2478 = vmatpush1.bf16.msra.mxu0 %v3444_v16  ;;  %2274 = vmatprep.subr.bf16.mxu1 %v3449_v17  ;;  %v3527_v16 = vld [vmem:[#allocation5 + $0x2a4] ss:$8 sps:$4 sm:$0xff]  }
  0xd0   :  { %2479 = vmatprep.subr.bf16.mxu0 %v3452_v18  ;;  %v3530_v17 = vld [vmem:[#allocation5 + $0x7a4] ss:$8 sps:$4 sm:$0xff]   ;;  %v3525_v18 = vld [vmem:[#allocation5 + $0x2a0] ss:$8 sps:$4 sm:$0xff]  }
  0xd2   :  { %2275 = vmatpush1.bf16.msra.mxu1 %v3447_v19  ;;  %v3528_v19 = vld [vmem:[#allocation5 + $0x7a0] ss:$8 sps:$4 sm:$0xff]  }
  0xd3   :  { %2480 = vmatpush1.bf16.msra.mxu0 %v3450_v20  ;;  %2276 = vmatprep.subr.bf16.mxu1 %v3455_v22  ;;  %v3533_v20 = vld [vmem:[#allocation5 + $0x2b4] ss:$8 sps:$4 sm:$0xff]  }
  0xd4   :  { %2481 = vmatprep.subr.bf16.mxu0 %v3458_v23  ;;  %v3536_v22 = vld [vmem:[#allocation5 + $0x7b4] ss:$8 sps:$4 sm:$0xff]   ;;  %v3531_v23 = vld [vmem:[#allocation5 + $0x2b0] ss:$8 sps:$4 sm:$0xff]  }
  0xd6   :  { %2277 = vmatpush1.bf16.msra.mxu1 %v3453_v25  ;;  %v3539_v25 = vld [vmem:[#allocation5 + $0x2c4] ss:$8 sps:$4 sm:$0xff]  }
  0xd7   :  { %2482 = vmatpush1.bf16.msra.mxu0 %v3456_v26  ;;  %2278 = vmatprep.subr.bf16.mxu1 %v3461_v27  ;;  %v3542_v26 = vld [vmem:[#allocation5 + $0x7c4] ss:$8 sps:$4 sm:$0xff]   ;;  %v3537_v27 = vld [vmem:[#allocation5 + $0x2c0] ss:$8 sps:$4 sm:$0xff]  }
  0xd8   :  { %2483 = vmatprep.subr.bf16.mxu0 %v3464_v29  ;;  %v3540_v29 = vld [vmem:[#allocation5 + $0x7c0] ss:$8 sps:$4 sm:$0xff]  }
  0xda   :  { %2279 = vmatpush1.bf16.msra.mxu1 %v3459_v31  ;;  %v3545_v31 = vld [vmem:[#allocation5 + $0x2d4] ss:$8 sps:$4 sm:$0xff]  }
  0xdb   :  { %2484 = vmatpush1.bf16.msra.mxu0 %v3462_v32  ;;  %2289 = vmatprep.subr.bf16.mxu1 %v3467_v33  ;;  %v3548_v32 = vld [vmem:[#allocation5 + $0x7d4] ss:$8 sps:$4 sm:$0xff]   ;;  %v3543_v33 = vld [vmem:[#allocation5 + $0x2d0] ss:$8 sps:$4 sm:$0xff]  }
  0xdc   :  { %2494 = vmatprep.subr.bf16.mxu0 %v3470_v34  ;;  %v3546_v34 = vld [vmem:[#allocation5 + $0x7d0] ss:$8 sps:$4 sm:$0xff]  }
  0xdd   :  { %2281 = vmatmul.mubr.bf16.vlgmr.msra.gmra.mrb[0].mxu1 %v471_v35  ;;  %v3554_v35 = vld [vmem:[#allocation5 + $0x7e4] ss:$8 sps:$4 sm:$0xff]  }
  0xde   :  { %2486 = vmatmul.mubr.bf16.vlgmr.msra.gmra.mrb[0].mxu0 %v4068_v36  ;;  %2290 = vmatpush1.bf16.msra.mxu1 %v3465_v37  ;;  %v3549_v37 = vld [vmem:[#allocation5 + $0x2e0] ss:$8 sps:$4 sm:$0xff]  }
  0xdf   :  { %2495 = vmatpush1.bf16.msra.mxu0 %v3468_v38  ;;  %2291 = vmatprep.subr.bf16.mxu1 %v3473_v39  ;;  %v4077_v38 = vld [vmem:[#allocation2 + $0x10] sm:$0x1f]  ;;  %v3552_v39 = vld [vmem:[#allocation5 + $0x7e0] ss:$8 sps:$4 sm:$0xff]  }
  0xe0   :  { %2496 = vmatprep.subr.bf16.mxu0 %v3476_v40  ;;  %2321 = vmatprep.mubr.bf16.mxu1 %v4071_v41  ;;  %v3557_v40 = vld [vmem:[#allocation5 + $0x2f4] ss:$8 sps:$4 sm:$0xff]  }
  0xe1   :  { %2526 = vmatprep.mubr.bf16.mxu0 %v523_v42  ;;  %v3560_v42 = vld [vmem:[#allocation5 + $0x7f4] ss:$8 sps:$4 sm:$0xff]  }
  0xe2   :  { %2292 = vmatpush1.bf16.msra.mxu1 %v3471_v14  ;;  %v4081_v14 = vrot.slane %v4077_v38, %v4021_v51 }
  0xe3   :  { %2497 = vmatpush1.bf16.msra.mxu0 %v3474_v21  ;;  %2293 = vmatprep.subr.bf16.mxu1 %v3479_v43  ;;  %v3555_v21 = vld [vmem:[#allocation5 + $0x2f0] ss:$8 sps:$4 sm:$0xff]  }
  0xe4   :  { %2498 = vmatprep.subr.bf16.mxu0 %v3482_v44  ;;  %v3558_v43 = vld [vmem:[#allocation5 + $0x7f0] ss:$8 sps:$4 sm:$0xff]   ;;  %v3563_v44 = vld [vmem:[#allocation5 + $0x304] ss:$8 sps:$4 sm:$0xff]  }
  0xe6   :  { %2294 = vmatpush1.bf16.msra.mxu1 %v3477_v46  ;;  %v3566_v46 = vld [vmem:[#allocation5 + $0x804] ss:$8 sps:$4 sm:$0xff]  }
  0xe7   :  { %2499 = vmatpush1.bf16.msra.mxu0 %v3480_v47  ;;  %2295 = vmatprep.subr.bf16.mxu1 %v3485_v28  ;;  %v539_v47 = vcombine.high %v4081_v14, %v4081_v14  ;;  %v3561_v28 = vld [vmem:[#allocation5 + $0x300] ss:$8 sps:$4 sm:$0xff]  }
  0xe8   :  { %2500 = vmatprep.subr.bf16.mxu0 %v3488_v48  ;;  %v4087_v48 = vrot.slane %v4060_v30, %v4021_v51  ;;  %v3567_v30 = vld [vmem:[#allocation5 + $0x310] ss:$8 sps:$4 sm:$0xff]  }
  0xea   :  { %2296 = vmatpush1.bf16.msra.mxu1 %v3483_v49  ;;  %v521_v49 = vcombine.high %v4068_v36, %v4068_v36  ;;  %v3570_v36 = vld [vmem:[#allocation5 + $0x810] ss:$8 sps:$4 sm:$0xff]  }
  0xeb   :  { %2501 = vmatpush1.bf16.msra.mxu0 %v3486_v50  ;;  %2297 = vmatprep.subr.bf16.mxu1 %v3491_v53  ;;  %v3564_v50 = vld [vmem:[#allocation5 + $0x800] ss:$8 sps:$4 sm:$0xff]   ;;  %v3569_v53 = vld [vmem:[#allocation5 + $0x314] ss:$8 sps:$4 sm:$0xff]  }
  0xec   :  { %2502 = vmatprep.subr.bf16.mxu0 %v3494_v54  ;;  %v3572_v54 = vld [vmem:[#allocation5 + $0x814] ss:$8 sps:$4 sm:$0xff]  }
  0xee   :  { %2298 = vmatpush1.bf16.msra.mxu1 %v3489_v55  ;;  %v474_v55 = vcombine.high %v4071_v41, %v4071_v41  ;;  %v3576_v41 = vld [vmem:[#allocation5 + $0x820] ss:$8 sps:$4 sm:$0xff]  }
  0xef   :  { %2503 = vmatpush1.bf16.msra.mxu0 %v3492_v56  ;;  %2299 = vmatprep.subr.bf16.mxu1 %v3497_v57  ;;  %v4094_v56 = vrot.slane %v539_v47, %v4021_v51  ;;  %v3575_v57 = vld [vmem:[#allocation5 + $0x324] ss:$8 sps:$4 sm:$0xff]   ;;  %v3642_v47 = vld [vmem:[#allocation5 + $0x8d0] ss:$8 sps:$4 sm:$0xff]  }
  0xf0   :  { %2504 = vmatprep.subr.bf16.mxu0 %v3500_v58  ;;  %v3578_v58 = vld [vmem:[#allocation5 + $0x824] ss:$8 sps:$4 sm:$0xff]  }
  0xf2   :  { %2300 = vmatpush1.bf16.msra.mxu1 %v3495_v59  ;;  %v3573_v59 = vld [vmem:[#allocation5 + $0x320] ss:$8 sps:$4 sm:$0xff]  }
  0xf3   :  { %2505 = vmatpush1.bf16.msra.mxu0 %v3498_v60  ;;  %2301 = vmatprep.subr.bf16.mxu1 %v3503_v61  ;;  %v3581_v60 = vld [vmem:[#allocation5 + $0x334] ss:$8 sps:$4 sm:$0xff]  }
  0xf4   :  { %2506 = vmatprep.subr.bf16.mxu0 %v3506_v62  ;;  %v3584_v61 = vld [vmem:[#allocation5 + $0x834] ss:$8 sps:$4 sm:$0xff]   ;;  %v3579_v62 = vld [vmem:[#allocation5 + $0x330] ss:$8 sps:$4 sm:$0xff]  }
  0xf6   :  { %2302 = vmatpush1.bf16.msra.mxu1 %v3501_v63  ;;  %v3582_v63 = vld [vmem:[#allocation5 + $0x830] ss:$8 sps:$4 sm:$0xff]  }
  0xf7   :  { %2507 = vmatpush1.bf16.msra.mxu0 %v3504_v0  ;;  %2303 = vmatprep.subr.bf16.mxu1 %v3509_v1  ;;  %v3587_v0 = vld [vmem:[#allocation5 + $0x344] ss:$8 sps:$4 sm:$0xff]  }
  0xf8   :  { %2508 = vmatprep.subr.bf16.mxu0 %v3512_v2  ;;  %v3590_v1 = vld [vmem:[#allocation5 + $0x844] ss:$8 sps:$4 sm:$0xff]   ;;  %v3585_v2 = vld [vmem:[#allocation5 + $0x340] ss:$8 sps:$4 sm:$0xff]  }
  0xfa   :  { %2304 = vmatpush1.bf16.msra.mxu1 %v3507_v4  ;;  %v3588_v4 = vld [vmem:[#allocation5 + $0x840] ss:$8 sps:$4 sm:$0xff]  }
  0xfb   :  { %2509 = vmatpush1.bf16.msra.mxu0 %v3510_v5  ;;  %2305 = vmatprep.subr.bf16.mxu1 %v3515_v6  ;;  %v3593_v5 = vld [vmem:[#allocation5 + $0x354] ss:$8 sps:$4 sm:$0xff]  }
  0xfc   :  { %2510 = vmatprep.subr.bf16.mxu0 %v3518_v7  ;;  %v3596_v6 = vld [vmem:[#allocation5 + $0x854] ss:$8 sps:$4 sm:$0xff]   ;;  %v3591_v7 = vld [vmem:[#allocation5 + $0x350] ss:$8 sps:$4 sm:$0xff]  }
  0xfe   :  { %2306 = vmatpush1.bf16.msra.mxu1 %v3513_v8  ;;  %v3594_v8 = vld [vmem:[#allocation5 + $0x850] ss:$8 sps:$4 sm:$0xff]  }
  0xff   :  { %2511 = vmatpush1.bf16.msra.mxu0 %v3516_v9  ;;  %2307 = vmatprep.subr.bf16.mxu1 %v3521_v10  ;;  %v3599_v9 = vld [vmem:[#allocation5 + $0x364] ss:$8 sps:$4 sm:$0xff]  }
 0x100   :  { %2512 = vmatprep.subr.bf16.mxu0 %v3524_v11  ;;  %v3602_v10 = vld [vmem:[#allocation5 + $0x864] ss:$8 sps:$4 sm:$0xff]   ;;  %v3597_v11 = vld [vmem:[#allocation5 + $0x360] ss:$8 sps:$4 sm:$0xff]  }
 0x102   :  { %2308 = vmatpush1.bf16.msra.mxu1 %v3519_v12  ;;  %v3600_v12 = vld [vmem:[#allocation5 + $0x860] ss:$8 sps:$4 sm:$0xff]  }
 0x103   :  { %2513 = vmatpush1.bf16.msra.mxu0 %v3522_v13  ;;  %2309 = vmatprep.subr.bf16.mxu1 %v3527_v16  ;;  %v3605_v13 = vld [vmem:[#allocation5 + $0x374] ss:$8 sps:$4 sm:$0xff]  }
 0x104   :  { %2514 = vmatprep.subr.bf16.mxu0 %v3530_v17  ;;  %v3608_v16 = vld [vmem:[#allocation5 + $0x874] ss:$8 sps:$4 sm:$0xff]   ;;  %v3603_v17 = vld [vmem:[#allocation5 + $0x370] ss:$8 sps:$4 sm:$0xff]  }
 0x106   :  { %2310 = vmatpush1.bf16.msra.mxu1 %v3525_v18  ;;  %v3606_v18 = vld [vmem:[#allocation5 + $0x870] ss:$8 sps:$4 sm:$0xff]  }
 0x107   :  { %2515 = vmatpush1.bf16.msra.mxu0 %v3528_v19  ;;  %2311 = vmatprep.subr.bf16.mxu1 %v3533_v20  ;;  %v3611_v19 = vld [vmem:[#allocation5 + $0x384] ss:$8 sps:$4 sm:$0xff]  }
 0x108   :  { %2516 = vmatprep.subr.bf16.mxu0 %v3536_v22  ;;  %v3614_v20 = vld [vmem:[#allocation5 + $0x884] ss:$8 sps:$4 sm:$0xff]   ;;  %v3609_v22 = vld [vmem:[#allocation5 + $0x380] ss:$8 sps:$4 sm:$0xff]  }
 0x10a   :  { %2312 = vmatpush1.bf16.msra.mxu1 %v3531_v23  ;;  %v3612_v23 = vld [vmem:[#allocation5 + $0x880] ss:$8 sps:$4 sm:$0xff]  }
 0x10b   :  { %2517 = vmatpush1.bf16.msra.mxu0 %v3534_v24  ;;  %2313 = vmatprep.subr.bf16.mxu1 %v3539_v25  ;;  %v3617_v24 = vld [vmem:[#allocation5 + $0x394] ss:$8 sps:$4 sm:$0xff]  }
 0x10c   :  { %2518 = vmatprep.subr.bf16.mxu0 %v3542_v26  ;;  %v3620_v25 = vld [vmem:[#allocation5 + $0x894] ss:$8 sps:$4 sm:$0xff]   ;;  %v3615_v26 = vld [vmem:[#allocation5 + $0x390] ss:$8 sps:$4 sm:$0xff]  }
 0x10e   :  { %2314 = vmatpush1.bf16.msra.mxu1 %v3537_v27  ;;  %v3618_v27 = vld [vmem:[#allocation5 + $0x890] ss:$8 sps:$4 sm:$0xff]  }
 0x10f   :  { %2519 = vmatpush1.bf16.msra.mxu0 %v3540_v29  ;;  %2315 = vmatprep.subr.bf16.mxu1 %v3545_v31  ;;  %v3623_v29 = vld [vmem:[#allocation5 + $0x3a4] ss:$8 sps:$4 sm:$0xff]  }
 0x110   :  { %2520 = vmatprep.subr.bf16.mxu0 %v3548_v32  ;;  %v3626_v31 = vld [vmem:[#allocation5 + $0x8a4] ss:$8 sps:$4 sm:$0xff]   ;;  %v3621_v32 = vld [vmem:[#allocation5 + $0x3a0] ss:$8 sps:$4 sm:$0xff]  }
 0x112   :  { %2316 = vmatpush1.bf16.msra.mxu1 %v3543_v33  ;;  %v3624_v33 = vld [vmem:[#allocation5 + $0x8a0] ss:$8 sps:$4 sm:$0xff]  }
 0x113   :  { %2521 = vmatpush1.bf16.msra.mxu0 %v3546_v34  ;;  %2317 = vmatprep.subr.bf16.mxu1 %v3551_v52  ;;  %v3629_v34 = vld [vmem:[#allocation5 + $0x3b4] ss:$8 sps:$4 sm:$0xff]  }
 0x114   :  { %2522 = vmatprep.subr.bf16.mxu0 %v3554_v35  ;;  %v3632_v52 = vld [vmem:[#allocation5 + $0x8b4] ss:$8 sps:$4 sm:$0xff]   ;;  %v3627_v35 = vld [vmem:[#allocation5 + $0x3b0] ss:$8 sps:$4 sm:$0xff]  }
 0x116   :  { %2318 = vmatpush1.bf16.msra.mxu1 %v3549_v37  ;;  %v3630_v37 = vld [vmem:[#allocation5 + $0x8b0] ss:$8 sps:$4 sm:$0xff]  }
 0x117   :  { %2523 = vmatpush1.bf16.msra.mxu0 %v3552_v39  ;;  %2319 = vmatprep.subr.bf16.mxu1 %v3557_v40  ;;  %v3635_v39 = vld [vmem:[#allocation5 + $0x3c4] ss:$8 sps:$4 sm:$0xff]  }
 0x118   :  { %2524 = vmatprep.subr.bf16.mxu0 %v3560_v42  ;;  %v3638_v40 = vld [vmem:[#allocation5 + $0x8c4] ss:$8 sps:$4 sm:$0xff]   ;;  %v3633_v42 = vld [vmem:[#allocation5 + $0x3c0] ss:$8 sps:$4 sm:$0xff]  }
 0x11a   :  { %2320 = vmatpush1.bf16.msra.mxu1 %v3555_v21  ;;  %v3636_v21 = vld [vmem:[#allocation5 + $0x8c0] ss:$8 sps:$4 sm:$0xff]  }
 0x11b   :  { %2525 = vmatpush1.bf16.msra.mxu0 %v3558_v43  ;;  %2330 = vmatprep.subr.bf16.mxu1 %v3563_v44  ;;  %v3641_v43 = vld [vmem:[#allocation5 + $0x3d4] ss:$8 sps:$4 sm:$0xff]  }
 0x11c   :  { %2535 = vmatprep.subr.bf16.mxu0 %v3566_v46  ;;  %v3644_v44 = vld [vmem:[#allocation5 + $0x8d4] ss:$8 sps:$4 sm:$0xff]   ;;  %v3639_v46 = vld [vmem:[#allocation5 + $0x3d0] ss:$8 sps:$4 sm:$0xff]  }
 0x11d   :  { %2322 = vmatmul.mubr.bf16.vlgmr.msra.gmra.mrb[0].mxu1 %v4087_v48 }
 0x11e   :  { %2527 = vmatmul.mubr.bf16.vlgmr.msra.gmra.mrb[0].mxu0 %v521_v49  ;;  %2331 = vmatpush1.bf16.msra.mxu1 %v3561_v28  ;;  %v3647_v28 = vld [vmem:[#allocation5 + $0x3e4] ss:$8 sps:$4 sm:$0xff]  }
 0x11f   :  { %2536 = vmatpush1.bf16.msra.mxu0 %v3564_v50  ;;  %2332 = vmatprep.subr.bf16.mxu1 %v3569_v53  ;;  %v3650_v49 = vld [vmem:[#allocation5 + $0x8e4] ss:$8 sps:$4 sm:$0xff]   ;;  %v3645_v50 = vld [vmem:[#allocation5 + $0x3e0] ss:$8 sps:$4 sm:$0xff]  }
 0x120   :  { %2537 = vmatprep.subr.bf16.mxu0 %v3572_v54  ;;  %2362 = vmatprep.mubr.bf16.mxu1 %v474_v55  ;;  %v3648_v53 = vld [vmem:[#allocation5 + $0x8e0] ss:$8 sps:$4 sm:$0xff]   ;;  %v3653_v54 = vld [vmem:[#allocation5 + $0x3f4] ss:$8 sps:$4 sm:$0xff]  }
 0x121   :  { %2567 = vmatprep.mubr.bf16.mxu0 %v4094_v56  ;;  %v3656_v55 = vld [vmem:[#allocation5 + $0x8f4] ss:$8 sps:$4 sm:$0xff]  }
 0x122   :  { %2333 = vmatpush1.bf16.msra.mxu1 %v3567_v30  ;;  %v3651_v30 = vld [vmem:[#allocation5 + $0x3f0] ss:$8 sps:$4 sm:$0xff]  }
 0x123   :  { %2538 = vmatpush1.bf16.msra.mxu0 %v3570_v36  ;;  %2334 = vmatprep.subr.bf16.mxu1 %v3575_v57  ;;  %v3654_v36 = vld [vmem:[#allocation5 + $0x8f0] ss:$8 sps:$4 sm:$0xff]   ;;  %v3659_v57 = vld [vmem:[#allocation5 + $0x404] ss:$8 sps:$4 sm:$0xff]  }
 0x124   :  { %2539 = vmatprep.subr.bf16.mxu0 %v3578_v58  ;;  %v3663_v58 = vld [vmem:[#allocation5 + $0x904] ss:$8 sps:$4 sm:$0xff]  }
 0x126   :  { %2335 = vmatpush1.bf16.msra.mxu1 %v3573_v59  ;;  %v472_v59 = vcombine.high %v4087_v48, %v4087_v48  ;;  %v3664_v48 = vld [vmem:[#allocation5 + $0x410] ss:$8 sps:$4 sm:$0xff]  }
 0x127   :  { %2540 = vmatpush1.bf16.msra.mxu0 %v3576_v41  ;;  %2336 = vmatprep.subr.bf16.mxu1 %v3581_v60  ;;  %v4102_v41 = vrot.slane %v4081_v14, %v4021_v51  ;;  %v3657_v60 = vld [vmem:[#allocation5 + $0x400] ss:$8 sps:$4 sm:$0xff]   ;;  %v3672_v14 = vld [vmem:[#allocation5 + $0x424] ss:$8 sps:$4 sm:$0xff]  }
 0x128   :  { %2541 = vmatprep.subr.bf16.mxu0 %v3584_v61  ;;  %v3661_v61 = vld [vmem:[#allocation5 + $0x900] ss:$8 sps:$4 sm:$0xff]  }
 0x12a   :  { %2337 = vmatpush1.bf16.msra.mxu1 %v3579_v62  ;;  %v3666_v62 = vld [vmem:[#allocation5 + $0x414] ss:$8 sps:$4 sm:$0xff]  }
 0x12b   :  { %2542 = vmatpush1.bf16.msra.mxu0 %v3582_v63  ;;  %2338 = vmatprep.subr.bf16.mxu1 %v3587_v0  ;;  %v3669_v63 = vld [vmem:[#allocation5 + $0x914] ss:$8 sps:$4 sm:$0xff]   ;;  %v562_v0 = vcombine.high %v4094_v56, %v4094_v56 }
 0x12c   :  { %2543 = vmatprep.subr.bf16.mxu0 %v3590_v1  ;;  %v3667_v1 = vld [vmem:[#allocation5 + $0x910] ss:$8 sps:$4 sm:$0xff]   ;;  %v3678_v56 = vld [vmem:[#allocation5 + $0x434] ss:$8 sps:$4 sm:$0xff]  }
 0x12e   :  { %2339 = vmatpush1.bf16.msra.mxu1 %v3585_v2  ;;  %v3675_v2 = vld [vmem:[#allocation5 + $0x924] ss:$8 sps:$4 sm:$0xff]  }
 0x12f   :  { %2544 = vmatpush1.bf16.msra.mxu0 %v3588_v4  ;;  %2340 = vmatprep.subr.bf16.mxu1 %v3593_v5  ;;  %v3670_v4 = vld [vmem:[#allocation5 + $0x420] ss:$8 sps:$4 sm:$0xff]  }
 0x130   :  { %2545 = vmatprep.subr.bf16.mxu0 %v3596_v6  ;;  %v3673_v5 = vld [vmem:[#allocation5 + $0x920] ss:$8 sps:$4 sm:$0xff]   ;;  %v3681_v6 = vld [vmem:[#allocation5 + $0x934] ss:$8 sps:$4 sm:$0xff]  }
 0x132   :  { %2341 = vmatpush1.bf16.msra.mxu1 %v3591_v7  ;;  %v3676_v7 = vld [vmem:[#allocation5 + $0x430] ss:$8 sps:$4 sm:$0xff]  }
 0x133   :  { %2546 = vmatpush1.bf16.msra.mxu0 %v3594_v8  ;;  %2342 = vmatprep.subr.bf16.mxu1 %v3599_v9  ;;  %v3679_v8 = vld [vmem:[#allocation5 + $0x930] ss:$8 sps:$4 sm:$0xff]   ;;  %v3684_v9 = vld [vmem:[#allocation5 + $0x444] ss:$8 sps:$4 sm:$0xff]  }
 0x134   :  { %2547 = vmatprep.subr.bf16.mxu0 %v3602_v10  ;;  %v3687_v10 = vld [vmem:[#allocation5 + $0x944] ss:$8 sps:$4 sm:$0xff]  }
 0x136   :  { %2343 = vmatpush1.bf16.msra.mxu1 %v3597_v11  ;;  %v3685_v11 = vld [vmem:[#allocation5 + $0x940] ss:$8 sps:$4 sm:$0xff]  }
 0x137   :  { %2548 = vmatpush1.bf16.msra.mxu0 %v3600_v12  ;;  %2344 = vmatprep.subr.bf16.mxu1 %v3605_v13  ;;  %v3690_v12 = vld [vmem:[#allocation5 + $0x454] ss:$8 sps:$4 sm:$0xff]  }
 0x138   :  { %2549 = vmatprep.subr.bf16.mxu0 %v3608_v16  ;;  %v3693_v13 = vld [vmem:[#allocation5 + $0x954] ss:$8 sps:$4 sm:$0xff]   ;;  %v3688_v16 = vld [vmem:[#allocation5 + $0x450] ss:$8 sps:$4 sm:$0xff]  }
 0x13a   :  { %2345 = vmatpush1.bf16.msra.mxu1 %v3603_v17  ;;  %v3691_v17 = vld [vmem:[#allocation5 + $0x950] ss:$8 sps:$4 sm:$0xff]  }
 0x13b   :  { %2550 = vmatpush1.bf16.msra.mxu0 %v3606_v18  ;;  %2346 = vmatprep.subr.bf16.mxu1 %v3611_v19  ;;  %v3696_v18 = vld [vmem:[#allocation5 + $0x464] ss:$8 sps:$4 sm:$0xff]  }
 0x13c   :  { %2551 = vmatprep.subr.bf16.mxu0 %v3614_v20  ;;  %v3699_v19 = vld [vmem:[#allocation5 + $0x964] ss:$8 sps:$4 sm:$0xff]   ;;  %v3694_v20 = vld [vmem:[#allocation5 + $0x460] ss:$8 sps:$4 sm:$0xff]  }
 0x13e   :  { %2347 = vmatpush1.bf16.msra.mxu1 %v3609_v22  ;;  %v3697_v22 = vld [vmem:[#allocation5 + $0x960] ss:$8 sps:$4 sm:$0xff]  }
 0x13f   :  { %2552 = vmatpush1.bf16.msra.mxu0 %v3612_v23  ;;  %2348 = vmatprep.subr.bf16.mxu1 %v3617_v24  ;;  %v3702_v23 = vld [vmem:[#allocation5 + $0x474] ss:$8 sps:$4 sm:$0xff]  }
 0x140   :  { %2553 = vmatprep.subr.bf16.mxu0 %v3620_v25  ;;  %v3705_v24 = vld [vmem:[#allocation5 + $0x974] ss:$8 sps:$4 sm:$0xff]   ;;  %v3700_v25 = vld [vmem:[#allocation5 + $0x470] ss:$8 sps:$4 sm:$0xff]  }
 0x142   :  { %2349 = vmatpush1.bf16.msra.mxu1 %v3615_v26  ;;  %v3703_v26 = vld [vmem:[#allocation5 + $0x970] ss:$8 sps:$4 sm:$0xff]  }
 0x143   :  { %2554 = vmatpush1.bf16.msra.mxu0 %v3618_v27  ;;  %2350 = vmatprep.subr.bf16.mxu1 %v3623_v29  ;;  %v3708_v27 = vld [vmem:[#allocation5 + $0x484] ss:$8 sps:$4 sm:$0xff]  }
 0x144   :  { %2555 = vmatprep.subr.bf16.mxu0 %v3626_v31  ;;  %v3711_v29 = vld [vmem:[#allocation5 + $0x984] ss:$8 sps:$4 sm:$0xff]   ;;  %v3706_v31 = vld [vmem:[#allocation5 + $0x480] ss:$8 sps:$4 sm:$0xff]  }
 0x146   :  { %2351 = vmatpush1.bf16.msra.mxu1 %v3621_v32  ;;  %v3709_v32 = vld [vmem:[#allocation5 + $0x980] ss:$8 sps:$4 sm:$0xff]  }
 0x147   :  { %2556 = vmatpush1.bf16.msra.mxu0 %v3624_v33  ;;  %2352 = vmatprep.subr.bf16.mxu1 %v3629_v34  ;;  %v3714_v33 = vld [vmem:[#allocation5 + $0x494] ss:$8 sps:$4 sm:$0xff]  }
 0x148   :  { %2557 = vmatprep.subr.bf16.mxu0 %v3632_v52  ;;  %v3717_v34 = vld [vmem:[#allocation5 + $0x994] ss:$8 sps:$4 sm:$0xff]   ;;  %v3712_v52 = vld [vmem:[#allocation5 + $0x490] ss:$8 sps:$4 sm:$0xff]  }
 0x14a   :  { %2353 = vmatpush1.bf16.msra.mxu1 %v3627_v35  ;;  %v3715_v35 = vld [vmem:[#allocation5 + $0x990] ss:$8 sps:$4 sm:$0xff]  }
 0x14b   :  { %2558 = vmatpush1.bf16.msra.mxu0 %v3630_v37  ;;  %2354 = vmatprep.subr.bf16.mxu1 %v3635_v39  ;;  %v3720_v37 = vld [vmem:[#allocation5 + $0x4a4] ss:$8 sps:$4 sm:$0xff]  }
 0x14c   :  { %2559 = vmatprep.subr.bf16.mxu0 %v3638_v40  ;;  %v3723_v39 = vld [vmem:[#allocation5 + $0x9a4] ss:$8 sps:$4 sm:$0xff]   ;;  %v3718_v40 = vld [vmem:[#allocation5 + $0x4a0] ss:$8 sps:$4 sm:$0xff]  }
 0x14e   :  { %2355 = vmatpush1.bf16.msra.mxu1 %v3633_v42  ;;  %v3721_v42 = vld [vmem:[#allocation5 + $0x9a0] ss:$8 sps:$4 sm:$0xff]  }
 0x14f   :  { %2560 = vmatpush1.bf16.msra.mxu0 %v3636_v21  ;;  %2356 = vmatprep.subr.bf16.mxu1 %v3641_v43  ;;  %v3726_v21 = vld [vmem:[#allocation5 + $0x4b4] ss:$8 sps:$4 sm:$0xff]  }
 0x150   :  { %2561 = vmatprep.subr.bf16.mxu0 %v3644_v44  ;;  %v3729_v43 = vld [vmem:[#allocation5 + $0x9b4] ss:$8 sps:$4 sm:$0xff]   ;;  %v3724_v44 = vld [vmem:[#allocation5 + $0x4b0] ss:$8 sps:$4 sm:$0xff]  }
 0x152   :  { %2357 = vmatpush1.bf16.msra.mxu1 %v3639_v46  ;;  %v3727_v46 = vld [vmem:[#allocation5 + $0x9b0] ss:$8 sps:$4 sm:$0xff]  }
 0x153   :  { %2562 = vmatpush1.bf16.msra.mxu0 %v3642_v47  ;;  %2358 = vmatprep.subr.bf16.mxu1 %v3647_v28  ;;  %v3732_v47 = vld [vmem:[#allocation5 + $0x4c4] ss:$8 sps:$4 sm:$0xff]  }
 0x154   :  { %2563 = vmatprep.subr.bf16.mxu0 %v3650_v49  ;;  %v3735_v28 = vld [vmem:[#allocation5 + $0x9c4] ss:$8 sps:$4 sm:$0xff]   ;;  %v3730_v49 = vld [vmem:[#allocation5 + $0x4c0] ss:$8 sps:$4 sm:$0xff]  }
 0x156   :  { %2359 = vmatpush1.bf16.msra.mxu1 %v3645_v50  ;;  %v3733_v50 = vld [vmem:[#allocation5 + $0x9c0] ss:$8 sps:$4 sm:$0xff]  }
 0x157   :  { %2564 = vmatpush1.bf16.msra.mxu0 %v3648_v53  ;;  %2360 = vmatprep.subr.bf16.mxu1 %v3653_v54  ;;  %v3738_v53 = vld [vmem:[#allocation5 + $0x4d4] ss:$8 sps:$4 sm:$0xff]  }
 0x158   :  { %2565 = vmatprep.subr.bf16.mxu0 %v3656_v55  ;;  %v3741_v54 = vld [vmem:[#allocation5 + $0x9d4] ss:$8 sps:$4 sm:$0xff]   ;;  %v3736_v55 = vld [vmem:[#allocation5 + $0x4d0] ss:$8 sps:$4 sm:$0xff]  }
 0x15a   :  { %2361 = vmatpush1.bf16.msra.mxu1 %v3651_v30  ;;  %v3739_v30 = vld [vmem:[#allocation5 + $0x9d0] ss:$8 sps:$4 sm:$0xff]  }
 0x15b   :  { %2566 = vmatpush1.bf16.msra.mxu0 %v3654_v36  ;;  %2371 = vmatprep.subr.bf16.mxu1 %v3659_v57  ;;  %v3744_v36 = vld [vmem:[#allocation5 + $0x4e4] ss:$8 sps:$4 sm:$0xff]  }
 0x15c   :  { %2576 = vmatprep.subr.bf16.mxu0 %v3663_v58  ;;  %v3747_v57 = vld [vmem:[#allocation5 + $0x9e4] ss:$8 sps:$4 sm:$0xff]   ;;  %v3742_v58 = vld [vmem:[#allocation5 + $0x4e0] ss:$8 sps:$4 sm:$0xff]  }
 0x15d   :  { %2363 = vmatmul.mubr.bf16.vlgmr.msra.gmra.mrb[0].mxu1 %v472_v59  ;;  %v3745_v59 = vld [vmem:[#allocation5 + $0x9e0] ss:$8 sps:$4 sm:$0xff]  }
 0x15e   :  { %2568 = vmatmul.mubr.bf16.vlgmr.msra.gmra.mrb[0].mxu0 %v4102_v41  ;;  %2372 = vmatpush1.bf16.msra.mxu1 %v3657_v60  ;;  %v3750_v60 = vld [vmem:[#allocation5 + $0x4f4] ss:$8 sps:$4 sm:$0xff]  }
 0x15f   :  { %2577 = vmatpush1.bf16.msra.mxu0 %v3661_v61  ;;  %2373 = vmatprep.subr.bf16.mxu1 %v3666_v62  ;;  %v3753_v61 = vld [vmem:[#allocation5 + $0x9f4] ss:$8 sps:$4 sm:$0xff]   ;;  %v3748_v62 = vld [vmem:[#allocation5 + $0x4f0] ss:$8 sps:$4 sm:$0xff]  }
 0x160   :  { %2578 = vmatprep.subr.bf16.mxu0 %v3669_v63  ;;  %2403 = vmatprep.mubr.bf16.mxu1 %v4032_v3  ;;  %v3682_v3 = vld [vmem:[#allocation5 + $0x440] ss:$8 sps:$4 sm:$0xff]   ;;  %v3751_v63 = vld [vmem:[#allocation5 + $0x9f0] ss:$8 sps:$4 sm:$0xff]  }
 0x161   :  { %2608 = vmatprep.mubr.bf16.mxu0 %v562_v0  ;;  %v3756_v0 = vld [vmem:[#allocation5 + $0xa04] ss:$8 sps:$4 sm:$0xff]  }
 0x162   :  { %2374 = vmatpush1.bf16.msra.mxu1 %v3664_v48  ;;  %v3760_v48 = vld [vmem:[#allocation8 + $0x40] sm:$0xff]  }
 0x163   :  { %2579 = vmatpush1.bf16.msra.mxu0 %v3667_v1  ;;  %2375 = vmatprep.subr.bf16.mxu1 %v3672_v14  ;;  %v561_v1 = vcombine.high %v4102_v41, %v4102_v41  ;;  %v3754_v14 = vld [vmem:[#allocation5 + $0xa00] ss:$8 sps:$4 sm:$0xff]  }
 0x164   :  { %2580 = vmatprep.subr.bf16.mxu0 %v3675_v2  ;;  %v3759_v2 = vld [vmem:[#allocation5 + $0xa14] ss:$8 sps:$4 sm:$0xff]   ;;  %v3763_v41 = vld [vmem:[#allocation8 + $0x8] sm:$0xff]  }
 0x166   :  { %2376 = vmatpush1.bf16.msra.mxu1 %v3670_v4  ;;  %v3761_v4 = vld [vmem:[#allocation8] sm:$0xff]  }
 0x167   :  { %2581 = vmatpush1.bf16.msra.mxu0 %v3673_v5  ;;  %2377 = vmatprep.subr.bf16.mxu1 %v3678_v56  ;;  %v3762_v5 = vld [vmem:[#allocation8 + $0x48] sm:$0xff]   ;;  %v524_v56 = vcombine.high %v4077_v38, %v4077_v38 }
 0x168   :  { %2582 = vmatprep.subr.bf16.mxu0 %v3681_v6  ;;  %v3757_v6 = vld [vmem:[#allocation5 + $0xa10] ss:$8 sps:$4 sm:$0xff]  }
 0x16a   :  { %2378 = vmatpush1.bf16.msra.mxu1 %v3676_v7  ;;  %v3926_v7 = vmov 0  }
 0x16b   :  { %2583 = vmatpush1.bf16.msra.mxu0 %v3679_v8  ;;  %2379 = vmatprep.subr.bf16.mxu1 %v3684_v9  ;;  %v3764_v8 = vld [vmem:[#allocation8 + $0x50] sm:$0xff]   ;;  %v538_v9 = vrot.slane %v524_v56, %v4021_v51 }
 0x16c   :  { %2584 = vmatprep.subr.bf16.mxu0 %v3687_v10  ;;  %v3765_v10 = vld [vmem:[#allocation8 + $0x10] sm:$0xff]  }
 0x16d   :  { %v553_v38 = vrot.slane %v538_v9, %v4021_v51  ;;  %v3774_v51 = vld [vmem:[#allocation8 + $0x78] sm:$0xff]  }
 0x16e   :  { %2380 = vmatpush1.bf16.msra.mxu1 %v3682_v3  ;;  %v3767_v3 = vld [vmem:[#allocation8 + $0x18] sm:$0xff]  }
 0x16f   :  { %2585 = vmatpush1.bf16.msra.mxu0 %v3685_v11  ;;  %2381 = vmatprep.subr.bf16.mxu1 %v3690_v12  ;;  %v3768_v11 = vld [vmem:[#allocation8 + $0x60] sm:$0xff]  }
 0x170   :  { %2586 = vmatprep.subr.bf16.mxu0 %v3693_v13  ;;  %v3769_v12 = vld [vmem:[#allocation8 + $0x20] sm:$0xff]   ;;  %v3770_v13 = vld [vmem:[#allocation8 + $0x68] sm:$0xff]  }
 0x172   :  { %2382 = vmatpush1.bf16.msra.mxu1 %v3688_v16  ;;  %v3771_v16 = vld [vmem:[#allocation8 + $0x28] sm:$0xff]  }
 0x173   :  { %2587 = vmatpush1.bf16.msra.mxu0 %v3691_v17  ;;  %2383 = vmatprep.subr.bf16.mxu1 %v3696_v18  ;;  %v3772_v17 = vld [vmem:[#allocation8 + $0x70] sm:$0xff]  }
 0x174   :  { %2588 = vmatprep.subr.bf16.mxu0 %v3699_v19  ;;  %v3773_v18 = vld [vmem:[#allocation8 + $0x30] sm:$0xff]   ;;  %v3775_v19 = vld [vmem:[#allocation8 + $0x38] sm:$0xff]  }
 0x176   :  { %2384 = vmatpush1.bf16.msra.mxu1 %v3694_v20 }
 0x177   :  { %2589 = vmatpush1.bf16.msra.mxu0 %v3697_v22  ;;  %2385 = vmatprep.subr.bf16.mxu1 %v3702_v23 }
 0x178   :  { %2590 = vmatprep.subr.bf16.mxu0 %v3705_v24  ;;  %v415_v24 = vsub.s32 0, %v4018_v45 }
 0x17a   :  { %2386 = vmatpush1.bf16.msra.mxu1 %v3700_v25 }
 0x17b   :  { %2591 = vmatpush1.bf16.msra.mxu0 %v3703_v26  ;;  %2387 = vmatprep.subr.bf16.mxu1 %v3708_v27  ;;  %v411_v26 = vld [vmem:[#allocation7] sm:$0x3]  ;;  %v419_v27 = vsub.s32 1, %v4018_v45 }
 0x17c   :  { %2592 = vmatprep.subr.bf16.mxu0 %v3711_v29  ;;  %v416_v29 = vrot.slane %v411_v26, %v415_v24 }
 0x17e   :  { %2388 = vmatpush1.bf16.msra.mxu1 %v3706_v31  ;;  %v420_v31 = vrot.slane %v411_v26, %v419_v27 }
 0x17f   :  { %2593 = vmatpush1.bf16.msra.mxu0 %v3709_v32  ;;  %2389 = vmatprep.subr.bf16.mxu1 %v3714_v33 }
 0x180   :  { %2594 = vmatprep.subr.bf16.mxu0 %v3717_v34 }
 0x182   :  { %2390 = vmatpush1.bf16.msra.mxu1 %v3712_v52 }
 0x183   :  { %2595 = vmatpush1.bf16.msra.mxu0 %v3715_v35  ;;  %2391 = vmatprep.subr.bf16.mxu1 %v3720_v37 }
 0x184   :  { %2596 = vmatprep.subr.bf16.mxu0 %v3723_v39 }
 0x186   :  { %2392 = vmatpush1.bf16.msra.mxu1 %v3718_v40 }
 0x187   :  { %2597 = vmatpush1.bf16.msra.mxu0 %v3721_v42  ;;  %2393 = vmatprep.subr.bf16.mxu1 %v3726_v21 }
 0x188   :  { %2598 = vmatprep.subr.bf16.mxu0 %v3729_v43 }
 0x18a   :  { %2394 = vmatpush1.bf16.msra.mxu1 %v3724_v44 }
 0x18b   :  { %2599 = vmatpush1.bf16.msra.mxu0 %v3727_v46  ;;  %2395 = vmatprep.subr.bf16.mxu1 %v3732_v47  ;;  %v3180_v47 = vld [vmem:[#allocation10] ss:$0 sm:$0xff] }
 0x18c   :  { %2600 = vmatprep.subr.bf16.mxu0 %v3735_v28 }
 0x18e   :  { %2396 = vmatpush1.bf16.msra.mxu1 %v3730_v49 }
 0x18f   :  { %2601 = vmatpush1.bf16.msra.mxu0 %v3733_v50  ;;  %2397 = vmatprep.subr.bf16.mxu1 %v3738_v53 }
 0x190   :  { %2602 = vmatprep.subr.bf16.mxu0 %v3741_v54 }
 0x192   :  { %2398 = vmatpush1.bf16.msra.mxu1 %v3736_v55 }
 0x193   :  { %2603 = vmatpush1.bf16.msra.mxu0 %v3739_v30  ;;  %2399 = vmatprep.subr.bf16.mxu1 %v3744_v36 }
 0x194   :  { %2604 = vmatprep.subr.bf16.mxu0 %v3747_v57 }
 0x196   :  { %2400 = vmatpush1.bf16.msra.mxu1 %v3742_v58 }
 0x197   :  { %2605 = vmatpush1.bf16.msra.mxu0 %v3745_v59  ;;  %2401 = vmatprep.subr.bf16.mxu1 %v3750_v60 }
 0x198   :  { %2606 = vmatprep.subr.bf16.mxu0 %v3753_v61 }
 0x19a   :  { %2402 = vmatpush1.bf16.msra.mxu1 %v3748_v62 }
 0x19b   :  { %2607 = vmatpush1.bf16.msra.mxu0 %v3751_v63  ;;  %3197 = vmatprep.subr.bf16.mxu1 %v3760_v48 }
 0x19c   :  { %2617 = vmatprep.subr.bf16.mxu0 %v3756_v0 }
 0x19d   :  { %2404 = vmatmul.mubr.bf16.vlgmr.msra.gmra.mrb[0].mxu1 %v4041_v15  ;;  %v3766_v15 = vld [vmem:[#allocation8 + $0x58] sm:$0xff]  }
 0x19e   :  { %2609 = vmatmul.mubr.bf16.vlgmr.msra.gmra.mrb[0].mxu0 %v561_v1  ;;  %3198 = vmatpush3.bf16.msra.mxu1 %v3761_v4 }
 0x19f   :  { %2618 = vmatpush1.bf16.msra.mxu0 %v3754_v14  ;;  %2649 = vmatprep.mubr.bf16.mxu0 %v3926_v7 }
 0x1a0   :  { %2619 = vmatprep.subr.bf16.mxu0 %v3759_v2  ;;  %3199 = vmatprep.subr.bf16.mxu1 %v3762_v5 }
 0x1a2   :  { %3200 = vmatpush3.bf16.msra.mxu1 %v3763_v41 }
 0x1a3   :  { %2620 = vmatpush1.bf16.msra.mxu0 %v3757_v6  ;;  %3201 = vmatprep.subr.bf16.mxu1 %v3764_v8 }
 0x1a6   :  { %3202 = vmatpush3.bf16.msra.mxu1 %v3765_v10 }
 0x1a7   :  { %3203 = vmatprep.subr.bf16.mxu1 %v3766_v15 }
 0x1aa   :  { %3179 = vmatmul.mubr.msk.bf16.vlgmr.msra.gmra.mrb[0].mxu0 %vm2203_vm0, %v553_v38  ;;  %3204 = vmatpush3.bf16.msra.mxu1 %v3767_v3 }
 0x1ab   :  { %3205 = vmatprep.subr.bf16.mxu1 %v3768_v11 }
 0x1ae   :  { %3206 = vmatpush3.bf16.msra.mxu1 %v3769_v12 }
 0x1af   :  { %3207 = vmatprep.subr.bf16.mxu1 %v3770_v13 }
 0x1b2   :  { %3208 = vmatpush3.bf16.msra.mxu1 %v3771_v16 }
 0x1b3   :  { %3209 = vmatprep.subr.bf16.mxu1 %v3772_v17 }
 0x1b6   :  { %3210 = vmatpush3.bf16.msra.mxu1 %v3773_v18 }
 0x1b7   :  { %3211 = vmatprep.subr.bf16.mxu1 %v3774_v51 }
 0x1ba   :  { %3212 = vmatpush3.bf16.msra.mxu1 %v3775_v19 }
 0x270   :  { %v2405_v20 = vpop.f32.mrb[0].mxu1 }
 0x271   :  { %v2407_v22 = vpop.f32.mrb[1].mxu1  ;;  %v3219_v32 = vadd.f32 %v2405_v20, %v416_v29 }
 0x272   :  { %v2409_v23 = vpop.f32.mrb[2].mxu1  ;;  %v3221_v33 = vadd.f32 %v2407_v22, %v420_v31 }
 0x273   :  { %v2410_v25 = vpop.f32.mrb[3].mxu1 }
 0x27d   :  { %v2651_v34 = vpop.f32.mrb[0].mxu0 }
 0x27e   :  { %v3220_v52 = vadd.f32 %v3219_v32, %v2651_v34  ;;  %v2653_v35 = vpop.f32.mrb[1].mxu0 }
 0x27f   :  { %v3222_v37 = vadd.f32 %v3221_v33, %v2653_v35  ;;  %v2655_v39 = vpop.f32.mrb[2].mxu0 }
 0x280   :  { %v2658_v40 = vmax.f32 %v3220_v52, 0.0  ;;  %v2656_v42 = vpop.f32.mrb[3].mxu0 }
 0x281   :  { %v2659_v21 = vmax.f32 %v3222_v37, 0.0 }
 0x282   :  { %v2660_v44 = vpack.c.bf16 %v2658_v40, %v2658_v40 }
 0x283   :  { %v2661_v43 = vpack.c.bf16 %v2659_v21, %v2659_v21 }
 0x285   :  { %2829 = vmatprep.mubr.bf16.mxu1 %v2661_v43 }
 0x286   :  { %2830 = vmatmul.mubr.bf16.vlgmr.msra.gmra.mrb[4].mxu1 %v2660_v44 }
 0x359   :  { %v3213_v46 = vpop.f32.mrb[4].mxu1 }
 0x35a   :  { %v3214_v28 = vpop.f32.mrb[5].mxu1 }
 0x35b   :  { %v3215_v45 = vadd.f32 %v3214_v28, %v3213_v46  ;;  %v3216_v49 = vpop.f32.mrb[6].mxu1 }
 0x35c   :  { %v3217_v50 = vpop.f32.mrb[7].mxu1 }
 0x35d   :  { %v2832_v53 = vadd.f32 %v3215_v45, %v3180_v47 }
 0x35f   :  { %2837 = vst [vmem:[#allocation11] sm:$0x3] %v2832_v53 }
 0x360   :  { %3897 = shalt.err (!%p3894_p2)
}
 0x361   :  { %s3898_s7 = scalar_lea.hbm %s4134_s5, 32 }
 0x362   :  { %p3899_p3 = scmp.ne.s32.totalorder %s4134_s5, %s3898_s7  ;;  %p3902_p4 = scmp.lt.u32.totalorder %s3898_s7, %s4134_s5 }
 0x364   :  { %p3904_p5 = pnand %p3902_p4, %p3899_p3 }
 0x366   :  { %3907 = shalt.err (!%p3904_p5)
}
 0x367   :  { %2847 = dma.vmem_to_hbm [thread:$0]  %s2845_s29, 32, %s4134_s5, [#allocation4]  }
 0x368   :  { %3914 = dma.done.wait [#allocation4], 32  }
 0x369   :  { %3915 = vsyncadd [#allocation4], 4294967264 }
 0x36a   :  { %2851 = vsyncpa [#allocation3], 1 }
 0x36b   :  { %2852 = vsyncpa [#allocation6], 1 }
 0x36c   :  { %2853 = vsyncpa [#allocation9], 1 }
 0x36d   :  { %2854 = vsyncpa [#allocation4], 1 }

</bundles_post_ra>
